<compile_context>
chip_gen: v5e
topology: v5e:2x2
jax: 0.10.0
libtpu: 0.0.40
codegen_flags: <defaults>
</compile_context>

<pallas_src>
import functools
import math

import jax
import jax.numpy as jnp
from jax.experimental import pallas as pl
from jax.experimental.pallas import tpu as pltpu

LN_EPS = 1e-5  # nn.LayerNorm default


# ------------------------------------------------------------------ helpers ---
def _layernorm(x, gamma, beta):
    mu = jnp.mean(x, axis=-1, keepdims=True)
    var = jnp.mean(jnp.square(x - mu), axis=-1, keepdims=True)
    return (x - mu) * jax.lax.rsqrt(var + LN_EPS) * gamma + beta


def sinusoidal_pos_encoding(max_len, d_model):
    # Matches PositionalEncoding: pe[:, 0::2] = sin, pe[:, 1::2] = cos.
    position = jnp.arange(max_len, dtype=jnp.float32)[:, None]
    div_term = jnp.exp(jnp.arange(0, d_model, 2, dtype=jnp.float32)
                       * (-math.log(10000.0) / d_model))
    ang = position * div_term                                   # (max_len, d_model//2)
    pe = jnp.stack([jnp.sin(ang), jnp.cos(ang)], axis=-1).reshape(max_len, d_model)
    return pe.astype(jnp.float32)


# ------------------------------------------------------------- fused kernel ---
def fused_forward_kernel(x_ref, we_ref, posb_ref, wqkvo_ref, vecs_ref,
                         w1_ref, b1_ref, w2_ref, lnf_ref, fcwb_ref,
                         o_ref, *, batch, seq, num_heads, num_layers):
    H = we_ref.shape[1]
    hd = H // num_heads
    M = batch * seq
    scale = 1.0 / math.sqrt(hd)

    # ---- embedding + (pre-tiled) positional encoding, embedding bias folded --
    h = jnp.dot(x_ref[...], we_ref[...], preferred_element_type=jnp.float32) + posb_ref[...]

    # ---- block-diagonal additive attention mask (built once, no extra DMA) ---
    # Same-sequence entries get 0, cross-sequence entries a large negative
    # value applied BEFORE the row-max so softmax stays per-sequence.
    row_ids = jax.lax.broadcasted_iota(jnp.int32, (M, M), 0)
    col_ids = jax.lax.broadcasted_iota(jnp.int32, (M, M), 1)
    same_seq = jnp.zeros((M, M), dtype=jnp.bool_)
    for b in range(batch):  # O(B) cheap VPU compares, executed once
        lo_, hi_ = b * seq, (b + 1) * seq
        r_in = (row_ids >= lo_) & (row_ids < hi_)
        c_in = (col_ids >= lo_) & (col_ids < hi_)
        same_seq = same_seq | (r_in & c_in)
    attn_bias = jnp.where(same_seq, 0.0, -1e9).astype(jnp.float32)

    # ---- transformer encoder layers (post-norm, ReLU FFN, eval-mode dropout) --
    # TODO(synk): nn.Dropout layers are identity here (inference mode).
    # Static unroll is fine for num_layers=3; switch to lax.fori_loop if L grows.
    for l in range(num_layers):
        bq = vecs_ref[l, 0:1, :]
        bk = vecs_ref[l, 1:2, :]
        bv = vecs_ref[l, 2:3, :]
        bo = vecs_ref[l, 3:4, :]
        n1g = vecs_ref[l, 4:5, :]
        n1b = vecs_ref[l, 5:6, :]
        b2 = vecs_ref[l, 6:7, :]
        n2g = vecs_ref[l, 7:8, :]
        n2b = vecs_ref[l, 8:9, :]

        # three separate lane-aligned projections (no 3H-wide slicing)
        q = jnp.dot(h, wqkvo_ref[l, 0], preferred_element_type=jnp.float32) + bq
        k = jnp.dot(h, wqkvo_ref[l, 1], preferred_element_type=jnp.float32) + bk
        v = jnp.dot(h, wqkvo_ref[l, 2], preferred_element_type=jnp.float32) + bv
        wo = wqkvo_ref[l, 3]

        # attention over all B*S rows at once, heads unrolled (tiny & static)
        attn = None
        for hh in range(num_heads):
            lo, hi = hh * hd, (hh + 1) * hd
            s = jax.lax.dot_general(q[:, lo:hi], k[:, lo:hi],
                                    (((1,), (1,)), ((), ())),
                                    preferred_element_type=jnp.float32)
            s = s * scale + attn_bias
            s = s - jnp.max(s, axis=-1, keepdims=True)
            p = jnp.exp(s)
            p = p * pl.reciprocal(jnp.sum(p, axis=-1, keepdims=True), approx=True)
            oh = jnp.dot(p, v[:, lo:hi], preferred_element_type=jnp.float32)
            # out_proj applied per head slice and summed == concat(heads) @ Wo
            contrib = jnp.dot(oh, wo[lo:hi, :], preferred_element_type=jnp.float32)
            attn = contrib if attn is None else attn + contrib
        attn = attn + bo

        h = _layernorm(h + attn, n1g, n1b)

        ff = jnp.maximum(
            jnp.dot(h, w1_ref[l], preferred_element_type=jnp.float32) + b1_ref[l], 0.0)
        ff = jnp.dot(ff, w2_ref[l], preferred_element_type=jnp.float32) + b2
        h = _layernorm(h + ff, n2g, n2b)

    # ---- mean over seq (sublane mean), final LayerNorm, classifier -----------
    pooled = jnp.mean(h.reshape(batch, seq, H), axis=1)          # (B, H)
    pooled = _layernorm(pooled, lnf_ref[0:1, :], lnf_ref[1:2, :])
    o_ref[...] = (jnp.dot(pooled, fcwb_ref[0:H, :], preferred_element_type=jnp.float32)
                  + fcwb_ref[H:H + 1, :])


# ------------------------------------------------------------------ wrapper ---
def forward(x, params, *, num_heads):
    B, S, F_in = x.shape
    H = params["we"].shape[1]
    L = params["wqkvo"].shape[0]
    C = params["fcwb"].shape[1]
    M = B * S
    hd = H // num_heads

    # Positional encoding pre-tiled to (M, H) with the embedding bias folded in
    # (done outside the kernel; avoids an in-kernel concatenate + one DMA input).
    posb = jnp.tile(params["pos"][:S], (B, 1)) + params["be"]

    args = (x.reshape(M, F_in), params["we"], posb,
            params["wqkvo"], params["vecs"],
            params["w1"], params["b1"], params["w2"],
            params["lnf"], params["fcwb"])

    # advisory cost estimate for the XLA scheduler
    flops = 2 * M * F_in * H
    flops += L * (3 * 2 * M * H * H
                  + num_heads * (2 * M * M * hd + 2 * M * M * hd + 2 * M * hd * H)
                  + 2 * 2 * M * H * 4 * H)
    flops += 2 * B * H * C
    trans = L * num_heads * M * M + 2 * L * M + B
    bytes_acc = sum(int(a.size) * a.dtype.itemsize for a in args) + B * C * 4

    kernel = functools.partial(fused_forward_kernel, batch=B, seq=S,
                               num_heads=num_heads, num_layers=L)
    return pl.pallas_call(
        kernel,
        out_shape=jax.ShapeDtypeStruct((B, C), jnp.float32),
        in_specs=[pl.BlockSpec(memory_space=pltpu.MemorySpace.VMEM) for _ in args],
        out_specs=pl.BlockSpec(memory_space=pltpu.MemorySpace.VMEM),
        compiler_params=pltpu.CompilerParams(vmem_limit_bytes=32 * 1024 * 1024),
        cost_estimate=pl.CostEstimate(flops=int(flops), transcendentals=int(trans),
                                      bytes_accessed=int(bytes_acc)),
    )(*args)


# --------------------------------------------------------------- parameters ---
def init_params(key, *, input_size, hidden, num_layers, num_classes, max_len=500):
    keys = iter(jax.random.split(key, 128))

    def rnd(shape, scale=None):
        if scale is None:
            scale = 1.0 / math.sqrt(shape[-2])
        return (scale * jax.random.normal(next(keys), shape)).astype(jnp.float32)

    H, L, C = hidden, num_layers, num_classes
    ones = jnp.ones((H,), jnp.float32)
    zeros = jnp.zeros((H,), jnp.float32)

    def bias_vec():
        return (0.02 * jax.random.normal(next(keys), (H,))).astype(jnp.float32)

    wqkvo, vecs, w1, b1, w2 = [], [], [], [], []
    for _ in range(L):
        # [Wq, Wk, Wv, Wo] stacked -> (4, H, H)
        wqkvo.append(jnp.stack([rnd((H, H)) for _ in range(4)], axis=0))
        # per-layer (H,)-vectors packed: [bq, bk, bv, bo, ln1_g, ln1_b, b2, ln2_g, ln2_b]
        bq, bk, bv, bo, b2 = bias_vec(), bias_vec(), bias_vec(), bias_vec(), bias_vec()
        vecs.append(jnp.stack([bq, bk, bv, bo, ones, zeros, b2, ones, zeros], axis=0))
        w1.append(rnd((H, 4 * H)))
        b1.append(rnd((1, 4 * H), 0.02))
        w2.append(rnd((4 * H, H)))

    return {
        # embedding (stored as (in, out) so kernels compute x @ W + b)
        "we": rnd((input_size, H)), "be": rnd((1, H), 0.02),
        # fixed sinusoidal positional encoding (buffer, not a parameter)
        "pos": sinusoidal_pos_encoding(max_len, H),
        # packed per-layer weights
        "wqkvo": jnp.stack(wqkvo, axis=0),           # (L, 4, H, H)
        "vecs": jnp.stack(vecs, axis=0),             # (L, 9, H)
        "w1": jnp.stack(w1, axis=0),                 # (L, H, 4H)
        "b1": jnp.stack(b1, axis=0),                 # (L, 1, 4H)
        "w2": jnp.stack(w2, axis=0),                 # (L, 4H, H)
        # final LayerNorm [gamma; beta] and classifier [W; b]
        "lnf": jnp.stack([ones, zeros], axis=0),     # (2, H)
        "fcwb": jnp.concatenate([rnd((H, C)), rnd((1, C), 0.02)], axis=0),  # (H+1, C)
    }


# --------------------------------------------------------------------- main ---
if __name__ == "__main__":
    B, S, F_IN = 2, 8, 6                 # batch, seq, input_size
    HIDDEN, N_HEADS, N_LAYERS, N_CLASSES = 32, 4, 3, 5

    key = jax.random.PRNGKey(0)
    kx, kp = jax.random.split(key)
    x = jax.random.normal(kx, (B, S, F_IN), dtype=jnp.float32)
    params = init_params(kp, input_size=F_IN, hidden=HIDDEN,
                         num_layers=N_LAYERS, num_classes=N_CLASSES, max_len=500)

    fwd = jax.jit(functools.partial(forward, num_heads=N_HEADS))
    out = fwd(x, params)
    jax.block_until_ready(out)
    assert out.shape == (B, N_CLASSES) and out.dtype == jnp.float32
    assert bool(jnp.all(jnp.isfinite(out)))
    print("KERNEL_OK")
</pallas_src>

<mosaic_0001>
module attributes {stable_mosaic.version = 11 : i64} {
  func.func @fused_forward_kernel(%arg0: memref<16x6xf32, #tpu.memory_space<vmem>>, %arg1: memref<6x32xf32, #tpu.memory_space<vmem>>, %arg2: memref<16x32xf32, #tpu.memory_space<vmem>>, %arg3: memref<3x4x32x32xf32, #tpu.memory_space<vmem>>, %arg4: memref<3x9x32xf32, #tpu.memory_space<vmem>>, %arg5: memref<3x32x128xf32, #tpu.memory_space<vmem>>, %arg6: memref<3x1x128xf32, #tpu.memory_space<vmem>>, %arg7: memref<3x128x32xf32, #tpu.memory_space<vmem>>, %arg8: memref<2x32xf32, #tpu.memory_space<vmem>>, %arg9: memref<33x5xf32, #tpu.memory_space<vmem>>, %arg10: memref<2x5xf32, #tpu.memory_space<vmem>>) attributes {dimension_semantics = [], scalar_prefetch = 0 : i64, scratch_operands = 0 : i64, tpu.core_type = #tpu.core_type<tc>} {
    %c0 = arith.constant 0 : index
    %c0_0 = arith.constant 0 : index
    %0 = vector.load %arg0[%c0, %c0_0] : memref<16x6xf32, #tpu.memory_space<vmem>>, vector<16x6xf32>
    %c0_1 = arith.constant 0 : index
    %c0_2 = arith.constant 0 : index
    %1 = vector.load %arg1[%c0_1, %c0_2] : memref<6x32xf32, #tpu.memory_space<vmem>>, vector<6x32xf32>
    %cst = arith.constant dense<0.000000e+00> : vector<16x32xf32>
    %2 = tpu.matmul %0, %1, %cst {dimension_numbers = #tpu.dot_dimension_numbers<[1], [0], [0], [1], [0, 0, 1, 1], [], []>} : vector<16x6xf32>, vector<6x32xf32>, vector<16x32xf32> -> vector<16x32xf32>
    %c0_3 = arith.constant 0 : index
    %c0_4 = arith.constant 0 : index
    %3 = vector.load %arg2[%c0_3, %c0_4] : memref<16x32xf32, #tpu.memory_space<vmem>>, vector<16x32xf32>
    %4 = arith.addf %2, %3 : vector<16x32xf32>
    %5 = tpu.iota {dimensions = array<i32: 0>} : vector<16x16xi32>
    %6 = tpu.iota {dimensions = array<i32: 1>} : vector<16x16xi32>
    %false = arith.constant false
    %7 = vector.broadcast %false : i1 to vector<16x16xi1>
    %c0_i32 = arith.constant 0 : i32
    %8 = vector.broadcast %c0_i32 : i32 to vector<16x16xi32>
    %9 = arith.cmpi sge, %5, %8 : vector<16x16xi32>
    %c8_i32 = arith.constant 8 : i32
    %10 = vector.broadcast %c8_i32 : i32 to vector<16x16xi32>
    %11 = arith.cmpi slt, %5, %10 : vector<16x16xi32>
    %12 = arith.andi %9, %11 : vector<16x16xi1>
    %c0_i32_5 = arith.constant 0 : i32
    %13 = vector.broadcast %c0_i32_5 : i32 to vector<16x16xi32>
    %14 = arith.cmpi sge, %6, %13 : vector<16x16xi32>
    %c8_i32_6 = arith.constant 8 : i32
    %15 = vector.broadcast %c8_i32_6 : i32 to vector<16x16xi32>
    %16 = arith.cmpi slt, %6, %15 : vector<16x16xi32>
    %17 = arith.andi %14, %16 : vector<16x16xi1>
    %18 = arith.andi %12, %17 : vector<16x16xi1>
    %19 = arith.ori %7, %18 : vector<16x16xi1>
    %c8_i32_7 = arith.constant 8 : i32
    %20 = vector.broadcast %c8_i32_7 : i32 to vector<16x16xi32>
    %21 = arith.cmpi sge, %5, %20 : vector<16x16xi32>
    %c16_i32 = arith.constant 16 : i32
    %22 = vector.broadcast %c16_i32 : i32 to vector<16x16xi32>
    %23 = arith.cmpi slt, %5, %22 : vector<16x16xi32>
    %24 = arith.andi %21, %23 : vector<16x16xi1>
    %c8_i32_8 = arith.constant 8 : i32
    %25 = vector.broadcast %c8_i32_8 : i32 to vector<16x16xi32>
    %26 = arith.cmpi sge, %6, %25 : vector<16x16xi32>
    %c16_i32_9 = arith.constant 16 : i32
    %27 = vector.broadcast %c16_i32_9 : i32 to vector<16x16xi32>
    %28 = arith.cmpi slt, %6, %27 : vector<16x16xi32>
    %29 = arith.andi %26, %28 : vector<16x16xi1>
    %30 = arith.andi %24, %29 : vector<16x16xi1>
    %31 = arith.ori %19, %30 : vector<16x16xi1>
    %cst_10 = arith.constant 0.000000e+00 : f32
    %cst_11 = arith.constant -1.000000e+09 : f32
    %32 = vector.broadcast %cst_10 : f32 to vector<16x16xf32>
    %33 = vector.broadcast %cst_11 : f32 to vector<16x16xf32>
    %34 = arith.select %31, %32, %33 : vector<16x16xi1>, vector<16x16xf32>
    %c0_12 = arith.constant 0 : index
    %c0_13 = arith.constant 0 : index
    %c0_14 = arith.constant 0 : index
    %35 = vector.load %arg4[%c0_12, %c0_13, %c0_14] : memref<3x9x32xf32, #tpu.memory_space<vmem>>, vector<1x1x32xf32>
    %36 = vector.shape_cast %35 : vector<1x1x32xf32> to vector<1x32xf32>
    %c0_15 = arith.constant 0 : index
    %c1 = arith.constant 1 : index
    %c0_16 = arith.constant 0 : index
    %37 = vector.load %arg4[%c0_15, %c1, %c0_16] : memref<3x9x32xf32, #tpu.memory_space<vmem>>, vector<1x1x32xf32>
    %38 = vector.shape_cast %37 : vector<1x1x32xf32> to vector<1x32xf32>
    %c0_17 = arith.constant 0 : index
    %c2 = arith.constant 2 : index
    %c0_18 = arith.constant 0 : index
    %39 = vector.load %arg4[%c0_17, %c2, %c0_18] : memref<3x9x32xf32, #tpu.memory_space<vmem>>, vector<1x1x32xf32>
    %40 = vector.shape_cast %39 : vector<1x1x32xf32> to vector<1x32xf32>
    %c0_19 = arith.constant 0 : index
    %c3 = arith.constant 3 : index
    %c0_20 = arith.constant 0 : index
    %41 = vector.load %arg4[%c0_19, %c3, %c0_20] : memref<3x9x32xf32, #tpu.memory_space<vmem>>, vector<1x1x32xf32>
    %42 = vector.shape_cast %41 : vector<1x1x32xf32> to vector<1x32xf32>
    %c0_21 = arith.constant 0 : index
    %c4 = arith.constant 4 : index
    %c0_22 = arith.constant 0 : index
    %43 = vector.load %arg4[%c0_21, %c4, %c0_22] : memref<3x9x32xf32, #tpu.memory_space<vmem>>, vector<1x1x32xf32>
    %44 = vector.shape_cast %43 : vector<1x1x32xf32> to vector<1x32xf32>
    %c0_23 = arith.constant 0 : index
    %c5 = arith.constant 5 : index
    %c0_24 = arith.constant 0 : index
    %45 = vector.load %arg4[%c0_23, %c5, %c0_24] : memref<3x9x32xf32, #tpu.memory_space<vmem>>, vector<1x1x32xf32>
    %46 = vector.shape_cast %45 : vector<1x1x32xf32> to vector<1x32xf32>
    %c0_25 = arith.constant 0 : index
    %c6 = arith.constant 6 : index
    %c0_26 = arith.constant 0 : index
    %47 = vector.load %arg4[%c0_25, %c6, %c0_26] : memref<3x9x32xf32, #tpu.memory_space<vmem>>, vector<1x1x32xf32>
    %48 = vector.shape_cast %47 : vector<1x1x32xf32> to vector<1x32xf32>
    %c0_27 = arith.constant 0 : index
    %c7 = arith.constant 7 : index
    %c0_28 = arith.constant 0 : index
    %49 = vector.load %arg4[%c0_27, %c7, %c0_28] : memref<3x9x32xf32, #tpu.memory_space<vmem>>, vector<1x1x32xf32>
    %50 = vector.shape_cast %49 : vector<1x1x32xf32> to vector<1x32xf32>
    %c0_29 = arith.constant 0 : index
    %c8 = arith.constant 8 : index
    %c0_30 = arith.constant 0 : index
    %51 = vector.load %arg4[%c0_29, %c8, %c0_30] : memref<3x9x32xf32, #tpu.memory_space<vmem>>, vector<1x1x32xf32>
    %52 = vector.shape_cast %51 : vector<1x1x32xf32> to vector<1x32xf32>
    %c0_31 = arith.constant 0 : index
    %c0_32 = arith.constant 0 : index
    %c0_33 = arith.constant 0 : index
    %c0_34 = arith.constant 0 : index
    %53 = vector.load %arg3[%c0_31, %c0_32, %c0_33, %c0_34] : memref<3x4x32x32xf32, #tpu.memory_space<vmem>>, vector<1x1x32x32xf32>
    %54 = vector.shape_cast %53 : vector<1x1x32x32xf32> to vector<32x32xf32>
    %cst_35 = arith.constant dense<0.000000e+00> : vector<16x32xf32>
    %55 = tpu.matmul %4, %54, %cst_35 {dimension_numbers = #tpu.dot_dimension_numbers<[1], [0], [0], [1], [0, 0, 1, 1], [], []>} : vector<16x32xf32>, vector<32x32xf32>, vector<16x32xf32> -> vector<16x32xf32>
    %56 = vector.broadcast %36 : vector<1x32xf32> to vector<16x32xf32>
    %57 = arith.addf %55, %56 : vector<16x32xf32>
    %c0_36 = arith.constant 0 : index
    %c1_37 = arith.constant 1 : index
    %c0_38 = arith.constant 0 : index
    %c0_39 = arith.constant 0 : index
    %58 = vector.load %arg3[%c0_36, %c1_37, %c0_38, %c0_39] : memref<3x4x32x32xf32, #tpu.memory_space<vmem>>, vector<1x1x32x32xf32>
    %59 = vector.shape_cast %58 : vector<1x1x32x32xf32> to vector<32x32xf32>
    %cst_40 = arith.constant dense<0.000000e+00> : vector<16x32xf32>
    %60 = tpu.matmul %4, %59, %cst_40 {dimension_numbers = #tpu.dot_dimension_numbers<[1], [0], [0], [1], [0, 0, 1, 1], [], []>} : vector<16x32xf32>, vector<32x32xf32>, vector<16x32xf32> -> vector<16x32xf32>
    %61 = vector.broadcast %38 : vector<1x32xf32> to vector<16x32xf32>
    %62 = arith.addf %60, %61 : vector<16x32xf32>
    %c0_41 = arith.constant 0 : index
    %c2_42 = arith.constant 2 : index
    %c0_43 = arith.constant 0 : index
    %c0_44 = arith.constant 0 : index
    %63 = vector.load %arg3[%c0_41, %c2_42, %c0_43, %c0_44] : memref<3x4x32x32xf32, #tpu.memory_space<vmem>>, vector<1x1x32x32xf32>
    %64 = vector.shape_cast %63 : vector<1x1x32x32xf32> to vector<32x32xf32>
    %cst_45 = arith.constant dense<0.000000e+00> : vector<16x32xf32>
    %65 = tpu.matmul %4, %64, %cst_45 {dimension_numbers = #tpu.dot_dimension_numbers<[1], [0], [0], [1], [0, 0, 1, 1], [], []>} : vector<16x32xf32>, vector<32x32xf32>, vector<16x32xf32> -> vector<16x32xf32>
    %66 = vector.broadcast %40 : vector<1x32xf32> to vector<16x32xf32>
    %67 = arith.addf %65, %66 : vector<16x32xf32>
    %c0_46 = arith.constant 0 : index
    %c3_47 = arith.constant 3 : index
    %c0_48 = arith.constant 0 : index
    %c0_49 = arith.constant 0 : index
    %68 = vector.load %arg3[%c0_46, %c3_47, %c0_48, %c0_49] : memref<3x4x32x32xf32, #tpu.memory_space<vmem>>, vector<1x1x32x32xf32>
    %69 = vector.shape_cast %68 : vector<1x1x32x32xf32> to vector<32x32xf32>
    %70 = vector.extract_strided_slice %57 {offsets = [0, 0], sizes = [16, 8], strides = [1, 1]} : vector<16x32xf32> to vector<16x8xf32>
    %71 = vector.extract_strided_slice %62 {offsets = [0, 0], sizes = [16, 8], strides = [1, 1]} : vector<16x32xf32> to vector<16x8xf32>
    %cst_50 = arith.constant dense<0.000000e+00> : vector<16x16xf32>
    %72 = tpu.matmul %70, %71, %cst_50 {dimension_numbers = #tpu.dot_dimension_numbers<[1], [1], [0], [0], [0, 0, 1, 0], [], []>} : vector<16x8xf32>, vector<16x8xf32>, vector<16x16xf32> -> vector<16x16xf32>
    %cst_51 = arith.constant 0.353553385 : f32
    %73 = vector.broadcast %cst_51 : f32 to vector<16x16xf32>
    %74 = arith.mulf %72, %73 : vector<16x16xf32>
    %75 = arith.addf %74, %34 : vector<16x16xf32>
    %cst_52 = arith.constant dense<0xFF800000> : vector<16xf32>
    %76 = vector.multi_reduction <maximumf>, %75, %cst_52 [1] : vector<16x16xf32> to vector<16xf32>
    %77 = vector.shape_cast %76 : vector<16xf32> to vector<16x1xf32>
    %78 = vector.broadcast %77 : vector<16x1xf32> to vector<16x16xf32>
    %79 = arith.subf %75, %78 : vector<16x16xf32>
    %80 = math.exp %79 : vector<16x16xf32>
    %cst_53 = arith.constant dense<0.000000e+00> : vector<16xf32>
    %81 = vector.multi_reduction <add>, %80, %cst_53 [1] : vector<16x16xf32> to vector<16xf32>
    %82 = vector.shape_cast %81 : vector<16xf32> to vector<16x1xf32>
    %83 = tpu.reciprocal %82 {approx = true} : vector<16x1xf32> -> vector<16x1xf32>
    %84 = vector.broadcast %83 : vector<16x1xf32> to vector<16x16xf32>
    %85 = arith.mulf %80, %84 : vector<16x16xf32>
    %86 = vector.extract_strided_slice %67 {offsets = [0, 0], sizes = [16, 8], strides = [1, 1]} : vector<16x32xf32> to vector<16x8xf32>
    %cst_54 = arith.constant dense<0.000000e+00> : vector<16x8xf32>
    %87 = tpu.matmul %85, %86, %cst_54 {dimension_numbers = #tpu.dot_dimension_numbers<[1], [0], [0], [1], [0, 0, 1, 1], [], []>} : vector<16x16xf32>, vector<16x8xf32>, vector<16x8xf32> -> vector<16x8xf32>
    %88 = vector.extract_strided_slice %69 {offsets = [0, 0], sizes = [8, 32], strides = [1, 1]} : vector<32x32xf32> to vector<8x32xf32>
    %cst_55 = arith.constant dense<0.000000e+00> : vector<16x32xf32>
    %89 = tpu.matmul %87, %88, %cst_55 {dimension_numbers = #tpu.dot_dimension_numbers<[1], [0], [0], [1], [0, 0, 1, 1], [], []>} : vector<16x8xf32>, vector<8x32xf32>, vector<16x32xf32> -> vector<16x32xf32>
    %90 = vector.extract_strided_slice %57 {offsets = [0, 8], sizes = [16, 8], strides = [1, 1]} : vector<16x32xf32> to vector<16x8xf32>
    %91 = vector.extract_strided_slice %62 {offsets = [0, 8], sizes = [16, 8], strides = [1, 1]} : vector<16x32xf32> to vector<16x8xf32>
    %cst_56 = arith.constant dense<0.000000e+00> : vector<16x16xf32>
    %92 = tpu.matmul %90, %91, %cst_56 {dimension_numbers = #tpu.dot_dimension_numbers<[1], [1], [0], [0], [0, 0, 1, 0], [], []>} : vector<16x8xf32>, vector<16x8xf32>, vector<16x16xf32> -> vector<16x16xf32>
    %cst_57 = arith.constant 0.353553385 : f32
    %93 = vector.broadcast %cst_57 : f32 to vector<16x16xf32>
    %94 = arith.mulf %92, %93 : vector<16x16xf32>
    %95 = arith.addf %94, %34 : vector<16x16xf32>
    %cst_58 = arith.constant dense<0xFF800000> : vector<16xf32>
    %96 = vector.multi_reduction <maximumf>, %95, %cst_58 [1] : vector<16x16xf32> to vector<16xf32>
    %97 = vector.shape_cast %96 : vector<16xf32> to vector<16x1xf32>
    %98 = vector.broadcast %97 : vector<16x1xf32> to vector<16x16xf32>
    %99 = arith.subf %95, %98 : vector<16x16xf32>
    %100 = math.exp %99 : vector<16x16xf32>
    %cst_59 = arith.constant dense<0.000000e+00> : vector<16xf32>
    %101 = vector.multi_reduction <add>, %100, %cst_59 [1] : vector<16x16xf32> to vector<16xf32>
    %102 = vector.shape_cast %101 : vector<16xf32> to vector<16x1xf32>
    %103 = tpu.reciprocal %102 {approx = true} : vector<16x1xf32> -> vector<16x1xf32>
    %104 = vector.broadcast %103 : vector<16x1xf32> to vector<16x16xf32>
    %105 = arith.mulf %100, %104 : vector<16x16xf32>
    %106 = vector.extract_strided_slice %67 {offsets = [0, 8], sizes = [16, 8], strides = [1, 1]} : vector<16x32xf32> to vector<16x8xf32>
    %cst_60 = arith.constant dense<0.000000e+00> : vector<16x8xf32>
    %107 = tpu.matmul %105, %106, %cst_60 {dimension_numbers = #tpu.dot_dimension_numbers<[1], [0], [0], [1], [0, 0, 1, 1], [], []>} : vector<16x16xf32>, vector<16x8xf32>, vector<16x8xf32> -> vector<16x8xf32>
    %108 = vector.extract_strided_slice %69 {offsets = [8, 0], sizes = [8, 32], strides = [1, 1]} : vector<32x32xf32> to vector<8x32xf32>
    %cst_61 = arith.constant dense<0.000000e+00> : vector<16x32xf32>
    %109 = tpu.matmul %107, %108, %cst_61 {dimension_numbers = #tpu.dot_dimension_numbers<[1], [0], [0], [1], [0, 0, 1, 1], [], []>} : vector<16x8xf32>, vector<8x32xf32>, vector<16x32xf32> -> vector<16x32xf32>
    %110 = arith.addf %89, %109 : vector<16x32xf32>
    %111 = vector.extract_strided_slice %57 {offsets = [0, 16], sizes = [16, 8], strides = [1, 1]} : vector<16x32xf32> to vector<16x8xf32>
    %112 = vector.extract_strided_slice %62 {offsets = [0, 16], sizes = [16, 8], strides = [1, 1]} : vector<16x32xf32> to vector<16x8xf32>
    %cst_62 = arith.constant dense<0.000000e+00> : vector<16x16xf32>
    %113 = tpu.matmul %111, %112, %cst_62 {dimension_numbers = #tpu.dot_dimension_numbers<[1], [1], [0], [0], [0, 0, 1, 0], [], []>} : vector<16x8xf32>, vector<16x8xf32>, vector<16x16xf32> -> vector<16x16xf32>
    %cst_63 = arith.constant 0.353553385 : f32
    %114 = vector.broadcast %cst_63 : f32 to vector<16x16xf32>
    %115 = arith.mulf %113, %114 : vector<16x16xf32>
    %116 = arith.addf %115, %34 : vector<16x16xf32>
    %cst_64 = arith.constant dense<0xFF800000> : vector<16xf32>
    %117 = vector.multi_reduction <maximumf>, %116, %cst_64 [1] : vector<16x16xf32> to vector<16xf32>
    %118 = vector.shape_cast %117 : vector<16xf32> to vector<16x1xf32>
    %119 = vector.broadcast %118 : vector<16x1xf32> to vector<16x16xf32>
    %120 = arith.subf %116, %119 : vector<16x16xf32>
    %121 = math.exp %120 : vector<16x16xf32>
    %cst_65 = arith.constant dense<0.000000e+00> : vector<16xf32>
    %122 = vector.multi_reduction <add>, %121, %cst_65 [1] : vector<16x16xf32> to vector<16xf32>
    %123 = vector.shape_cast %122 : vector<16xf32> to vector<16x1xf32>
    %124 = tpu.reciprocal %123 {approx = true} : vector<16x1xf32> -> vector<16x1xf32>
    %125 = vector.broadcast %124 : vector<16x1xf32> to vector<16x16xf32>
    %126 = arith.mulf %121, %125 : vector<16x16xf32>
    %127 = vector.extract_strided_slice %67 {offsets = [0, 16], sizes = [16, 8], strides = [1, 1]} : vector<16x32xf32> to vector<16x8xf32>
    %cst_66 = arith.constant dense<0.000000e+00> : vector<16x8xf32>
    %128 = tpu.matmul %126, %127, %cst_66 {dimension_numbers = #tpu.dot_dimension_numbers<[1], [0], [0], [1], [0, 0, 1, 1], [], []>} : vector<16x16xf32>, vector<16x8xf32>, vector<16x8xf32> -> vector<16x8xf32>
    %129 = vector.extract_strided_slice %69 {offsets = [16, 0], sizes = [8, 32], strides = [1, 1]} : vector<32x32xf32> to vector<8x32xf32>
    %cst_67 = arith.constant dense<0.000000e+00> : vector<16x32xf32>
    %130 = tpu.matmul %128, %129, %cst_67 {dimension_numbers = #tpu.dot_dimension_numbers<[1], [0], [0], [1], [0, 0, 1, 1], [], []>} : vector<16x8xf32>, vector<8x32xf32>, vector<16x32xf32> -> vector<16x32xf32>
    %131 = arith.addf %110, %130 : vector<16x32xf32>
    %132 = vector.extract_strided_slice %57 {offsets = [0, 24], sizes = [16, 8], strides = [1, 1]} : vector<16x32xf32> to vector<16x8xf32>
    %133 = vector.extract_strided_slice %62 {offsets = [0, 24], sizes = [16, 8], strides = [1, 1]} : vector<16x32xf32> to vector<16x8xf32>
    %cst_68 = arith.constant dense<0.000000e+00> : vector<16x16xf32>
    %134 = tpu.matmul %132, %133, %cst_68 {dimension_numbers = #tpu.dot_dimension_numbers<[1], [1], [0], [0], [0, 0, 1, 0], [], []>} : vector<16x8xf32>, vector<16x8xf32>, vector<16x16xf32> -> vector<16x16xf32>
    %cst_69 = arith.constant 0.353553385 : f32
    %135 = vector.broadcast %cst_69 : f32 to vector<16x16xf32>
    %136 = arith.mulf %134, %135 : vector<16x16xf32>
    %137 = arith.addf %136, %34 : vector<16x16xf32>
    %cst_70 = arith.constant dense<0xFF800000> : vector<16xf32>
    %138 = vector.multi_reduction <maximumf>, %137, %cst_70 [1] : vector<16x16xf32> to vector<16xf32>
    %139 = vector.shape_cast %138 : vector<16xf32> to vector<16x1xf32>
    %140 = vector.broadcast %139 : vector<16x1xf32> to vector<16x16xf32>
    %141 = arith.subf %137, %140 : vector<16x16xf32>
    %142 = math.exp %141 : vector<16x16xf32>
    %cst_71 = arith.constant dense<0.000000e+00> : vector<16xf32>
    %143 = vector.multi_reduction <add>, %142, %cst_71 [1] : vector<16x16xf32> to vector<16xf32>
    %144 = vector.shape_cast %143 : vector<16xf32> to vector<16x1xf32>
    %145 = tpu.reciprocal %144 {approx = true} : vector<16x1xf32> -> vector<16x1xf32>
    %146 = vector.broadcast %145 : vector<16x1xf32> to vector<16x16xf32>
    %147 = arith.mulf %142, %146 : vector<16x16xf32>
    %148 = vector.extract_strided_slice %67 {offsets = [0, 24], sizes = [16, 8], strides = [1, 1]} : vector<16x32xf32> to vector<16x8xf32>
    %cst_72 = arith.constant dense<0.000000e+00> : vector<16x8xf32>
    %149 = tpu.matmul %147, %148, %cst_72 {dimension_numbers = #tpu.dot_dimension_numbers<[1], [0], [0], [1], [0, 0, 1, 1], [], []>} : vector<16x16xf32>, vector<16x8xf32>, vector<16x8xf32> -> vector<16x8xf32>
    %150 = vector.extract_strided_slice %69 {offsets = [24, 0], sizes = [8, 32], strides = [1, 1]} : vector<32x32xf32> to vector<8x32xf32>
    %cst_73 = arith.constant dense<0.000000e+00> : vector<16x32xf32>
    %151 = tpu.matmul %149, %150, %cst_73 {dimension_numbers = #tpu.dot_dimension_numbers<[1], [0], [0], [1], [0, 0, 1, 1], [], []>} : vector<16x8xf32>, vector<8x32xf32>, vector<16x32xf32> -> vector<16x32xf32>
    %152 = arith.addf %131, %151 : vector<16x32xf32>
    %153 = vector.broadcast %42 : vector<1x32xf32> to vector<16x32xf32>
    %154 = arith.addf %152, %153 : vector<16x32xf32>
    %155 = arith.addf %4, %154 : vector<16x32xf32>
    %cst_74 = arith.constant dense<0.000000e+00> : vector<16xf32>
    %156 = vector.multi_reduction <add>, %155, %cst_74 [1] : vector<16x32xf32> to vector<16xf32>
    %157 = vector.shape_cast %156 : vector<16xf32> to vector<16x1xf32>
    %cst_75 = arith.constant 3.200000e+01 : f32
    %158 = vector.broadcast %cst_75 : f32 to vector<16x1xf32>
    %159 = arith.divf %157, %158 : vector<16x1xf32>
    %160 = vector.broadcast %159 : vector<16x1xf32> to vector<16x32xf32>
    %161 = arith.subf %155, %160 : vector<16x32xf32>
    %162 = arith.mulf %161, %161 : vector<16x32xf32>
    %cst_76 = arith.constant dense<0.000000e+00> : vector<16xf32>
    %163 = vector.multi_reduction <add>, %162, %cst_76 [1] : vector<16x32xf32> to vector<16xf32>
    %164 = vector.shape_cast %163 : vector<16xf32> to vector<16x1xf32>
    %cst_77 = arith.constant 3.200000e+01 : f32
    %165 = vector.broadcast %cst_77 : f32 to vector<16x1xf32>
    %166 = arith.divf %164, %165 : vector<16x1xf32>
    %167 = vector.broadcast %159 : vector<16x1xf32> to vector<16x32xf32>
    %168 = arith.subf %155, %167 : vector<16x32xf32>
    %cst_78 = arith.constant 9.99999974E-6 : f32
    %169 = vector.broadcast %cst_78 : f32 to vector<16x1xf32>
    %170 = arith.addf %166, %169 : vector<16x1xf32>
    %171 = math.rsqrt %170 : vector<16x1xf32>
    %172 = vector.broadcast %171 : vector<16x1xf32> to vector<16x32xf32>
    %173 = arith.mulf %168, %172 : vector<16x32xf32>
    %174 = vector.broadcast %44 : vector<1x32xf32> to vector<16x32xf32>
    %175 = arith.mulf %173, %174 : vector<16x32xf32>
    %176 = vector.broadcast %46 : vector<1x32xf32> to vector<16x32xf32>
    %177 = arith.addf %175, %176 : vector<16x32xf32>
    %c0_79 = arith.constant 0 : index
    %c0_80 = arith.constant 0 : index
    %c0_81 = arith.constant 0 : index
    %178 = vector.load %arg5[%c0_79, %c0_80, %c0_81] : memref<3x32x128xf32, #tpu.memory_space<vmem>>, vector<1x32x128xf32>
    %179 = vector.shape_cast %178 : vector<1x32x128xf32> to vector<32x128xf32>
    %cst_82 = arith.constant dense<0.000000e+00> : vector<16x128xf32>
    %180 = tpu.matmul %177, %179, %cst_82 {dimension_numbers = #tpu.dot_dimension_numbers<[1], [0], [0], [1], [0, 0, 1, 1], [], []>} : vector<16x32xf32>, vector<32x128xf32>, vector<16x128xf32> -> vector<16x128xf32>
    %c0_83 = arith.constant 0 : index
    %c0_84 = arith.constant 0 : index
    %c0_85 = arith.constant 0 : index
    %181 = vector.load %arg6[%c0_83, %c0_84, %c0_85] : memref<3x1x128xf32, #tpu.memory_space<vmem>>, vector<1x1x128xf32>
    %182 = vector.shape_cast %181 : vector<1x1x128xf32> to vector<1x128xf32>
    %183 = vector.broadcast %182 : vector<1x128xf32> to vector<16x128xf32>
    %184 = arith.addf %180, %183 : vector<16x128xf32>
    %cst_86 = arith.constant 0.000000e+00 : f32
    %185 = vector.broadcast %cst_86 : f32 to vector<16x128xf32>
    %186 = arith.maximumf %184, %185 : vector<16x128xf32>
    %c0_87 = arith.constant 0 : index
    %c0_88 = arith.constant 0 : index
    %c0_89 = arith.constant 0 : index
    %187 = vector.load %arg7[%c0_87, %c0_88, %c0_89] : memref<3x128x32xf32, #tpu.memory_space<vmem>>, vector<1x128x32xf32>
    %188 = vector.shape_cast %187 : vector<1x128x32xf32> to vector<128x32xf32>
    %cst_90 = arith.constant dense<0.000000e+00> : vector<16x32xf32>
    %189 = tpu.matmul %186, %188, %cst_90 {dimension_numbers = #tpu.dot_dimension_numbers<[1], [0], [0], [1], [0, 0, 1, 1], [], []>} : vector<16x128xf32>, vector<128x32xf32>, vector<16x32xf32> -> vector<16x32xf32>
    %190 = vector.broadcast %48 : vector<1x32xf32> to vector<16x32xf32>
    %191 = arith.addf %189, %190 : vector<16x32xf32>
    %192 = arith.addf %177, %191 : vector<16x32xf32>
    %cst_91 = arith.constant dense<0.000000e+00> : vector<16xf32>
    %193 = vector.multi_reduction <add>, %192, %cst_91 [1] : vector<16x32xf32> to vector<16xf32>
    %194 = vector.shape_cast %193 : vector<16xf32> to vector<16x1xf32>
    %cst_92 = arith.constant 3.200000e+01 : f32
    %195 = vector.broadcast %cst_92 : f32 to vector<16x1xf32>
    %196 = arith.divf %194, %195 : vector<16x1xf32>
    %197 = vector.broadcast %196 : vector<16x1xf32> to vector<16x32xf32>
    %198 = arith.subf %192, %197 : vector<16x32xf32>
    %199 = arith.mulf %198, %198 : vector<16x32xf32>
    %cst_93 = arith.constant dense<0.000000e+00> : vector<16xf32>
    %200 = vector.multi_reduction <add>, %199, %cst_93 [1] : vector<16x32xf32> to vector<16xf32>
    %201 = vector.shape_cast %200 : vector<16xf32> to vector<16x1xf32>
    %cst_94 = arith.constant 3.200000e+01 : f32
    %202 = vector.broadcast %cst_94 : f32 to vector<16x1xf32>
    %203 = arith.divf %201, %202 : vector<16x1xf32>
    %204 = vector.broadcast %196 : vector<16x1xf32> to vector<16x32xf32>
    %205 = arith.subf %192, %204 : vector<16x32xf32>
    %cst_95 = arith.constant 9.99999974E-6 : f32
    %206 = vector.broadcast %cst_95 : f32 to vector<16x1xf32>
    %207 = arith.addf %203, %206 : vector<16x1xf32>
    %208 = math.rsqrt %207 : vector<16x1xf32>
    %209 = vector.broadcast %208 : vector<16x1xf32> to vector<16x32xf32>
    %210 = arith.mulf %205, %209 : vector<16x32xf32>
    %211 = vector.broadcast %50 : vector<1x32xf32> to vector<16x32xf32>
    %212 = arith.mulf %210, %211 : vector<16x32xf32>
    %213 = vector.broadcast %52 : vector<1x32xf32> to vector<16x32xf32>
    %214 = arith.addf %212, %213 : vector<16x32xf32>
    %c1_96 = arith.constant 1 : index
    %c0_97 = arith.constant 0 : index
    %c0_98 = arith.constant 0 : index
    %215 = vector.load %arg4[%c1_96, %c0_97, %c0_98] : memref<3x9x32xf32, #tpu.memory_space<vmem>>, vector<1x1x32xf32>
    %216 = vector.shape_cast %215 : vector<1x1x32xf32> to vector<1x32xf32>
    %c1_99 = arith.constant 1 : index
    %c1_100 = arith.constant 1 : index
    %c0_101 = arith.constant 0 : index
    %217 = vector.load %arg4[%c1_99, %c1_100, %c0_101] : memref<3x9x32xf32, #tpu.memory_space<vmem>>, vector<1x1x32xf32>
    %218 = vector.shape_cast %217 : vector<1x1x32xf32> to vector<1x32xf32>
    %c1_102 = arith.constant 1 : index
    %c2_103 = arith.constant 2 : index
    %c0_104 = arith.constant 0 : index
    %219 = vector.load %arg4[%c1_102, %c2_103, %c0_104] : memref<3x9x32xf32, #tpu.memory_space<vmem>>, vector<1x1x32xf32>
    %220 = vector.shape_cast %219 : vector<1x1x32xf32> to vector<1x32xf32>
    %c1_105 = arith.constant 1 : index
    %c3_106 = arith.constant 3 : index
    %c0_107 = arith.constant 0 : index
    %221 = vector.load %arg4[%c1_105, %c3_106, %c0_107] : memref<3x9x32xf32, #tpu.memory_space<vmem>>, vector<1x1x32xf32>
    %222 = vector.shape_cast %221 : vector<1x1x32xf32> to vector<1x32xf32>
    %c1_108 = arith.constant 1 : index
    %c4_109 = arith.constant 4 : index
    %c0_110 = arith.constant 0 : index
    %223 = vector.load %arg4[%c1_108, %c4_109, %c0_110] : memref<3x9x32xf32, #tpu.memory_space<vmem>>, vector<1x1x32xf32>
    %224 = vector.shape_cast %223 : vector<1x1x32xf32> to vector<1x32xf32>
    %c1_111 = arith.constant 1 : index
    %c5_112 = arith.constant 5 : index
    %c0_113 = arith.constant 0 : index
    %225 = vector.load %arg4[%c1_111, %c5_112, %c0_113] : memref<3x9x32xf32, #tpu.memory_space<vmem>>, vector<1x1x32xf32>
    %226 = vector.shape_cast %225 : vector<1x1x32xf32> to vector<1x32xf32>
    %c1_114 = arith.constant 1 : index
    %c6_115 = arith.constant 6 : index
    %c0_116 = arith.constant 0 : index
    %227 = vector.load %arg4[%c1_114, %c6_115, %c0_116] : memref<3x9x32xf32, #tpu.memory_space<vmem>>, vector<1x1x32xf32>
    %228 = vector.shape_cast %227 : vector<1x1x32xf32> to vector<1x32xf32>
    %c1_117 = arith.constant 1 : index
    %c7_118 = arith.constant 7 : index
    %c0_119 = arith.constant 0 : index
    %229 = vector.load %arg4[%c1_117, %c7_118, %c0_119] : memref<3x9x32xf32, #tpu.memory_space<vmem>>, vector<1x1x32xf32>
    %230 = vector.shape_cast %229 : vector<1x1x32xf32> to vector<1x32xf32>
    %c1_120 = arith.constant 1 : index
    %c8_121 = arith.constant 8 : index
    %c0_122 = arith.constant 0 : index
    %231 = vector.load %arg4[%c1_120, %c8_121, %c0_122] : memref<3x9x32xf32, #tpu.memory_space<vmem>>, vector<1x1x32xf32>
    %232 = vector.shape_cast %231 : vector<1x1x32xf32> to vector<1x32xf32>
    %c1_123 = arith.constant 1 : index
    %c0_124 = arith.constant 0 : index
    %c0_125 = arith.constant 0 : index
    %c0_126 = arith.constant 0 : index
    %233 = vector.load %arg3[%c1_123, %c0_124, %c0_125, %c0_126] : memref<3x4x32x32xf32, #tpu.memory_space<vmem>>, vector<1x1x32x32xf32>
    %234 = vector.shape_cast %233 : vector<1x1x32x32xf32> to vector<32x32xf32>
    %cst_127 = arith.constant dense<0.000000e+00> : vector<16x32xf32>
    %235 = tpu.matmul %214, %234, %cst_127 {dimension_numbers = #tpu.dot_dimension_numbers<[1], [0], [0], [1], [0, 0, 1, 1], [], []>} : vector<16x32xf32>, vector<32x32xf32>, vector<16x32xf32> -> vector<16x32xf32>
    %236 = vector.broadcast %216 : vector<1x32xf32> to vector<16x32xf32>
    %237 = arith.addf %235, %236 : vector<16x32xf32>
    %c1_128 = arith.constant 1 : index
    %c1_129 = arith.constant 1 : index
    %c0_130 = arith.constant 0 : index
    %c0_131 = arith.constant 0 : index
    %238 = vector.load %arg3[%c1_128, %c1_129, %c0_130, %c0_131] : memref<3x4x32x32xf32, #tpu.memory_space<vmem>>, vector<1x1x32x32xf32>
    %239 = vector.shape_cast %238 : vector<1x1x32x32xf32> to vector<32x32xf32>
    %cst_132 = arith.constant dense<0.000000e+00> : vector<16x32xf32>
    %240 = tpu.matmul %214, %239, %cst_132 {dimension_numbers = #tpu.dot_dimension_numbers<[1], [0], [0], [1], [0, 0, 1, 1], [], []>} : vector<16x32xf32>, vector<32x32xf32>, vector<16x32xf32> -> vector<16x32xf32>
    %241 = vector.broadcast %218 : vector<1x32xf32> to vector<16x32xf32>
    %242 = arith.addf %240, %241 : vector<16x32xf32>
    %c1_133 = arith.constant 1 : index
    %c2_134 = arith.constant 2 : index
    %c0_135 = arith.constant 0 : index
    %c0_136 = arith.constant 0 : index
    %243 = vector.load %arg3[%c1_133, %c2_134, %c0_135, %c0_136] : memref<3x4x32x32xf32, #tpu.memory_space<vmem>>, vector<1x1x32x32xf32>
    %244 = vector.shape_cast %243 : vector<1x1x32x32xf32> to vector<32x32xf32>
    %cst_137 = arith.constant dense<0.000000e+00> : vector<16x32xf32>
    %245 = tpu.matmul %214, %244, %cst_137 {dimension_numbers = #tpu.dot_dimension_numbers<[1], [0], [0], [1], [0, 0, 1, 1], [], []>} : vector<16x32xf32>, vector<32x32xf32>, vector<16x32xf32> -> vector<16x32xf32>
    %246 = vector.broadcast %220 : vector<1x32xf32> to vector<16x32xf32>
    %247 = arith.addf %245, %246 : vector<16x32xf32>
    %c1_138 = arith.constant 1 : index
    %c3_139 = arith.constant 3 : index
    %c0_140 = arith.constant 0 : index
    %c0_141 = arith.constant 0 : index
    %248 = vector.load %arg3[%c1_138, %c3_139, %c0_140, %c0_141] : memref<3x4x32x32xf32, #tpu.memory_space<vmem>>, vector<1x1x32x32xf32>
    %249 = vector.shape_cast %248 : vector<1x1x32x32xf32> to vector<32x32xf32>
    %250 = vector.extract_strided_slice %237 {offsets = [0, 0], sizes = [16, 8], strides = [1, 1]} : vector<16x32xf32> to vector<16x8xf32>
    %251 = vector.extract_strided_slice %242 {offsets = [0, 0], sizes = [16, 8], strides = [1, 1]} : vector<16x32xf32> to vector<16x8xf32>
    %cst_142 = arith.constant dense<0.000000e+00> : vector<16x16xf32>
    %252 = tpu.matmul %250, %251, %cst_142 {dimension_numbers = #tpu.dot_dimension_numbers<[1], [1], [0], [0], [0, 0, 1, 0], [], []>} : vector<16x8xf32>, vector<16x8xf32>, vector<16x16xf32> -> vector<16x16xf32>
    %cst_143 = arith.constant 0.353553385 : f32
    %253 = vector.broadcast %cst_143 : f32 to vector<16x16xf32>
    %254 = arith.mulf %252, %253 : vector<16x16xf32>
    %255 = arith.addf %254, %34 : vector<16x16xf32>
    %cst_144 = arith.constant dense<0xFF800000> : vector<16xf32>
    %256 = vector.multi_reduction <maximumf>, %255, %cst_144 [1] : vector<16x16xf32> to vector<16xf32>
    %257 = vector.shape_cast %256 : vector<16xf32> to vector<16x1xf32>
    %258 = vector.broadcast %257 : vector<16x1xf32> to vector<16x16xf32>
    %259 = arith.subf %255, %258 : vector<16x16xf32>
    %260 = math.exp %259 : vector<16x16xf32>
    %cst_145 = arith.constant dense<0.000000e+00> : vector<16xf32>
    %261 = vector.multi_reduction <add>, %260, %cst_145 [1] : vector<16x16xf32> to vector<16xf32>
    %262 = vector.shape_cast %261 : vector<16xf32> to vector<16x1xf32>
    %263 = tpu.reciprocal %262 {approx = true} : vector<16x1xf32> -> vector<16x1xf32>
    %264 = vector.broadcast %263 : vector<16x1xf32> to vector<16x16xf32>
    %265 = arith.mulf %260, %264 : vector<16x16xf32>
    %266 = vector.extract_strided_slice %247 {offsets = [0, 0], sizes = [16, 8], strides = [1, 1]} : vector<16x32xf32> to vector<16x8xf32>
    %cst_146 = arith.constant dense<0.000000e+00> : vector<16x8xf32>
    %267 = tpu.matmul %265, %266, %cst_146 {dimension_numbers = #tpu.dot_dimension_numbers<[1], [0], [0], [1], [0, 0, 1, 1], [], []>} : vector<16x16xf32>, vector<16x8xf32>, vector<16x8xf32> -> vector<16x8xf32>
    %268 = vector.extract_strided_slice %249 {offsets = [0, 0], sizes = [8, 32], strides = [1, 1]} : vector<32x32xf32> to vector<8x32xf32>
    %cst_147 = arith.constant dense<0.000000e+00> : vector<16x32xf32>
    %269 = tpu.matmul %267, %268, %cst_147 {dimension_numbers = #tpu.dot_dimension_numbers<[1], [0], [0], [1], [0, 0, 1, 1], [], []>} : vector<16x8xf32>, vector<8x32xf32>, vector<16x32xf32> -> vector<16x32xf32>
    %270 = vector.extract_strided_slice %237 {offsets = [0, 8], sizes = [16, 8], strides = [1, 1]} : vector<16x32xf32> to vector<16x8xf32>
    %271 = vector.extract_strided_slice %242 {offsets = [0, 8], sizes = [16, 8], strides = [1, 1]} : vector<16x32xf32> to vector<16x8xf32>
    %cst_148 = arith.constant dense<0.000000e+00> : vector<16x16xf32>
    %272 = tpu.matmul %270, %271, %cst_148 {dimension_numbers = #tpu.dot_dimension_numbers<[1], [1], [0], [0], [0, 0, 1, 0], [], []>} : vector<16x8xf32>, vector<16x8xf32>, vector<16x16xf32> -> vector<16x16xf32>
    %cst_149 = arith.constant 0.353553385 : f32
    %273 = vector.broadcast %cst_149 : f32 to vector<16x16xf32>
    %274 = arith.mulf %272, %273 : vector<16x16xf32>
    %275 = arith.addf %274, %34 : vector<16x16xf32>
    %cst_150 = arith.constant dense<0xFF800000> : vector<16xf32>
    %276 = vector.multi_reduction <maximumf>, %275, %cst_150 [1] : vector<16x16xf32> to vector<16xf32>
    %277 = vector.shape_cast %276 : vector<16xf32> to vector<16x1xf32>
    %278 = vector.broadcast %277 : vector<16x1xf32> to vector<16x16xf32>
    %279 = arith.subf %275, %278 : vector<16x16xf32>
    %280 = math.exp %279 : vector<16x16xf32>
    %cst_151 = arith.constant dense<0.000000e+00> : vector<16xf32>
    %281 = vector.multi_reduction <add>, %280, %cst_151 [1] : vector<16x16xf32> to vector<16xf32>
    %282 = vector.shape_cast %281 : vector<16xf32> to vector<16x1xf32>
    %283 = tpu.reciprocal %282 {approx = true} : vector<16x1xf32> -> vector<16x1xf32>
    %284 = vector.broadcast %283 : vector<16x1xf32> to vector<16x16xf32>
    %285 = arith.mulf %280, %284 : vector<16x16xf32>
    %286 = vector.extract_strided_slice %247 {offsets = [0, 8], sizes = [16, 8], strides = [1, 1]} : vector<16x32xf32> to vector<16x8xf32>
    %cst_152 = arith.constant dense<0.000000e+00> : vector<16x8xf32>
    %287 = tpu.matmul %285, %286, %cst_152 {dimension_numbers = #tpu.dot_dimension_numbers<[1], [0], [0], [1], [0, 0, 1, 1], [], []>} : vector<16x16xf32>, vector<16x8xf32>, vector<16x8xf32> -> vector<16x8xf32>
    %288 = vector.extract_strided_slice %249 {offsets = [8, 0], sizes = [8, 32], strides = [1, 1]} : vector<32x32xf32> to vector<8x32xf32>
    %cst_153 = arith.constant dense<0.000000e+00> : vector<16x32xf32>
    %289 = tpu.matmul %287, %288, %cst_153 {dimension_numbers = #tpu.dot_dimension_numbers<[1], [0], [0], [1], [0, 0, 1, 1], [], []>} : vector<16x8xf32>, vector<8x32xf32>, vector<16x32xf32> -> vector<16x32xf32>
    %290 = arith.addf %269, %289 : vector<16x32xf32>
    %291 = vector.extract_strided_slice %237 {offsets = [0, 16], sizes = [16, 8], strides = [1, 1]} : vector<16x32xf32> to vector<16x8xf32>
    %292 = vector.extract_strided_slice %242 {offsets = [0, 16], sizes = [16, 8], strides = [1, 1]} : vector<16x32xf32> to vector<16x8xf32>
    %cst_154 = arith.constant dense<0.000000e+00> : vector<16x16xf32>
    %293 = tpu.matmul %291, %292, %cst_154 {dimension_numbers = #tpu.dot_dimension_numbers<[1], [1], [0], [0], [0, 0, 1, 0], [], []>} : vector<16x8xf32>, vector<16x8xf32>, vector<16x16xf32> -> vector<16x16xf32>
    %cst_155 = arith.constant 0.353553385 : f32
    %294 = vector.broadcast %cst_155 : f32 to vector<16x16xf32>
    %295 = arith.mulf %293, %294 : vector<16x16xf32>
    %296 = arith.addf %295, %34 : vector<16x16xf32>
    %cst_156 = arith.constant dense<0xFF800000> : vector<16xf32>
    %297 = vector.multi_reduction <maximumf>, %296, %cst_156 [1] : vector<16x16xf32> to vector<16xf32>
    %298 = vector.shape_cast %297 : vector<16xf32> to vector<16x1xf32>
    %299 = vector.broadcast %298 : vector<16x1xf32> to vector<16x16xf32>
    %300 = arith.subf %296, %299 : vector<16x16xf32>
    %301 = math.exp %300 : vector<16x16xf32>
    %cst_157 = arith.constant dense<0.000000e+00> : vector<16xf32>
    %302 = vector.multi_reduction <add>, %301, %cst_157 [1] : vector<16x16xf32> to vector<16xf32>
    %303 = vector.shape_cast %302 : vector<16xf32> to vector<16x1xf32>
    %304 = tpu.reciprocal %303 {approx = true} : vector<16x1xf32> -> vector<16x1xf32>
    %305 = vector.broadcast %304 : vector<16x1xf32> to vector<16x16xf32>
    %306 = arith.mulf %301, %305 : vector<16x16xf32>
    %307 = vector.extract_strided_slice %247 {offsets = [0, 16], sizes = [16, 8], strides = [1, 1]} : vector<16x32xf32> to vector<16x8xf32>
    %cst_158 = arith.constant dense<0.000000e+00> : vector<16x8xf32>
    %308 = tpu.matmul %306, %307, %cst_158 {dimension_numbers = #tpu.dot_dimension_numbers<[1], [0], [0], [1], [0, 0, 1, 1], [], []>} : vector<16x16xf32>, vector<16x8xf32>, vector<16x8xf32> -> vector<16x8xf32>
    %309 = vector.extract_strided_slice %249 {offsets = [16, 0], sizes = [8, 32], strides = [1, 1]} : vector<32x32xf32> to vector<8x32xf32>
    %cst_159 = arith.constant dense<0.000000e+00> : vector<16x32xf32>
    %310 = tpu.matmul %308, %309, %cst_159 {dimension_numbers = #tpu.dot_dimension_numbers<[1], [0], [0], [1], [0, 0, 1, 1], [], []>} : vector<16x8xf32>, vector<8x32xf32>, vector<16x32xf32> -> vector<16x32xf32>
    %311 = arith.addf %290, %310 : vector<16x32xf32>
    %312 = vector.extract_strided_slice %237 {offsets = [0, 24], sizes = [16, 8], strides = [1, 1]} : vector<16x32xf32> to vector<16x8xf32>
    %313 = vector.extract_strided_slice %242 {offsets = [0, 24], sizes = [16, 8], strides = [1, 1]} : vector<16x32xf32> to vector<16x8xf32>
    %cst_160 = arith.constant dense<0.000000e+00> : vector<16x16xf32>
    %314 = tpu.matmul %312, %313, %cst_160 {dimension_numbers = #tpu.dot_dimension_numbers<[1], [1], [0], [0], [0, 0, 1, 0], [], []>} : vector<16x8xf32>, vector<16x8xf32>, vector<16x16xf32> -> vector<16x16xf32>
    %cst_161 = arith.constant 0.353553385 : f32
    %315 = vector.broadcast %cst_161 : f32 to vector<16x16xf32>
    %316 = arith.mulf %314, %315 : vector<16x16xf32>
    %317 = arith.addf %316, %34 : vector<16x16xf32>
    %cst_162 = arith.constant dense<0xFF800000> : vector<16xf32>
    %318 = vector.multi_reduction <maximumf>, %317, %cst_162 [1] : vector<16x16xf32> to vector<16xf32>
    %319 = vector.shape_cast %318 : vector<16xf32> to vector<16x1xf32>
    %320 = vector.broadcast %319 : vector<16x1xf32> to vector<16x16xf32>
    %321 = arith.subf %317, %320 : vector<16x16xf32>
    %322 = math.exp %321 : vector<16x16xf32>
    %cst_163 = arith.constant dense<0.000000e+00> : vector<16xf32>
    %323 = vector.multi_reduction <add>, %322, %cst_163 [1] : vector<16x16xf32> to vector<16xf32>
    %324 = vector.shape_cast %323 : vector<16xf32> to vector<16x1xf32>
    %325 = tpu.reciprocal %324 {approx = true} : vector<16x1xf32> -> vector<16x1xf32>
    %326 = vector.broadcast %325 : vector<16x1xf32> to vector<16x16xf32>
    %327 = arith.mulf %322, %326 : vector<16x16xf32>
    %328 = vector.extract_strided_slice %247 {offsets = [0, 24], sizes = [16, 8], strides = [1, 1]} : vector<16x32xf32> to vector<16x8xf32>
    %cst_164 = arith.constant dense<0.000000e+00> : vector<16x8xf32>
    %329 = tpu.matmul %327, %328, %cst_164 {dimension_numbers = #tpu.dot_dimension_numbers<[1], [0], [0], [1], [0, 0, 1, 1], [], []>} : vector<16x16xf32>, vector<16x8xf32>, vector<16x8xf32> -> vector<16x8xf32>
    %330 = vector.extract_strided_slice %249 {offsets = [24, 0], sizes = [8, 32], strides = [1, 1]} : vector<32x32xf32> to vector<8x32xf32>
    %cst_165 = arith.constant dense<0.000000e+00> : vector<16x32xf32>
    %331 = tpu.matmul %329, %330, %cst_165 {dimension_numbers = #tpu.dot_dimension_numbers<[1], [0], [0], [1], [0, 0, 1, 1], [], []>} : vector<16x8xf32>, vector<8x32xf32>, vector<16x32xf32> -> vector<16x32xf32>
    %332 = arith.addf %311, %331 : vector<16x32xf32>
    %333 = vector.broadcast %222 : vector<1x32xf32> to vector<16x32xf32>
    %334 = arith.addf %332, %333 : vector<16x32xf32>
    %335 = arith.addf %214, %334 : vector<16x32xf32>
    %cst_166 = arith.constant dense<0.000000e+00> : vector<16xf32>
    %336 = vector.multi_reduction <add>, %335, %cst_166 [1] : vector<16x32xf32> to vector<16xf32>
    %337 = vector.shape_cast %336 : vector<16xf32> to vector<16x1xf32>
    %cst_167 = arith.constant 3.200000e+01 : f32
    %338 = vector.broadcast %cst_167 : f32 to vector<16x1xf32>
    %339 = arith.divf %337, %338 : vector<16x1xf32>
    %340 = vector.broadcast %339 : vector<16x1xf32> to vector<16x32xf32>
    %341 = arith.subf %335, %340 : vector<16x32xf32>
    %342 = arith.mulf %341, %341 : vector<16x32xf32>
    %cst_168 = arith.constant dense<0.000000e+00> : vector<16xf32>
    %343 = vector.multi_reduction <add>, %342, %cst_168 [1] : vector<16x32xf32> to vector<16xf32>
    %344 = vector.shape_cast %343 : vector<16xf32> to vector<16x1xf32>
    %cst_169 = arith.constant 3.200000e+01 : f32
    %345 = vector.broadcast %cst_169 : f32 to vector<16x1xf32>
    %346 = arith.divf %344, %345 : vector<16x1xf32>
    %347 = vector.broadcast %339 : vector<16x1xf32> to vector<16x32xf32>
    %348 = arith.subf %335, %347 : vector<16x32xf32>
    %cst_170 = arith.constant 9.99999974E-6 : f32
    %349 = vector.broadcast %cst_170 : f32 to vector<16x1xf32>
    %350 = arith.addf %346, %349 : vector<16x1xf32>
    %351 = math.rsqrt %350 : vector<16x1xf32>
    %352 = vector.broadcast %351 : vector<16x1xf32> to vector<16x32xf32>
    %353 = arith.mulf %348, %352 : vector<16x32xf32>
    %354 = vector.broadcast %224 : vector<1x32xf32> to vector<16x32xf32>
    %355 = arith.mulf %353, %354 : vector<16x32xf32>
    %356 = vector.broadcast %226 : vector<1x32xf32> to vector<16x32xf32>
    %357 = arith.addf %355, %356 : vector<16x32xf32>
    %c1_171 = arith.constant 1 : index
    %c0_172 = arith.constant 0 : index
    %c0_173 = arith.constant 0 : index
    %358 = vector.load %arg5[%c1_171, %c0_172, %c0_173] : memref<3x32x128xf32, #tpu.memory_space<vmem>>, vector<1x32x128xf32>
    %359 = vector.shape_cast %358 : vector<1x32x128xf32> to vector<32x128xf32>
    %cst_174 = arith.constant dense<0.000000e+00> : vector<16x128xf32>
    %360 = tpu.matmul %357, %359, %cst_174 {dimension_numbers = #tpu.dot_dimension_numbers<[1], [0], [0], [1], [0, 0, 1, 1], [], []>} : vector<16x32xf32>, vector<32x128xf32>, vector<16x128xf32> -> vector<16x128xf32>
    %c1_175 = arith.constant 1 : index
    %c0_176 = arith.constant 0 : index
    %c0_177 = arith.constant 0 : index
    %361 = vector.load %arg6[%c1_175, %c0_176, %c0_177] : memref<3x1x128xf32, #tpu.memory_space<vmem>>, vector<1x1x128xf32>
    %362 = vector.shape_cast %361 : vector<1x1x128xf32> to vector<1x128xf32>
    %363 = vector.broadcast %362 : vector<1x128xf32> to vector<16x128xf32>
    %364 = arith.addf %360, %363 : vector<16x128xf32>
    %cst_178 = arith.constant 0.000000e+00 : f32
    %365 = vector.broadcast %cst_178 : f32 to vector<16x128xf32>
    %366 = arith.maximumf %364, %365 : vector<16x128xf32>
    %c1_179 = arith.constant 1 : index
    %c0_180 = arith.constant 0 : index
    %c0_181 = arith.constant 0 : index
    %367 = vector.load %arg7[%c1_179, %c0_180, %c0_181] : memref<3x128x32xf32, #tpu.memory_space<vmem>>, vector<1x128x32xf32>
    %368 = vector.shape_cast %367 : vector<1x128x32xf32> to vector<128x32xf32>
    %cst_182 = arith.constant dense<0.000000e+00> : vector<16x32xf32>
    %369 = tpu.matmul %366, %368, %cst_182 {dimension_numbers = #tpu.dot_dimension_numbers<[1], [0], [0], [1], [0, 0, 1, 1], [], []>} : vector<16x128xf32>, vector<128x32xf32>, vector<16x32xf32> -> vector<16x32xf32>
    %370 = vector.broadcast %228 : vector<1x32xf32> to vector<16x32xf32>
    %371 = arith.addf %369, %370 : vector<16x32xf32>
    %372 = arith.addf %357, %371 : vector<16x32xf32>
    %cst_183 = arith.constant dense<0.000000e+00> : vector<16xf32>
    %373 = vector.multi_reduction <add>, %372, %cst_183 [1] : vector<16x32xf32> to vector<16xf32>
    %374 = vector.shape_cast %373 : vector<16xf32> to vector<16x1xf32>
    %cst_184 = arith.constant 3.200000e+01 : f32
    %375 = vector.broadcast %cst_184 : f32 to vector<16x1xf32>
    %376 = arith.divf %374, %375 : vector<16x1xf32>
    %377 = vector.broadcast %376 : vector<16x1xf32> to vector<16x32xf32>
    %378 = arith.subf %372, %377 : vector<16x32xf32>
    %379 = arith.mulf %378, %378 : vector<16x32xf32>
    %cst_185 = arith.constant dense<0.000000e+00> : vector<16xf32>
    %380 = vector.multi_reduction <add>, %379, %cst_185 [1] : vector<16x32xf32> to vector<16xf32>
    %381 = vector.shape_cast %380 : vector<16xf32> to vector<16x1xf32>
    %cst_186 = arith.constant 3.200000e+01 : f32
    %382 = vector.broadcast %cst_186 : f32 to vector<16x1xf32>
    %383 = arith.divf %381, %382 : vector<16x1xf32>
    %384 = vector.broadcast %376 : vector<16x1xf32> to vector<16x32xf32>
    %385 = arith.subf %372, %384 : vector<16x32xf32>
    %cst_187 = arith.constant 9.99999974E-6 : f32
    %386 = vector.broadcast %cst_187 : f32 to vector<16x1xf32>
    %387 = arith.addf %383, %386 : vector<16x1xf32>
    %388 = math.rsqrt %387 : vector<16x1xf32>
    %389 = vector.broadcast %388 : vector<16x1xf32> to vector<16x32xf32>
    %390 = arith.mulf %385, %389 : vector<16x32xf32>
    %391 = vector.broadcast %230 : vector<1x32xf32> to vector<16x32xf32>
    %392 = arith.mulf %390, %391 : vector<16x32xf32>
    %393 = vector.broadcast %232 : vector<1x32xf32> to vector<16x32xf32>
    %394 = arith.addf %392, %393 : vector<16x32xf32>
    %c2_188 = arith.constant 2 : index
    %c0_189 = arith.constant 0 : index
    %c0_190 = arith.constant 0 : index
    %395 = vector.load %arg4[%c2_188, %c0_189, %c0_190] : memref<3x9x32xf32, #tpu.memory_space<vmem>>, vector<1x1x32xf32>
    %396 = vector.shape_cast %395 : vector<1x1x32xf32> to vector<1x32xf32>
    %c2_191 = arith.constant 2 : index
    %c1_192 = arith.constant 1 : index
    %c0_193 = arith.constant 0 : index
    %397 = vector.load %arg4[%c2_191, %c1_192, %c0_193] : memref<3x9x32xf32, #tpu.memory_space<vmem>>, vector<1x1x32xf32>
    %398 = vector.shape_cast %397 : vector<1x1x32xf32> to vector<1x32xf32>
    %c2_194 = arith.constant 2 : index
    %c2_195 = arith.constant 2 : index
    %c0_196 = arith.constant 0 : index
    %399 = vector.load %arg4[%c2_194, %c2_195, %c0_196] : memref<3x9x32xf32, #tpu.memory_space<vmem>>, vector<1x1x32xf32>
    %400 = vector.shape_cast %399 : vector<1x1x32xf32> to vector<1x32xf32>
    %c2_197 = arith.constant 2 : index
    %c3_198 = arith.constant 3 : index
    %c0_199 = arith.constant 0 : index
    %401 = vector.load %arg4[%c2_197, %c3_198, %c0_199] : memref<3x9x32xf32, #tpu.memory_space<vmem>>, vector<1x1x32xf32>
    %402 = vector.shape_cast %401 : vector<1x1x32xf32> to vector<1x32xf32>
    %c2_200 = arith.constant 2 : index
    %c4_201 = arith.constant 4 : index
    %c0_202 = arith.constant 0 : index
    %403 = vector.load %arg4[%c2_200, %c4_201, %c0_202] : memref<3x9x32xf32, #tpu.memory_space<vmem>>, vector<1x1x32xf32>
    %404 = vector.shape_cast %403 : vector<1x1x32xf32> to vector<1x32xf32>
    %c2_203 = arith.constant 2 : index
    %c5_204 = arith.constant 5 : index
    %c0_205 = arith.constant 0 : index
    %405 = vector.load %arg4[%c2_203, %c5_204, %c0_205] : memref<3x9x32xf32, #tpu.memory_space<vmem>>, vector<1x1x32xf32>
    %406 = vector.shape_cast %405 : vector<1x1x32xf32> to vector<1x32xf32>
    %c2_206 = arith.constant 2 : index
    %c6_207 = arith.constant 6 : index
    %c0_208 = arith.constant 0 : index
    %407 = vector.load %arg4[%c2_206, %c6_207, %c0_208] : memref<3x9x32xf32, #tpu.memory_space<vmem>>, vector<1x1x32xf32>
    %408 = vector.shape_cast %407 : vector<1x1x32xf32> to vector<1x32xf32>
    %c2_209 = arith.constant 2 : index
    %c7_210 = arith.constant 7 : index
    %c0_211 = arith.constant 0 : index
    %409 = vector.load %arg4[%c2_209, %c7_210, %c0_211] : memref<3x9x32xf32, #tpu.memory_space<vmem>>, vector<1x1x32xf32>
    %410 = vector.shape_cast %409 : vector<1x1x32xf32> to vector<1x32xf32>
    %c2_212 = arith.constant 2 : index
    %c8_213 = arith.constant 8 : index
    %c0_214 = arith.constant 0 : index
    %411 = vector.load %arg4[%c2_212, %c8_213, %c0_214] : memref<3x9x32xf32, #tpu.memory_space<vmem>>, vector<1x1x32xf32>
    %412 = vector.shape_cast %411 : vector<1x1x32xf32> to vector<1x32xf32>
    %c2_215 = arith.constant 2 : index
    %c0_216 = arith.constant 0 : index
    %c0_217 = arith.constant 0 : index
    %c0_218 = arith.constant 0 : index
    %413 = vector.load %arg3[%c2_215, %c0_216, %c0_217, %c0_218] : memref<3x4x32x32xf32, #tpu.memory_space<vmem>>, vector<1x1x32x32xf32>
    %414 = vector.shape_cast %413 : vector<1x1x32x32xf32> to vector<32x32xf32>
    %cst_219 = arith.constant dense<0.000000e+00> : vector<16x32xf32>
    %415 = tpu.matmul %394, %414, %cst_219 {dimension_numbers = #tpu.dot_dimension_numbers<[1], [0], [0], [1], [0, 0, 1, 1], [], []>} : vector<16x32xf32>, vector<32x32xf32>, vector<16x32xf32> -> vector<16x32xf32>
    %416 = vector.broadcast %396 : vector<1x32xf32> to vector<16x32xf32>
    %417 = arith.addf %415, %416 : vector<16x32xf32>
    %c2_220 = arith.constant 2 : index
    %c1_221 = arith.constant 1 : index
    %c0_222 = arith.constant 0 : index
    %c0_223 = arith.constant 0 : index
    %418 = vector.load %arg3[%c2_220, %c1_221, %c0_222, %c0_223] : memref<3x4x32x32xf32, #tpu.memory_space<vmem>>, vector<1x1x32x32xf32>
    %419 = vector.shape_cast %418 : vector<1x1x32x32xf32> to vector<32x32xf32>
    %cst_224 = arith.constant dense<0.000000e+00> : vector<16x32xf32>
    %420 = tpu.matmul %394, %419, %cst_224 {dimension_numbers = #tpu.dot_dimension_numbers<[1], [0], [0], [1], [0, 0, 1, 1], [], []>} : vector<16x32xf32>, vector<32x32xf32>, vector<16x32xf32> -> vector<16x32xf32>
    %421 = vector.broadcast %398 : vector<1x32xf32> to vector<16x32xf32>
    %422 = arith.addf %420, %421 : vector<16x32xf32>
    %c2_225 = arith.constant 2 : index
    %c2_226 = arith.constant 2 : index
    %c0_227 = arith.constant 0 : index
    %c0_228 = arith.constant 0 : index
    %423 = vector.load %arg3[%c2_225, %c2_226, %c0_227, %c0_228] : memref<3x4x32x32xf32, #tpu.memory_space<vmem>>, vector<1x1x32x32xf32>
    %424 = vector.shape_cast %423 : vector<1x1x32x32xf32> to vector<32x32xf32>
    %cst_229 = arith.constant dense<0.000000e+00> : vector<16x32xf32>
    %425 = tpu.matmul %394, %424, %cst_229 {dimension_numbers = #tpu.dot_dimension_numbers<[1], [0], [0], [1], [0, 0, 1, 1], [], []>} : vector<16x32xf32>, vector<32x32xf32>, vector<16x32xf32> -> vector<16x32xf32>
    %426 = vector.broadcast %400 : vector<1x32xf32> to vector<16x32xf32>
    %427 = arith.addf %425, %426 : vector<16x32xf32>
    %c2_230 = arith.constant 2 : index
    %c3_231 = arith.constant 3 : index
    %c0_232 = arith.constant 0 : index
    %c0_233 = arith.constant 0 : index
    %428 = vector.load %arg3[%c2_230, %c3_231, %c0_232, %c0_233] : memref<3x4x32x32xf32, #tpu.memory_space<vmem>>, vector<1x1x32x32xf32>
    %429 = vector.shape_cast %428 : vector<1x1x32x32xf32> to vector<32x32xf32>
    %430 = vector.extract_strided_slice %417 {offsets = [0, 0], sizes = [16, 8], strides = [1, 1]} : vector<16x32xf32> to vector<16x8xf32>
    %431 = vector.extract_strided_slice %422 {offsets = [0, 0], sizes = [16, 8], strides = [1, 1]} : vector<16x32xf32> to vector<16x8xf32>
    %cst_234 = arith.constant dense<0.000000e+00> : vector<16x16xf32>
    %432 = tpu.matmul %430, %431, %cst_234 {dimension_numbers = #tpu.dot_dimension_numbers<[1], [1], [0], [0], [0, 0, 1, 0], [], []>} : vector<16x8xf32>, vector<16x8xf32>, vector<16x16xf32> -> vector<16x16xf32>
    %cst_235 = arith.constant 0.353553385 : f32
    %433 = vector.broadcast %cst_235 : f32 to vector<16x16xf32>
    %434 = arith.mulf %432, %433 : vector<16x16xf32>
    %435 = arith.addf %434, %34 : vector<16x16xf32>
    %cst_236 = arith.constant dense<0xFF800000> : vector<16xf32>
    %436 = vector.multi_reduction <maximumf>, %435, %cst_236 [1] : vector<16x16xf32> to vector<16xf32>
    %437 = vector.shape_cast %436 : vector<16xf32> to vector<16x1xf32>
    %438 = vector.broadcast %437 : vector<16x1xf32> to vector<16x16xf32>
    %439 = arith.subf %435, %438 : vector<16x16xf32>
    %440 = math.exp %439 : vector<16x16xf32>
    %cst_237 = arith.constant dense<0.000000e+00> : vector<16xf32>
    %441 = vector.multi_reduction <add>, %440, %cst_237 [1] : vector<16x16xf32> to vector<16xf32>
    %442 = vector.shape_cast %441 : vector<16xf32> to vector<16x1xf32>
    %443 = tpu.reciprocal %442 {approx = true} : vector<16x1xf32> -> vector<16x1xf32>
    %444 = vector.broadcast %443 : vector<16x1xf32> to vector<16x16xf32>
    %445 = arith.mulf %440, %444 : vector<16x16xf32>
    %446 = vector.extract_strided_slice %427 {offsets = [0, 0], sizes = [16, 8], strides = [1, 1]} : vector<16x32xf32> to vector<16x8xf32>
    %cst_238 = arith.constant dense<0.000000e+00> : vector<16x8xf32>
    %447 = tpu.matmul %445, %446, %cst_238 {dimension_numbers = #tpu.dot_dimension_numbers<[1], [0], [0], [1], [0, 0, 1, 1], [], []>} : vector<16x16xf32>, vector<16x8xf32>, vector<16x8xf32> -> vector<16x8xf32>
    %448 = vector.extract_strided_slice %429 {offsets = [0, 0], sizes = [8, 32], strides = [1, 1]} : vector<32x32xf32> to vector<8x32xf32>
    %cst_239 = arith.constant dense<0.000000e+00> : vector<16x32xf32>
    %449 = tpu.matmul %447, %448, %cst_239 {dimension_numbers = #tpu.dot_dimension_numbers<[1], [0], [0], [1], [0, 0, 1, 1], [], []>} : vector<16x8xf32>, vector<8x32xf32>, vector<16x32xf32> -> vector<16x32xf32>
    %450 = vector.extract_strided_slice %417 {offsets = [0, 8], sizes = [16, 8], strides = [1, 1]} : vector<16x32xf32> to vector<16x8xf32>
    %451 = vector.extract_strided_slice %422 {offsets = [0, 8], sizes = [16, 8], strides = [1, 1]} : vector<16x32xf32> to vector<16x8xf32>
    %cst_240 = arith.constant dense<0.000000e+00> : vector<16x16xf32>
    %452 = tpu.matmul %450, %451, %cst_240 {dimension_numbers = #tpu.dot_dimension_numbers<[1], [1], [0], [0], [0, 0, 1, 0], [], []>} : vector<16x8xf32>, vector<16x8xf32>, vector<16x16xf32> -> vector<16x16xf32>
    %cst_241 = arith.constant 0.353553385 : f32
    %453 = vector.broadcast %cst_241 : f32 to vector<16x16xf32>
    %454 = arith.mulf %452, %453 : vector<16x16xf32>
    %455 = arith.addf %454, %34 : vector<16x16xf32>
    %cst_242 = arith.constant dense<0xFF800000> : vector<16xf32>
    %456 = vector.multi_reduction <maximumf>, %455, %cst_242 [1] : vector<16x16xf32> to vector<16xf32>
    %457 = vector.shape_cast %456 : vector<16xf32> to vector<16x1xf32>
    %458 = vector.broadcast %457 : vector<16x1xf32> to vector<16x16xf32>
    %459 = arith.subf %455, %458 : vector<16x16xf32>
    %460 = math.exp %459 : vector<16x16xf32>
    %cst_243 = arith.constant dense<0.000000e+00> : vector<16xf32>
    %461 = vector.multi_reduction <add>, %460, %cst_243 [1] : vector<16x16xf32> to vector<16xf32>
    %462 = vector.shape_cast %461 : vector<16xf32> to vector<16x1xf32>
    %463 = tpu.reciprocal %462 {approx = true} : vector<16x1xf32> -> vector<16x1xf32>
    %464 = vector.broadcast %463 : vector<16x1xf32> to vector<16x16xf32>
    %465 = arith.mulf %460, %464 : vector<16x16xf32>
    %466 = vector.extract_strided_slice %427 {offsets = [0, 8], sizes = [16, 8], strides = [1, 1]} : vector<16x32xf32> to vector<16x8xf32>
    %cst_244 = arith.constant dense<0.000000e+00> : vector<16x8xf32>
    %467 = tpu.matmul %465, %466, %cst_244 {dimension_numbers = #tpu.dot_dimension_numbers<[1], [0], [0], [1], [0, 0, 1, 1], [], []>} : vector<16x16xf32>, vector<16x8xf32>, vector<16x8xf32> -> vector<16x8xf32>
    %468 = vector.extract_strided_slice %429 {offsets = [8, 0], sizes = [8, 32], strides = [1, 1]} : vector<32x32xf32> to vector<8x32xf32>
    %cst_245 = arith.constant dense<0.000000e+00> : vector<16x32xf32>
    %469 = tpu.matmul %467, %468, %cst_245 {dimension_numbers = #tpu.dot_dimension_numbers<[1], [0], [0], [1], [0, 0, 1, 1], [], []>} : vector<16x8xf32>, vector<8x32xf32>, vector<16x32xf32> -> vector<16x32xf32>
    %470 = arith.addf %449, %469 : vector<16x32xf32>
    %471 = vector.extract_strided_slice %417 {offsets = [0, 16], sizes = [16, 8], strides = [1, 1]} : vector<16x32xf32> to vector<16x8xf32>
    %472 = vector.extract_strided_slice %422 {offsets = [0, 16], sizes = [16, 8], strides = [1, 1]} : vector<16x32xf32> to vector<16x8xf32>
    %cst_246 = arith.constant dense<0.000000e+00> : vector<16x16xf32>
    %473 = tpu.matmul %471, %472, %cst_246 {dimension_numbers = #tpu.dot_dimension_numbers<[1], [1], [0], [0], [0, 0, 1, 0], [], []>} : vector<16x8xf32>, vector<16x8xf32>, vector<16x16xf32> -> vector<16x16xf32>
    %cst_247 = arith.constant 0.353553385 : f32
    %474 = vector.broadcast %cst_247 : f32 to vector<16x16xf32>
    %475 = arith.mulf %473, %474 : vector<16x16xf32>
    %476 = arith.addf %475, %34 : vector<16x16xf32>
    %cst_248 = arith.constant dense<0xFF800000> : vector<16xf32>
    %477 = vector.multi_reduction <maximumf>, %476, %cst_248 [1] : vector<16x16xf32> to vector<16xf32>
    %478 = vector.shape_cast %477 : vector<16xf32> to vector<16x1xf32>
    %479 = vector.broadcast %478 : vector<16x1xf32> to vector<16x16xf32>
    %480 = arith.subf %476, %479 : vector<16x16xf32>
    %481 = math.exp %480 : vector<16x16xf32>
    %cst_249 = arith.constant dense<0.000000e+00> : vector<16xf32>
    %482 = vector.multi_reduction <add>, %481, %cst_249 [1] : vector<16x16xf32> to vector<16xf32>
    %483 = vector.shape_cast %482 : vector<16xf32> to vector<16x1xf32>
    %484 = tpu.reciprocal %483 {approx = true} : vector<16x1xf32> -> vector<16x1xf32>
    %485 = vector.broadcast %484 : vector<16x1xf32> to vector<16x16xf32>
    %486 = arith.mulf %481, %485 : vector<16x16xf32>
    %487 = vector.extract_strided_slice %427 {offsets = [0, 16], sizes = [16, 8], strides = [1, 1]} : vector<16x32xf32> to vector<16x8xf32>
    %cst_250 = arith.constant dense<0.000000e+00> : vector<16x8xf32>
    %488 = tpu.matmul %486, %487, %cst_250 {dimension_numbers = #tpu.dot_dimension_numbers<[1], [0], [0], [1], [0, 0, 1, 1], [], []>} : vector<16x16xf32>, vector<16x8xf32>, vector<16x8xf32> -> vector<16x8xf32>
    %489 = vector.extract_strided_slice %429 {offsets = [16, 0], sizes = [8, 32], strides = [1, 1]} : vector<32x32xf32> to vector<8x32xf32>
    %cst_251 = arith.constant dense<0.000000e+00> : vector<16x32xf32>
    %490 = tpu.matmul %488, %489, %cst_251 {dimension_numbers = #tpu.dot_dimension_numbers<[1], [0], [0], [1], [0, 0, 1, 1], [], []>} : vector<16x8xf32>, vector<8x32xf32>, vector<16x32xf32> -> vector<16x32xf32>
    %491 = arith.addf %470, %490 : vector<16x32xf32>
    %492 = vector.extract_strided_slice %417 {offsets = [0, 24], sizes = [16, 8], strides = [1, 1]} : vector<16x32xf32> to vector<16x8xf32>
    %493 = vector.extract_strided_slice %422 {offsets = [0, 24], sizes = [16, 8], strides = [1, 1]} : vector<16x32xf32> to vector<16x8xf32>
    %cst_252 = arith.constant dense<0.000000e+00> : vector<16x16xf32>
    %494 = tpu.matmul %492, %493, %cst_252 {dimension_numbers = #tpu.dot_dimension_numbers<[1], [1], [0], [0], [0, 0, 1, 0], [], []>} : vector<16x8xf32>, vector<16x8xf32>, vector<16x16xf32> -> vector<16x16xf32>
    %cst_253 = arith.constant 0.353553385 : f32
    %495 = vector.broadcast %cst_253 : f32 to vector<16x16xf32>
    %496 = arith.mulf %494, %495 : vector<16x16xf32>
    %497 = arith.addf %496, %34 : vector<16x16xf32>
    %cst_254 = arith.constant dense<0xFF800000> : vector<16xf32>
    %498 = vector.multi_reduction <maximumf>, %497, %cst_254 [1] : vector<16x16xf32> to vector<16xf32>
    %499 = vector.shape_cast %498 : vector<16xf32> to vector<16x1xf32>
    %500 = vector.broadcast %499 : vector<16x1xf32> to vector<16x16xf32>
    %501 = arith.subf %497, %500 : vector<16x16xf32>
    %502 = math.exp %501 : vector<16x16xf32>
    %cst_255 = arith.constant dense<0.000000e+00> : vector<16xf32>
    %503 = vector.multi_reduction <add>, %502, %cst_255 [1] : vector<16x16xf32> to vector<16xf32>
    %504 = vector.shape_cast %503 : vector<16xf32> to vector<16x1xf32>
    %505 = tpu.reciprocal %504 {approx = true} : vector<16x1xf32> -> vector<16x1xf32>
    %506 = vector.broadcast %505 : vector<16x1xf32> to vector<16x16xf32>
    %507 = arith.mulf %502, %506 : vector<16x16xf32>
    %508 = vector.extract_strided_slice %427 {offsets = [0, 24], sizes = [16, 8], strides = [1, 1]} : vector<16x32xf32> to vector<16x8xf32>
    %cst_256 = arith.constant dense<0.000000e+00> : vector<16x8xf32>
    %509 = tpu.matmul %507, %508, %cst_256 {dimension_numbers = #tpu.dot_dimension_numbers<[1], [0], [0], [1], [0, 0, 1, 1], [], []>} : vector<16x16xf32>, vector<16x8xf32>, vector<16x8xf32> -> vector<16x8xf32>
    %510 = vector.extract_strided_slice %429 {offsets = [24, 0], sizes = [8, 32], strides = [1, 1]} : vector<32x32xf32> to vector<8x32xf32>
    %cst_257 = arith.constant dense<0.000000e+00> : vector<16x32xf32>
    %511 = tpu.matmul %509, %510, %cst_257 {dimension_numbers = #tpu.dot_dimension_numbers<[1], [0], [0], [1], [0, 0, 1, 1], [], []>} : vector<16x8xf32>, vector<8x32xf32>, vector<16x32xf32> -> vector<16x32xf32>
    %512 = arith.addf %491, %511 : vector<16x32xf32>
    %513 = vector.broadcast %402 : vector<1x32xf32> to vector<16x32xf32>
    %514 = arith.addf %512, %513 : vector<16x32xf32>
    %515 = arith.addf %394, %514 : vector<16x32xf32>
    %cst_258 = arith.constant dense<0.000000e+00> : vector<16xf32>
    %516 = vector.multi_reduction <add>, %515, %cst_258 [1] : vector<16x32xf32> to vector<16xf32>
    %517 = vector.shape_cast %516 : vector<16xf32> to vector<16x1xf32>
    %cst_259 = arith.constant 3.200000e+01 : f32
    %518 = vector.broadcast %cst_259 : f32 to vector<16x1xf32>
    %519 = arith.divf %517, %518 : vector<16x1xf32>
    %520 = vector.broadcast %519 : vector<16x1xf32> to vector<16x32xf32>
    %521 = arith.subf %515, %520 : vector<16x32xf32>
    %522 = arith.mulf %521, %521 : vector<16x32xf32>
    %cst_260 = arith.constant dense<0.000000e+00> : vector<16xf32>
    %523 = vector.multi_reduction <add>, %522, %cst_260 [1] : vector<16x32xf32> to vector<16xf32>
    %524 = vector.shape_cast %523 : vector<16xf32> to vector<16x1xf32>
    %cst_261 = arith.constant 3.200000e+01 : f32
    %525 = vector.broadcast %cst_261 : f32 to vector<16x1xf32>
    %526 = arith.divf %524, %525 : vector<16x1xf32>
    %527 = vector.broadcast %519 : vector<16x1xf32> to vector<16x32xf32>
    %528 = arith.subf %515, %527 : vector<16x32xf32>
    %cst_262 = arith.constant 9.99999974E-6 : f32
    %529 = vector.broadcast %cst_262 : f32 to vector<16x1xf32>
    %530 = arith.addf %526, %529 : vector<16x1xf32>
    %531 = math.rsqrt %530 : vector<16x1xf32>
    %532 = vector.broadcast %531 : vector<16x1xf32> to vector<16x32xf32>
    %533 = arith.mulf %528, %532 : vector<16x32xf32>
    %534 = vector.broadcast %404 : vector<1x32xf32> to vector<16x32xf32>
    %535 = arith.mulf %533, %534 : vector<16x32xf32>
    %536 = vector.broadcast %406 : vector<1x32xf32> to vector<16x32xf32>
    %537 = arith.addf %535, %536 : vector<16x32xf32>
    %c2_263 = arith.constant 2 : index
    %c0_264 = arith.constant 0 : index
    %c0_265 = arith.constant 0 : index
    %538 = vector.load %arg5[%c2_263, %c0_264, %c0_265] : memref<3x32x128xf32, #tpu.memory_space<vmem>>, vector<1x32x128xf32>
    %539 = vector.shape_cast %538 : vector<1x32x128xf32> to vector<32x128xf32>
    %cst_266 = arith.constant dense<0.000000e+00> : vector<16x128xf32>
    %540 = tpu.matmul %537, %539, %cst_266 {dimension_numbers = #tpu.dot_dimension_numbers<[1], [0], [0], [1], [0, 0, 1, 1], [], []>} : vector<16x32xf32>, vector<32x128xf32>, vector<16x128xf32> -> vector<16x128xf32>
    %c2_267 = arith.constant 2 : index
    %c0_268 = arith.constant 0 : index
    %c0_269 = arith.constant 0 : index
    %541 = vector.load %arg6[%c2_267, %c0_268, %c0_269] : memref<3x1x128xf32, #tpu.memory_space<vmem>>, vector<1x1x128xf32>
    %542 = vector.shape_cast %541 : vector<1x1x128xf32> to vector<1x128xf32>
    %543 = vector.broadcast %542 : vector<1x128xf32> to vector<16x128xf32>
    %544 = arith.addf %540, %543 : vector<16x128xf32>
    %cst_270 = arith.constant 0.000000e+00 : f32
    %545 = vector.broadcast %cst_270 : f32 to vector<16x128xf32>
    %546 = arith.maximumf %544, %545 : vector<16x128xf32>
    %c2_271 = arith.constant 2 : index
    %c0_272 = arith.constant 0 : index
    %c0_273 = arith.constant 0 : index
    %547 = vector.load %arg7[%c2_271, %c0_272, %c0_273] : memref<3x128x32xf32, #tpu.memory_space<vmem>>, vector<1x128x32xf32>
    %548 = vector.shape_cast %547 : vector<1x128x32xf32> to vector<128x32xf32>
    %cst_274 = arith.constant dense<0.000000e+00> : vector<16x32xf32>
    %549 = tpu.matmul %546, %548, %cst_274 {dimension_numbers = #tpu.dot_dimension_numbers<[1], [0], [0], [1], [0, 0, 1, 1], [], []>} : vector<16x128xf32>, vector<128x32xf32>, vector<16x32xf32> -> vector<16x32xf32>
    %550 = vector.broadcast %408 : vector<1x32xf32> to vector<16x32xf32>
    %551 = arith.addf %549, %550 : vector<16x32xf32>
    %552 = arith.addf %537, %551 : vector<16x32xf32>
    %cst_275 = arith.constant dense<0.000000e+00> : vector<16xf32>
    %553 = vector.multi_reduction <add>, %552, %cst_275 [1] : vector<16x32xf32> to vector<16xf32>
    %554 = vector.shape_cast %553 : vector<16xf32> to vector<16x1xf32>
    %cst_276 = arith.constant 3.200000e+01 : f32
    %555 = vector.broadcast %cst_276 : f32 to vector<16x1xf32>
    %556 = arith.divf %554, %555 : vector<16x1xf32>
    %557 = vector.broadcast %556 : vector<16x1xf32> to vector<16x32xf32>
    %558 = arith.subf %552, %557 : vector<16x32xf32>
    %559 = arith.mulf %558, %558 : vector<16x32xf32>
    %cst_277 = arith.constant dense<0.000000e+00> : vector<16xf32>
    %560 = vector.multi_reduction <add>, %559, %cst_277 [1] : vector<16x32xf32> to vector<16xf32>
    %561 = vector.shape_cast %560 : vector<16xf32> to vector<16x1xf32>
    %cst_278 = arith.constant 3.200000e+01 : f32
    %562 = vector.broadcast %cst_278 : f32 to vector<16x1xf32>
    %563 = arith.divf %561, %562 : vector<16x1xf32>
    %564 = vector.broadcast %556 : vector<16x1xf32> to vector<16x32xf32>
    %565 = arith.subf %552, %564 : vector<16x32xf32>
    %cst_279 = arith.constant 9.99999974E-6 : f32
    %566 = vector.broadcast %cst_279 : f32 to vector<16x1xf32>
    %567 = arith.addf %563, %566 : vector<16x1xf32>
    %568 = math.rsqrt %567 : vector<16x1xf32>
    %569 = vector.broadcast %568 : vector<16x1xf32> to vector<16x32xf32>
    %570 = arith.mulf %565, %569 : vector<16x32xf32>
    %571 = vector.broadcast %410 : vector<1x32xf32> to vector<16x32xf32>
    %572 = arith.mulf %570, %571 : vector<16x32xf32>
    %573 = vector.broadcast %412 : vector<1x32xf32> to vector<16x32xf32>
    %574 = arith.addf %572, %573 : vector<16x32xf32>
    %575 = vector.shape_cast %574 : vector<16x32xf32> to vector<2x8x32xf32>
    %cst_280 = arith.constant dense<0.000000e+00> : vector<2x32xf32>
    %576 = vector.multi_reduction <add>, %575, %cst_280 [1] : vector<2x8x32xf32> to vector<2x32xf32>
    %cst_281 = arith.constant 8.000000e+00 : f32
    %577 = vector.broadcast %cst_281 : f32 to vector<2x32xf32>
    %578 = arith.divf %576, %577 : vector<2x32xf32>
    %c0_282 = arith.constant 0 : index
    %c0_283 = arith.constant 0 : index
    %579 = vector.load %arg8[%c0_282, %c0_283] : memref<2x32xf32, #tpu.memory_space<vmem>>, vector<1x32xf32>
    %c1_284 = arith.constant 1 : index
    %c0_285 = arith.constant 0 : index
    %580 = vector.load %arg8[%c1_284, %c0_285] : memref<2x32xf32, #tpu.memory_space<vmem>>, vector<1x32xf32>
    %cst_286 = arith.constant dense<0.000000e+00> : vector<2xf32>
    %581 = vector.multi_reduction <add>, %578, %cst_286 [1] : vector<2x32xf32> to vector<2xf32>
    %582 = vector.shape_cast %581 : vector<2xf32> to vector<2x1xf32>
    %cst_287 = arith.constant 3.200000e+01 : f32
    %583 = vector.broadcast %cst_287 : f32 to vector<2x1xf32>
    %584 = arith.divf %582, %583 : vector<2x1xf32>
    %585 = vector.broadcast %584 : vector<2x1xf32> to vector<2x32xf32>
    %586 = arith.subf %578, %585 : vector<2x32xf32>
    %587 = arith.mulf %586, %586 : vector<2x32xf32>
    %cst_288 = arith.constant dense<0.000000e+00> : vector<2xf32>
    %588 = vector.multi_reduction <add>, %587, %cst_288 [1] : vector<2x32xf32> to vector<2xf32>
    %589 = vector.shape_cast %588 : vector<2xf32> to vector<2x1xf32>
    %cst_289 = arith.constant 3.200000e+01 : f32
    %590 = vector.broadcast %cst_289 : f32 to vector<2x1xf32>
    %591 = arith.divf %589, %590 : vector<2x1xf32>
    %592 = vector.broadcast %584 : vector<2x1xf32> to vector<2x32xf32>
    %593 = arith.subf %578, %592 : vector<2x32xf32>
    %cst_290 = arith.constant 9.99999974E-6 : f32
    %594 = vector.broadcast %cst_290 : f32 to vector<2x1xf32>
    %595 = arith.addf %591, %594 : vector<2x1xf32>
    %596 = math.rsqrt %595 : vector<2x1xf32>
    %597 = vector.broadcast %596 : vector<2x1xf32> to vector<2x32xf32>
    %598 = arith.mulf %593, %597 : vector<2x32xf32>
    %599 = vector.broadcast %579 : vector<1x32xf32> to vector<2x32xf32>
    %600 = arith.mulf %598, %599 : vector<2x32xf32>
    %601 = vector.broadcast %580 : vector<1x32xf32> to vector<2x32xf32>
    %602 = arith.addf %600, %601 : vector<2x32xf32>
    %c0_291 = arith.constant 0 : index
    %c0_292 = arith.constant 0 : index
    %603 = vector.load %arg9[%c0_291, %c0_292] : memref<33x5xf32, #tpu.memory_space<vmem>>, vector<32x5xf32>
    %cst_293 = arith.constant dense<0.000000e+00> : vector<2x5xf32>
    %604 = tpu.matmul %602, %603, %cst_293 {dimension_numbers = #tpu.dot_dimension_numbers<[1], [0], [0], [1], [0, 0, 1, 1], [], []>} : vector<2x32xf32>, vector<32x5xf32>, vector<2x5xf32> -> vector<2x5xf32>
    %c32 = arith.constant 32 : index
    %c0_294 = arith.constant 0 : index
    %605 = vector.load %arg9[%c32, %c0_294] : memref<33x5xf32, #tpu.memory_space<vmem>>, vector<1x5xf32>
    %606 = vector.broadcast %605 : vector<1x5xf32> to vector<2x5xf32>
    %607 = arith.addf %604, %606 : vector<2x5xf32>
    %c0_295 = arith.constant 0 : index
    %c0_296 = arith.constant 0 : index
    %608 = vector.load %arg10[%c0_295, %c0_296] : memref<2x5xf32, #tpu.memory_space<vmem>>, vector<2x5xf32>
    tpu.vector_store %arg10[%c0_295, %c0_296], %607 {strides = array<i32>} : memref<2x5xf32, #tpu.memory_space<vmem>>, vector<2x5xf32>,
    return
  }
}

</mosaic_0001>

<bundles_post_ra>
// kernel: forward.1
= control target key start
LH: loop header
LB: loop body
LE: loop exit
PB: predicated region body
PF: predicated region fallthrough
CT: control target
= control target key end

     0   :  { %vm48_vm0 = vcmask 1045504   ;;  %vm41_vm1 = vcmask 48128   ;;  %s4052_s0 = inlined_call_operand.vmem [shape: f32[16,6], index: 0, kind: input, shape index: {}]   ;;  %s4053_s1 = inlined_call_operand.vmem [shape: f32[6,32], index: 1, kind: input, shape index: {}]   ;;  %s4054_s2 = inlined_call_operand.vmem [shape: f32[16,32], index: 2, kind: input, shape index: {}]   ;;  %s4055_s3 = inlined_call_operand.vmem [shape: f32[3,4,32,32], index: 3, kind: input, shape index: {}]   ;;  %s4056_s4 = inlined_call_operand.vmem [shape: f32[3,9,32], index: 4, kind: input, shape index: {}]   ;;  %s4057_s5 = inlined_call_operand.vmem [shape: f32[3,32,128], index: 5, kind: input, shape index: {}]   ;;  %s4058_s6 = inlined_call_operand.vmem [shape: f32[3,1,128], index: 6, kind: input, shape index: {}]   ;;  %s4059_s7 = inlined_call_operand.vmem [shape: f32[3,128,32], index: 7, kind: input, shape index: {}]   ;;  %s4060_s8 = inlined_call_operand.vmem [shape: f32[2,32], index: 8, kind: input, shape index: {}]   ;;  %s4061_s9 = inlined_call_operand.vmem [shape: f32[33,5], index: 9, kind: input, shape index: {}]   ;;  %s4062_s10 = inlined_call_operand.hbm [shape: f32[2,5], index: 10, kind: output, shape index: {}]  }
   0x1   :  { %v38_v0 = vld [vmem:[%s4053_s1] sm:$0x3f]  ;;  %v118_v2 = vld [vmem:[%s4055_s3 + $0x18] sm:$0xff]  ;;  %v117_v4 = vld [vmem:[%s4055_s3 + $0x10] sm:$0xff] }
   0x2   :  { %v36_v1 = vld [vmem:[%s4052_s0] sm:$0xff]  ;;  %2663 = vmatpush.msk.msra.mxu0 %vm48_vm0, %v38_v0  ;;  %v2671_v3 = vld [vmem:[%s4055_s3 + $0x38] sm:$0xff]  ;;  %139 = vmatpush.msra.mxu3 %v118_v2  ;;  %v2670_v5 = vld [vmem:[%s4055_s3 + $0x30] sm:$0xff] }
   0x3   :  { %2664 = vmatmul.msk.f32.vlgmr.msra.gmra.mxu0 %vm41_vm1, %v36_v1  ;;  %168 = vmatpush.msra.mxu2 %v2671_v3  ;;  %v37_v6 = vld [vmem:[%s4052_s0 + $0x8] sm:$0xff] }
   0x4   :  { %140 = vmatpush.msra.mxu3 %v117_v4 }
   0x5   :  { %169 = vmatpush.msra.mxu2 %v2670_v5 }
   0xb   :  { %2665 = vmatmul.msk.f32.gmra.mxu0 %vm41_vm1, %v37_v6 }
   0xc   :  { %15 = vsyncpa [#allocation3], 0  ;;  %v116_v7 = vld [vmem:[%s4055_s3 + $0x8] sm:$0xff]  ;;  %v115_v9 = vld [vmem:[%s4055_s3] sm:$0xff]  ;;  %vm120_vm2 = vcmask 261120   ;;  %vm213_vm3 = vcmask 64512   ;;  %v78_v41 = vlaneseq }
   0xd   :  { %v2669_v8 = vld [vmem:[%s4055_s3 + $0x28] sm:$0xff]  ;;  %141 = vmatpush.msra.mxu3 %v116_v7  ;;  %v2668_v10 = vld [vmem:[%s4055_s3 + $0x20] sm:$0xff]  ;;  %v2677_v11 = vld [vmem:[%s4055_s3 + $0x58] sm:$0xff]  ;;  %s3129_s30 = smov 112   ;;  %s3130_s11 = smov 104   ;;  %vm253_vm5 = vcmask 130048  }
   0xe   :  { %170 = vmatpush.msra.mxu2 %v2669_v8  ;;  %v2676_v12 = vld [vmem:[%s4055_s3 + $0x50] sm:$0xff]  ;;  %v2675_v13 = vld [vmem:[%s4055_s3 + $0x48] sm:$0xff]  ;;  %v2674_v14 = vld [vmem:[%s4055_s3 + $0x40] sm:$0xff]  ;;  %v79_v43 = vand.u32 127, %v78_v41  ;;  %v3131_v45 = vmov -1e+09  }
   0xf   :  { %142 = vmatpush.msra.mxu3 %v115_v9  ;;  %v39_v15 = vld [vmem:[%s4054_s2] sm:$0xff]  ;;  %v40_v18 = vld [vmem:[%s4054_s2 + $0x8] sm:$0xff]  ;;  %s3128_s2 = smov 120   ;;  %s3134_s14 = smov [#allocation2]  }
  0x10   :  { %171 = vmatpush.msra.mxu2 %v2668_v10  ;;  %v2944_v23 = vld [vmem:[%s4056_s4 + $0x1] ss:$0 sm:$0xff]  ;;  %v2943_v27 = vld [vmem:[%s4056_s4] ss:$0 sm:$0xff]  ;;  %v2945_v31 = vld [vmem:[%s4056_s4 + $0x2] ss:$0 sm:$0xff] }
  0x11   :  { %197 = vmatpush.msrb.mxu3 %v2677_v11  ;;  %vm87_vm4 = vcmp.lt.s32.totalorder %v79_v43, 8  ;;  %vm97_vm6 = vcmp.ge.s32.totalorder %v79_v43, 8  ;;  %vm98_vm7 = vcmp.lt.s32.totalorder %v79_v43, 16  ;;  %v2680_v2 = vld [vmem:[%s4055_s3 + $0x60] sm:$0xff] }
  0x12   :  { %v3291_v46 = vsel %vm87_vm4, 0.0, %v3131_v45  ;;  %vm99_vm8 = vmand %vm97_vm6, %vm98_vm7 }
  0x13   :  { %198 = vmatpush.msrb.mxu3 %v2676_v12  ;;  %v3295_v51 = vsel %vm99_vm8, 0.0, %v3131_v45 }
  0x15   :  { %199 = vmatpush.msrb.mxu3 %v2675_v13 }
  0x17   :  { %200 = vmatpush.msrb.mxu3 %v2674_v14 }
  0x80   :  { %v69_v16 = vpop.f32.mrf.mxu0 }
  0x81   :  { %v3238_v17 = vadd.f32 %v69_v16, %v39_v15 }
  0x83   :  { %2666 = vmatmul.msk.f32.vlgmr.msra.gmra.mxu3 %vm120_vm2, %v3238_v17  ;;  %2672 = vmatmul.msk.f32.vlgmr.msra.gmra.mxu2 %vm120_vm2, %v3238_v17 }
  0x88   :  { %v72_v19 = vpop.f32.mrf.mxu0 }
  0x89   :  { %v3247_v20 = vadd.f32 %v72_v19, %v40_v18 }
  0x8b   :  { %2667 = vmatmul.msk.f32.gmra.mxu3 %vm120_vm2, %v3247_v20  ;;  %2673 = vmatmul.msk.f32.gmra.mxu2 %vm120_vm2, %v3247_v20 }
  0x93   :  { %2678 = vmatmul.msk.f32.vlgmr.msrb.gmra.mxu3 %vm120_vm2, %v3238_v17 }
  0x9b   :  { %2679 = vmatmul.msk.f32.gmra.mxu3 %vm120_vm2, %v3247_v20 }
 0x106   :  { %v144_v21 = vpop.f32.mrf.mxu3  ;;  %v173_v22 = vpop.f32.mrf.mxu2 }
 0x107   :  { %v174_v28 = vadd.f32 %v2944_v23, %v173_v22  ;;  %v3266_v29 = vadd.f32 %v2943_v27, %v144_v21 }
 0x10e   :  { %v147_v24 = vpop.f32.mrf.mxu3  ;;  %v176_v25 = vpop.f32.mrf.mxu2 }
 0x10f   :  { %v177_v26 = vadd.f32 %v2944_v23, %v176_v25  ;;  %v3274_v32 = vadd.f32 %v2943_v27, %v147_v24 }
 0x111   :  { %311 = vrot.lane.b32.xlu2 %v177_v26, %s3128_s2  ;;  %2684 = vmatpush.xpose.msk.msrb.mxu0 %vm213_vm3, %v177_v26 }
 0x115   :  { %2685 = vmatpush.xpose.msk.msrb.mxu0 %vm213_vm3, %v174_v28 }
 0x116   :  { %v202_v30 = vpop.f32.mrf.mxu3 }
 0x117   :  { %v203_v34 = vadd.f32 %v2945_v31, %v202_v30 }
 0x118   :  { %2686 = vmatmul.msk.f32.vlgmr.msrb.gmra.mxu0 %vm213_vm3, %v3266_v29 }
 0x119   :  { %309 = vrot.lane.b32.xlu2 %v174_v28, %s3128_s2 }
 0x11e   :  { %v205_v33 = vpop.f32.mrf.mxu3 }
 0x11f   :  { %v206_v35 = vadd.f32 %v2945_v31, %v205_v33 }
 0x120   :  { %2687 = vmatmul.msk.f32.gmra.mxu0 %vm213_vm3, %v3274_v32 }
 0x121   :  { %471 = vrot.lane.b32.xlu2 %v177_v26, %s3129_s30  ;;  %296 = vmatpush.msra.mxu1 %v206_v35  ;;  %v3279_v36 = vpack.i.bf16 %v203_v34, %v206_v35 }
 0x123   :  { %297 = vmatpush.msra.mxu1 %v203_v34 }
 0x125   :  { %457 = vmatpush.msrb.mxu1 %v2680_v2 }
 0x129   :  { %602 = vrot.lane.b32.xlu2 %v177_v26, %s3130_s11 }
 0x131   :  { %469 = vrot.lane.b32.xlu2 %v174_v28, %s3129_s30 }
 0x139   :  { %465 = vrot.lane.b32.xlu2 %v3266_v29, %s3129_s30 }
 0x141   :  { %598 = vrot.lane.b32.xlu2 %v3274_v32, %s3130_s11 }
 0x16b   :  { %v312_v37 = vpop.permute.xlu2 %311 }
 0x16c   :  { %2690 = vmatpush.xpose.msk.msrb.mxu2 %vm213_vm3, %v312_v37 }
 0x173   :  { %v310_v38 = vpop.permute.xlu2 %309 }
 0x174   :  { %2691 = vmatpush.xpose.msk.msrb.mxu2 %vm213_vm3, %v310_v38 }
 0x17b   :  { %v472_v39 = vpop.permute.xlu2 %471 }
 0x17c   :  { %2700 = vmatpush.xpose.msk.msra.mxu2 %vm213_vm3, %v472_v39 }
 0x183   :  { %v603_v40 = vpop.permute.xlu2 %602 }
 0x18b   :  { %v470_v42 = vpop.permute.xlu2 %469 }
 0x18c   :  { %2701 = vmatpush.xpose.msk.msra.mxu2 %vm213_vm3, %v470_v42 }
 0x193   :  { %v466_v15 = vpop.permute.xlu2 %465 }
 0x195   :  { %v243_v44 = vpop.f32.mrf.mxu0 }
 0x196   :  { %v249_v47 = vmul.f32 0.35355338, %v243_v44 }
 0x198   :  { %v251_v48 = vadd.f32 %v249_v47, %v3291_v46 }
 0x19a   :  { %v254_v49 = vsel %vm253_vm5, %v251_v48, -inf }
 0x19b   :  { %255 = vmax.xlane.f32.xlu0 %v254_v49  ;;  %v599_v22 = vpop.permute.xlu2 %598 }
 0x19d   :  { %v246_v50 = vpop.f32.mrf.mxu0 }
 0x19e   :  { %v250_v52 = vmul.f32 0.35355338, %v246_v50 }
 0x1a0   :  { %v252_v53 = vadd.f32 %v250_v52, %v3295_v51 }
 0x1a2   :  { %v257_v54 = vsel %vm253_vm5, %v252_v53, -inf }
 0x1a3   :  { %258 = vmax.xlane.f32.xlu0 %v257_v54 }
 0x1b7   :  { %305 = vrot.lane.b32.xlu0 %v3266_v29, %s3128_s2 }
 0x1bf   :  { %600 = vrot.lane.b32.xlu0 %v174_v28, %s3130_s11 }
 0x1c7   :  { %467 = vrot.lane.b32.xlu0 %v3274_v32, %s3129_s30 }
 0x20e   :  { %v256_v55 = vpop.xlane.xlu0 %255 }
 0x20f   :  { %v260_v56 = vsub.f32 %v251_v48, %v256_v55 }
 0x211   :  { %v262_v57 = vmul.f32 1.442695, %v260_v56 }
 0x213   :  { %2976 = vpow2.f32 %v262_v57 }
 0x216   :  { %v259_v58 = vpop.xlane.xlu0 %258 }
 0x217   :  { %v261_v59 = vsub.f32 %v252_v53, %v259_v58 }
 0x219   :  { %v2977_v60 = vpop.eup %2976  ;;  %v264_v61 = vmul.f32 1.442695, %v261_v59 }
 0x21a   :  { %v266_v62 = vsel %vm253_vm5, %v2977_v60, 0.0 }
 0x21b   :  { %2978 = vpow2.f32 %v264_v61  ;;  %267 = vadd.xlane.f32.xlu1 %v266_v62 }
 0x221   :  { %v2979_v63 = vpop.eup %2978 }
 0x222   :  { %v269_v0 = vsel %vm253_vm5, %v2979_v63, 0.0 }
 0x223   :  { %270 = vadd.xlane.f32.xlu1 %v269_v0 }
 0x229   :  { %v306_v1 = vpop.permute.xlu0 %305 }
 0x22a   :  { %2692 = vmatmul.msk.f32.vlgmr.msrb.gmra.mxu2 %vm213_vm3, %v306_v1 }
 0x231   :  { %v601_v7 = vpop.permute.xlu0 %600 }
 0x239   :  { %v468_v16 = vpop.permute.xlu0 %467 }
 0x23c   :  { %307 = vrot.lane.b32.xlu1 %v3274_v32, %s3128_s2 }
 0x244   :  { %596 = vrot.lane.b32.xlu1 %v3266_v29, %s3130_s11 }
 0x28e   :  { %v268_v3 = vpop.xlane.xlu1 %267 }
 0x28f   :  { %2980 = vrcp.f32 %v268_v3 }
 0x295   :  { %v2981_v4 = vpop.eup %2980 }
 0x296   :  { %v271_v5 = vpop.xlane.xlu1 %270  ;;  %v274_v6 = vmul.f32 %v2981_v4, %v2977_v60 }
 0x297   :  { %2982 = vrcp.f32 %v271_v5 }
 0x298   :  { %2688 = vmatmul.msk.f32.vlgmr.msra.gmra.mxu1 %vm253_vm5, %v274_v6 }
 0x299   :  { %2708 = vmatpush.xpose.msk.msra.mxu1 %vm213_vm3, %v603_v40 }
 0x29d   :  { %v2983_v8 = vpop.eup %2982  ;;  %2709 = vmatpush.xpose.msk.msra.mxu1 %vm213_vm3, %v601_v7 }
 0x29e   :  { %v275_v9 = vmul.f32 %v2983_v8, %v2979_v63 }
 0x2a0   :  { %2689 = vmatmul.msk.f32.gmra.mxu1 %vm253_vm5, %v275_v9 }
 0x2ad   :  { %v338_v10 = vpop.f32.mrf.mxu2 }
 0x2ae   :  { %v344_v11 = vmul.f32 0.35355338, %v338_v10  ;;  %v308_v12 = vpop.permute.xlu1 %307 }
 0x2af   :  { %2693 = vmatmul.msk.f32.gmra.mxu2 %vm213_vm3, %v308_v12 }
 0x2b0   :  { %v346_v13 = vadd.f32 %v344_v11, %v3291_v46 }
 0x2b2   :  { %v348_v14 = vsel %vm253_vm5, %v346_v13, -inf }
 0x2b3   :  { %349 = vmax.xlane.f32.xlu1 %v348_v14 }
 0x2b6   :  { %v597_v21 = vpop.permute.xlu1 %596 }
 0x2b7   :  { %2702 = vmatmul.msk.f32.vlgmr.msra.gmra.mxu2 %vm213_vm3, %v466_v15 }
 0x2bf   :  { %2703 = vmatmul.msk.f32.gmra.mxu2 %vm213_vm3, %v468_v16 }
 0x315   :  { %v299_v18 = vpop.f32.mrf.mxu1 }
 0x316   :  { %2698 = vmatmul.msk.f32.vlgmr.msrb.gmra.mxu1 %vm213_vm3, %v299_v18 }
 0x31d   :  { %v302_v19 = vpop.f32.mrf.mxu1 }
 0x31e   :  { %2699 = vmatmul.msk.f32.gmra.mxu1 %vm213_vm3, %v302_v19 }
 0x326   :  { %2710 = vmatmul.msk.f32.vlgmr.msra.gmra.mxu1 %vm213_vm3, %v597_v21  ;;  %v350_v24 = vpop.xlane.xlu1 %349 }
 0x327   :  { %v354_v27 = vsub.f32 %v346_v13, %v350_v24 }
 0x329   :  { %v356_v29 = vmul.f32 1.442695, %v354_v27 }
 0x32b   :  { %2984 = vpow2.f32 %v356_v29 }
 0x32e   :  { %2711 = vmatmul.msk.f32.gmra.mxu1 %vm213_vm3, %v599_v22 }
 0x331   :  { %v3331_v34 = vpop.eup %2984 }
 0x332   :  { %v341_v23 = vpop.f32.mrf.mxu2  ;;  %v360_v35 = vsel %vm253_vm5, %v3331_v34, 0.0 }
 0x333   :  { %v345_v25 = vmul.f32 0.35355338, %v341_v23 }
 0x335   :  { %v347_v26 = vadd.f32 %v345_v25, %v3295_v51 }
 0x337   :  { %v351_v28 = vsel %vm253_vm5, %v347_v26, -inf }
 0x338   :  { %352 = vmax.xlane.f32.xlu0 %v351_v28 }
 0x33a   :  { %v498_v30 = vpop.f32.mrf.mxu2 }
 0x33b   :  { %v504_v31 = vmul.f32 0.35355338, %v498_v30 }
 0x33d   :  { %v506_v32 = vadd.f32 %v504_v31, %v3291_v46  ;;  %v2681_v31 = vld [vmem:[%s4055_s3 + $0x68] sm:$0xff] }
 0x33e   :  { %428 = vmatpush.msra.mxu0 %v2681_v31 }
 0x33f   :  { %v508_v33 = vsel %vm253_vm5, %v506_v32, -inf }
 0x340   :  { %509 = vmax.xlane.f32.xlu1 %v508_v33 }
 0x342   :  { %v501_v41 = vpop.f32.mrf.mxu2 }
 0x343   :  { %v505_v43 = vmul.f32 0.35355338, %v501_v41 }
 0x345   :  { %v507_v50 = vadd.f32 %v505_v43, %v3295_v51 }
 0x347   :  { %v511_v55 = vsel %vm253_vm5, %v507_v50, -inf }
 0x348   :  { %361 = vadd.xlane.f32.xlu1 %v360_v35 }
 0x393   :  { %v3335_v37 = vpop.f32.mrf.mxu1 }
 0x39b   :  { %v3337_v38 = vpop.f32.mrf.mxu1 }
 0x3a3   :  { %v629_v39 = vpop.f32.mrf.mxu1 }
 0x3a4   :  { %v635_v40 = vmul.f32 0.35355338, %v629_v39 }
 0x3a6   :  { %v637_v42 = vadd.f32 %v635_v40, %v3291_v46 }
 0x3a8   :  { %v639_v44 = vsel %vm253_vm5, %v637_v42, -inf }
 0x3a9   :  { %640 = vmax.xlane.f32.xlu2 %v639_v44 }
 0x3ab   :  { %v632_v45 = vpop.f32.mrf.mxu1  ;;  %v353_v47 = vpop.xlane.xlu0 %352 }
 0x3ac   :  { %v636_v48 = vmul.f32 0.35355338, %v632_v45  ;;  %v355_v49 = vsub.f32 %v347_v26, %v353_v47 }
 0x3ae   :  { %v358_v52 = vmul.f32 1.442695, %v355_v49  ;;  %v638_v53 = vadd.f32 %v636_v48, %v3295_v51 }
 0x3b0   :  { %2986 = vpow2.f32 %v358_v52  ;;  %v642_v54 = vsel %vm253_vm5, %v638_v53, -inf  ;;  %v2683_v52 = vld [vmem:[%s4055_s3 + $0x78] sm:$0xff] }
 0x3b1   :  { %643 = vmax.xlane.f32.xlu0 %v642_v54  ;;  %512 = vmax.xlane.f32.xlu2 %v511_v55 }
 0x3b3   :  { %v510_v56 = vpop.xlane.xlu1 %509 }
 0x3b4   :  { %v514_v57 = vsub.f32 %v506_v32, %v510_v56 }
 0x3b6   :  { %v2987_v58 = vpop.eup %2986  ;;  %v516_v59 = vmul.f32 1.442695, %v514_v57 }
 0x3b7   :  { %v363_v60 = vsel %vm253_vm5, %v2987_v58, 0.0 }
 0x3b8   :  { %2988 = vpow2.f32 %v516_v59 }
 0x3b9   :  { %364 = vadd.xlane.f32.xlu2 %v363_v60 }
 0x3bb   :  { %v362_v10 = vpop.xlane.xlu1 %361 }
 0x3be   :  { %v2989_v61 = vpop.eup %2988 }
 0x3bf   :  { %v520_v62 = vsel %vm253_vm5, %v2989_v61, 0.0 }
 0x3c1   :  { %521 = vadd.xlane.f32.xlu2 %v520_v62 }
 0x3c5   :  { %2899 = vrot.lane.b32.xlu0 %v3279_v36, %s3128_s2 }
 0x3cd   :  { %2909 = vrot.lane.b32.xlu0 %v3279_v36, %s3129_s30 }
 0x41c   :  { %v641_v63 = vpop.xlane.xlu2 %640 }
 0x41d   :  { %v645_v0 = vsub.f32 %v637_v42, %v641_v63 }
 0x41f   :  { %v647_v1 = vmul.f32 1.442695, %v645_v0 }
 0x421   :  { %2990 = vpow2.f32 %v647_v1 }
 0x424   :  { %v644_v2 = vpop.xlane.xlu0 %643  ;;  %v513_v3 = vpop.xlane.xlu2 %512 }
 0x425   :  { %v646_v4 = vsub.f32 %v638_v53, %v644_v2  ;;  %v515_v7 = vsub.f32 %v507_v50, %v513_v3 }
 0x427   :  { %v2991_v5 = vpop.eup %2990  ;;  %v649_v6 = vmul.f32 1.442695, %v646_v4  ;;  %v518_v9 = vmul.f32 1.442695, %v515_v7 }
 0x428   :  { %v651_v8 = vsel %vm253_vm5, %v2991_v5, 0.0 }
 0x429   :  { %652 = vadd.xlane.f32.xlu1 %v651_v8  ;;  %2992 = vpow2.f32 %v649_v6 }
 0x42a   :  { %2994 = vpow2.f32 %v518_v9 }
 0x42b   :  { %2996 = vrcp.f32 %v362_v10  ;;  %v3132_v10 = vmov 32.0  }
 0x42c   :  { %v365_v13 = vpop.xlane.xlu2 %364 }
 0x42d   :  { %2998 = vrcp.f32 %v365_v13 }
 0x42f   :  { %v2993_v11 = vpop.eup %2992 }
 0x430   :  { %v654_v12 = vsel %vm253_vm5, %v2993_v11, 0.0  ;;  %v2995_v14 = vpop.eup %2994 }
 0x431   :  { %655 = vadd.xlane.f32.xlu2 %v654_v12  ;;  %v2997_v16 = vpop.eup %2996  ;;  %v523_v19 = vsel %vm253_vm5, %v2995_v14, 0.0 }
 0x432   :  { %v368_v22 = vmul.f32 %v2997_v16, %v3331_v34 }
 0x433   :  { %v2999_v25 = vpop.eup %2998 }
 0x434   :  { %v522_v23 = vpop.xlane.xlu2 %521  ;;  %v369_v28 = vmul.f32 %v2999_v25, %v2987_v58 }
 0x435   :  { %3000 = vrcp.f32 %v522_v23 }
 0x437   :  { %v2900_v15 = vpop.permute.xlu0 %2899 }
 0x438   :  { %v2901_v18 = vunpack.i.l.bf16 %v2900_v15  ;;  %v2902_v21 = vunpack.i.h.bf16 %v2900_v15 }
 0x439   :  { %524 = vadd.xlane.f32.xlu2 %v523_v19 }
 0x43a   :  { %398 = vmatpush.msra.mxu3 %v2901_v18 }
 0x43b   :  { %v3001_v29 = vpop.eup %3000 }
 0x43c   :  { %399 = vmatpush.msra.mxu3 %v2902_v21  ;;  %v528_v30 = vmul.f32 %v3001_v29, %v2989_v61  ;;  %v2946_v61 = vld [vmem:[%s4056_s4 + $0x3] ss:$0 sm:$0xff] }
 0x43d   :  { %2694 = vmatmul.msk.f32.vlgmr.msra.gmra.mxu3 %vm253_vm5, %v368_v22  ;;  %v789_v29 = vld [vmem:[%s4057_s5] sm:$0xff] }
 0x43f   :  { %v2910_v24 = vpop.permute.xlu0 %2909 }
 0x440   :  { %v2911_v26 = vunpack.i.l.bf16 %v2910_v24  ;;  %v2912_v27 = vunpack.i.h.bf16 %v2910_v24 }
 0x442   :  { %2904 = vrot.lane.b32.xlu1 %v3279_v36, %s3130_s11  ;;  %556 = vmatpush.msrb.mxu3 %v2911_v26  ;;  %v2682_v36 = vld [vmem:[%s4055_s3 + $0x70] sm:$0xff]  ;;  %v792_v26 = vld [vmem:[%s4057_s5 + $0x18] sm:$0xff] }
 0x443   :  { %586 = vmatpush.msrb.mxu0 %v2682_v36  ;;  %v841_v36 = vld [vmem:[%s4059_s7 + $0x68] sm:$0xff] }
 0x444   :  { %557 = vmatpush.msrb.mxu3 %v2912_v27  ;;  %v791_v27 = vld [vmem:[%s4057_s5 + $0x10] sm:$0xff] }
 0x445   :  { %2695 = vmatmul.msk.f32.gmra.mxu3 %vm253_vm5, %v369_v28  ;;  %v790_v28 = vld [vmem:[%s4057_s5 + $0x8] sm:$0xff] }
 0x446   :  { %717 = vmatpush.msra.mxu3 %v2683_v52 }
 0x44d   :  { %2704 = vmatmul.msk.f32.vlgmr.msrb.gmra.mxu3 %vm253_vm5, %v528_v30 }
 0x49c   :  { %v653_v33 = vpop.xlane.xlu1 %652 }
 0x4a4   :  { %v656_v32 = vpop.xlane.xlu2 %655 }
 0x4ac   :  { %v525_v34 = vpop.xlane.xlu2 %524 }
 0x4ad   :  { %3002 = vrcp.f32 %v525_v34  ;;  %v842_v34 = vld [vmem:[%s4059_s7 + $0x70] sm:$0xff] }
 0x4ae   :  { %3004 = vrcp.f32 %v653_v33  ;;  %v843_v33 = vld [vmem:[%s4059_s7 + $0x78] sm:$0xff] }
 0x4af   :  { %3006 = vrcp.f32 %v656_v32  ;;  %845 = vmatpush.msrb.mxu1 %v843_v33 }
 0x4b0   :  { %3008 = vrcp.f32 %v3132_v10  ;;  %v830_v10 = vld [vmem:[%s4059_s7 + $0x10] sm:$0xff] }
 0x4b1   :  { %846 = vmatpush.msrb.mxu1 %v842_v34 }
 0x4b3   :  { %v3003_v35 = vpop.eup %3002  ;;  %847 = vmatpush.msrb.mxu1 %v841_v36 }
 0x4b4   :  { %v2905_v39 = vpop.permute.xlu1 %2904  ;;  %v3005_v40 = vpop.eup %3004  ;;  %v529_v42 = vmul.f32 %v3003_v35, %v2995_v14 }
 0x4b5   :  { %v2906_v41 = vunpack.i.l.bf16 %v2905_v39  ;;  %v2907_v43 = vunpack.i.h.bf16 %v2905_v39  ;;  %v659_v44 = vmul.f32 %v3005_v40, %v2991_v5  ;;  %v3007_v45 = vpop.eup %3006  ;;  %v840_v40 = vld [vmem:[%s4059_s7 + $0x60] sm:$0xff] }
 0x4b6   :  { %2705 = vmatmul.msk.f32.gmra.mxu3 %vm253_vm5, %v529_v42  ;;  %v660_v48 = vmul.f32 %v3007_v45, %v2993_v11  ;;  %v3009_v11 = vpop.eup %3008  ;;  %848 = vmatpush.msrb.mxu1 %v840_v40  ;;  %v838_v45 = vld [vmem:[%s4059_s7 + $0x50] sm:$0xff] }
 0x4b7   :  { %687 = vmatpush.msrb.mxu2 %v2906_v41  ;;  %v739_v12 = vmul.f32 32.0, %v3009_v11  ;;  %vm743_vm9 = vweird.f32 %v3009_v11 }
 0x4b9   :  { %688 = vmatpush.msrb.mxu2 %v2907_v43  ;;  %v740_v13 = vsub.f32 1.0, %v739_v12  ;;  %v839_v43 = vld [vmem:[%s4059_s7 + $0x58] sm:$0xff]  ;;  %v828_v12 = vld [vmem:[%s4059_s7] sm:$0xff] }
 0x4ba   :  { %2712 = vmatmul.msk.f32.vlgmr.msrb.gmra.mxu2 %vm253_vm5, %v659_v44  ;;  %849 = vmatpush.msrb.mxu1 %v839_v43  ;;  %v2742_v43 = vld [vmem:[%s4055_s3 + $0xd8] sm:$0xff] }
 0x4bc   :  { %850 = vmatpush.msrb.mxu1 %v838_v45  ;;  %v2735_v45 = vld [vmem:[%s4055_s3 + $0xb0] sm:$0xff] }
 0x4c0   :  { %v401_v47 = vpop.f32.mrf.mxu3 }
 0x4c1   :  { %2696 = vmatmul.msk.f32.vlgmr.msra.gmra.mxu0 %vm213_vm3, %v401_v47 }
 0x4c2   :  { %2713 = vmatmul.msk.f32.gmra.mxu2 %vm253_vm5, %v660_v48  ;;  %815 = vmatpush.msra.mxu0 %v792_v26  ;;  %v837_v48 = vld [vmem:[%s4059_s7 + $0x48] sm:$0xff] }
 0x4c3   :  { %851 = vmatpush.msrb.mxu1 %v837_v48  ;;  %v2728_v48 = vld [vmem:[%s4055_s3 + $0x88] sm:$0xff] }
 0x4c4   :  { %816 = vmatpush.msra.mxu0 %v791_v27 }
 0x4c6   :  { %817 = vmatpush.msra.mxu0 %v790_v28 }
 0x4c8   :  { %v404_v49 = vpop.f32.mrf.mxu3  ;;  %818 = vmatpush.msra.mxu0 %v789_v29 }
 0x4c9   :  { %2697 = vmatmul.msk.f32.gmra.mxu0 %vm213_vm3, %v404_v49 }
 0x4d0   :  { %v559_v50 = vpop.f32.mrf.mxu3 }
 0x4d1   :  { %2706 = vmatmul.msk.f32.vlgmr.msrb.gmra.mxu0 %vm213_vm3, %v559_v50  ;;  %v836_v50 = vld [vmem:[%s4059_s7 + $0x40] sm:$0xff] }
 0x4d2   :  { %852 = vmatpush.msrb.mxu1 %v836_v50  ;;  %1012 = vmatpush.msrb.mxu0 %v2742_v43  ;;  %v2740_v50 = vld [vmem:[%s4055_s3 + $0xc8] sm:$0xff] }
 0x539   :  { %v562_v53 = vpop.f32.mrf.mxu3 }
 0x53a   :  { %2707 = vmatmul.msk.f32.gmra.mxu0 %vm213_vm3, %v562_v53 }
 0x53d   :  { %v690_v54 = vpop.f32.mrf.mxu2 }
 0x53e   :  { %2714 = vmatmul.msk.f32.vlgmr.msra.gmra.mxu3 %vm213_vm3, %v690_v54  ;;  %v430_v56 = vpop.f32.mrf.mxu0  ;;  %v835_v54 = vld [vmem:[%s4059_s7 + $0x38] sm:$0xff] }
 0x53f   :  { %v460_v59 = vadd.f32 %v3335_v37, %v430_v56  ;;  %853 = vmatpush.msrb.mxu1 %v835_v54  ;;  %v2739_v54 = vld [vmem:[%s4055_s3 + $0xc0] sm:$0xff] }
 0x545   :  { %v693_v55 = vpop.f32.mrf.mxu2 }
 0x546   :  { %2715 = vmatmul.msk.f32.gmra.mxu3 %vm213_vm3, %v693_v55  ;;  %v433_v57 = vpop.f32.mrf.mxu0 }
 0x547   :  { %v463_v2 = vadd.f32 %v3337_v38, %v433_v57  ;;  %v741_v38 = vmul.f32 %v3009_v11, %v740_v13  ;;  %v2947_v57 = vld [vmem:[%s4056_s4 + $0x4] ss:$0 sm:$0xff]  ;;  %v2949_v13 = vld [vmem:[%s4058_s6] ss:$0 sm:$0xff] }
 0x549   :  { %v742_v14 = vadd.f32 %v3009_v11, %v741_v38 }
 0x54e   :  { %v588_v58 = vpop.f32.mrf.mxu0 }
 0x54f   :  { %v594_v60 = vadd.f32 %v588_v58, %v460_v59  ;;  %v834_v58 = vld [vmem:[%s4059_s7 + $0x30] sm:$0xff] }
 0x550   :  { %854 = vmatpush.msrb.mxu1 %v834_v58 }
 0x5b7   :  { %v591_v1 = vpop.f32.mrf.mxu0 }
 0x5b8   :  { %v595_v4 = vadd.f32 %v591_v1, %v463_v2  ;;  %v832_v2 = vld [vmem:[%s4059_s7 + $0x20] sm:$0xff] }
 0x5c1   :  { %v719_v62 = vpop.f32.mrf.mxu3 }
 0x5c2   :  { %v725_v63 = vadd.f32 %v719_v62, %v594_v60  ;;  %v2948_v62 = vld [vmem:[%s4056_s4 + $0x5] ss:$0 sm:$0xff] }
 0x5c4   :  { %v728_v0 = vadd.f32 %v2946_v61, %v725_v63  ;;  %v833_v63 = vld [vmem:[%s4059_s7 + $0x28] sm:$0xff] }
 0x5c5   :  { %855 = vmatpush.msrb.mxu1 %v833_v63 }
 0x5c6   :  { %v730_v3 = vadd.f32 %v728_v0, %v3238_v17  ;;  %v3387_v17 = vsel %vm743_vm9, %v3009_v11, %v742_v14  ;;  %v829_v11 = vld [vmem:[%s4059_s7 + $0x8] sm:$0xff] }
 0x5c7   :  { %856 = vmatpush.msrb.mxu1 %v832_v2 }
 0x5c8   :  { %v732_v5 = vsel %vm120_vm2, %v730_v3, 0.0 }
 0x5c9   :  { %v722_v6 = vpop.f32.mrf.mxu3  ;;  %733 = vadd.xlane.f32.xlu0 %v732_v5  ;;  %v831_v5 = vld [vmem:[%s4059_s7 + $0x18] sm:$0xff] }
 0x5ca   :  { %v726_v7 = vadd.f32 %v722_v6, %v595_v4  ;;  %857 = vmatpush.msrb.mxu1 %v831_v5  ;;  %v2951_v5 = vld [vmem:[%s4056_s4 + $0x7] ss:$0 sm:$0xff] }
 0x5cc   :  { %v729_v37 = vadd.f32 %v2946_v61, %v726_v7  ;;  %858 = vmatpush.msrb.mxu1 %v830_v10 }
 0x5ce   :  { %v731_v8 = vadd.f32 %v729_v37, %v3247_v20  ;;  %859 = vmatpush.msrb.mxu1 %v829_v11 }
 0x5d0   :  { %v735_v9 = vsel %vm120_vm2, %v731_v8, 0.0  ;;  %860 = vmatpush.msrb.mxu1 %v828_v12 }
 0x5d1   :  { %736 = vadd.xlane.f32.xlu2 %v735_v9 }
 0x63c   :  { %v734_v15 = vpop.xlane.xlu0 %733 }
 0x63d   :  { %v745_v16 = vmul.f32 %v3387_v17, %v734_v15 }
 0x63f   :  { %v747_v18 = vsub.f32 %v730_v3, %v745_v16 }
 0x641   :  { %v749_v19 = vmul.f32 %v747_v18, %v747_v18 }
 0x643   :  { %v751_v20 = vsel %vm120_vm2, %v749_v19, 0.0 }
 0x644   :  { %752 = vadd.xlane.f32.xlu1 %v751_v20  ;;  %v737_v21 = vpop.xlane.xlu2 %736  ;;  %v2950_v20 = vld [vmem:[%s4056_s4 + $0x6] ss:$0 sm:$0xff] }
 0x645   :  { %v746_v22 = vmul.f32 %v3387_v17, %v737_v21 }
 0x647   :  { %v3392_v23 = vsub.f32 %v731_v8, %v746_v22 }
 0x649   :  { %v750_v24 = vmul.f32 %v3392_v23, %v3392_v23 }
 0x64b   :  { %v754_v25 = vsel %vm120_vm2, %v750_v24, 0.0 }
 0x64c   :  { %755 = vadd.xlane.f32.xlu2 %v754_v25 }
 0x6b7   :  { %v753_v30 = vpop.xlane.xlu1 %752 }
 0x6b8   :  { %v757_v31 = vmul.f32 %v753_v30, %v3387_v17 }
 0x6ba   :  { %v759_v32 = vadd.f32 1e-05, %v757_v31 }
 0x6bc   :  { %3010 = vrsqrt.f32 %v759_v32  ;;  %vm767_vm11 = vweird.f32 %v759_v32 }
 0x6bf   :  { %v756_v35 = vpop.xlane.xlu2 %755 }
 0x6c0   :  { %v758_v39 = vmul.f32 %v756_v35, %v3387_v17 }
 0x6c2   :  { %v3011_v41 = vpop.eup %3010  ;;  %v760_v42 = vadd.f32 1e-05, %v758_v39 }
 0x6c3   :  { %v762_v44 = vmul.f32 %v3011_v41, %v759_v32  ;;  %vm768_vm10 = vweird.f32 %v3011_v41 }
 0x6c4   :  { %3012 = vrsqrt.f32 %v760_v42  ;;  %vm769_vm12 = vmor %vm767_vm11, %vm768_vm10  ;;  %vm777_vm14 = vweird.f32 %v760_v42 }
 0x6c5   :  { %v763_v47 = vmul.f32 %v3011_v41, %v762_v44  ;;  %v2729_v44 = vld [vmem:[%s4055_s3 + $0x90] sm:$0xff] }
 0x6c7   :  { %v764_v49 = vmul.f32 0.5, %v763_v47  ;;  %v2741_v47 = vld [vmem:[%s4055_s3 + $0xd0] sm:$0xff] }
 0x6c8   :  { %1013 = vmatpush.msrb.mxu0 %v2741_v47 }
 0x6c9   :  { %v765_v52 = vsub.f32 1.5, %v764_v49  ;;  %v2734_v49 = vld [vmem:[%s4055_s3 + $0xa8] sm:$0xff] }
 0x6ca   :  { %v3013_v53 = vpop.eup %3012  ;;  %1014 = vmatpush.msrb.mxu0 %v2740_v50 }
 0x6cb   :  { %v766_v55 = vmul.f32 %v3011_v41, %v765_v52  ;;  %v772_v56 = vmul.f32 %v3013_v53, %v760_v42  ;;  %vm778_vm13 = vweird.f32 %v3013_v53  ;;  %v2736_v42 = vld [vmem:[%s4055_s3 + $0xb8] sm:$0xff]  ;;  %v2727_v52 = vld [vmem:[%s4055_s3 + $0x80] sm:$0xff] }
 0x6cc   :  { %vm779_vm15 = vmor %vm777_vm14, %vm778_vm13  ;;  %983 = vmatpush.msrb.mxu3 %v2736_v42  ;;  %1015 = vmatpush.msrb.mxu0 %v2739_v54 }
 0x6cd   :  { %v770_v59 = vsel %vm769_vm12, %v3011_v41, %v766_v55  ;;  %v773_v60 = vmul.f32 %v3013_v53, %v772_v56  ;;  %v2730_v41 = vld [vmem:[%s4055_s3 + $0x98] sm:$0xff] }
 0x6ce   :  { %v781_v61 = vmul.f32 %v770_v59, %v747_v18  ;;  %954 = vmatpush.msra.mxu2 %v2730_v41  ;;  %984 = vmatpush.msrb.mxu3 %v2735_v45 }
 0x6cf   :  { %v774_v0 = vmul.f32 0.5, %v773_v60 }
 0x6d0   :  { %v784_v1 = vmul.f32 %v2947_v57, %v781_v61  ;;  %955 = vmatpush.msra.mxu2 %v2729_v44  ;;  %985 = vmatpush.msrb.mxu3 %v2734_v49 }
 0x6d1   :  { %v775_v3 = vsub.f32 1.5, %v774_v0 }
 0x6d2   :  { %v787_v4 = vadd.f32 %v2948_v62, %v784_v1  ;;  %956 = vmatpush.msra.mxu2 %v2728_v48 }
 0x6d3   :  { %v776_v6 = vmul.f32 %v3013_v53, %v775_v3 }
 0x6d4   :  { %2716 = vmatmul.msk.f32.vlgmr.msra.gmra.mxu0 %vm120_vm2, %v787_v4  ;;  %957 = vmatpush.msra.mxu2 %v2727_v52 }
 0x6d5   :  { %v780_v7 = vsel %vm779_vm15, %v3013_v53, %v776_v6  ;;  %v2733_v53 = vld [vmem:[%s4055_s3 + $0xa0] sm:$0xff] }
 0x6d6   :  { %v782_v37 = vmul.f32 %v780_v7, %v3392_v23  ;;  %986 = vmatpush.msrb.mxu3 %v2733_v53 }
 0x6d8   :  { %v785_v8 = vmul.f32 %v2947_v57, %v782_v37 }
 0x6da   :  { %v788_v9 = vadd.f32 %v2948_v62, %v785_v8  ;;  %v2952_v8 = vld [vmem:[%s4056_s4 + $0x8] ss:$0 sm:$0xff] }
 0x6dc   :  { %2717 = vmatmul.msk.f32.gmra.mxu0 %vm120_vm2, %v788_v9 }
 0x751   :  { %v820_v38 = vpop.f32.mrf.mxu0 }
 0x752   :  { %v821_v14 = vadd.f32 %v2949_v13, %v820_v38 }
 0x754   :  { %v826_v15 = vmax.f32 %v821_v14, 0.0 }
 0x756   :  { %861 = vmatmul.f32.vlgmr.msrb.gmra.mxu1 %v826_v15 }
 0x759   :  { %v823_v16 = vpop.f32.mrf.mxu0 }
 0x75a   :  { %v824_v18 = vadd.f32 %v2949_v13, %v823_v16 }
 0x75c   :  { %v827_v19 = vmax.f32 %v824_v18, 0.0 }
 0x75e   :  { %864 = vmatmul.f32.gmra.mxu1 %v827_v19  ;;  %v2953_v19 = vld [vmem:[%s4056_s4 + $0x12] ss:$0 sm:$0xff] }
 0x7d3   :  { %v862_v21 = vpop.f32.mrf.mxu1 }
 0x7d4   :  { %v863_v22 = vadd.f32 %v2950_v20, %v862_v21 }
 0x7d6   :  { %v868_v23 = vadd.f32 %v863_v22, %v787_v4 }
 0x7d8   :  { %v870_v24 = vsel %vm120_vm2, %v868_v23, 0.0 }
 0x7d9   :  { %871 = vadd.xlane.f32.xlu2 %v870_v24 }
 0x7db   :  { %v865_v25 = vpop.f32.mrf.mxu1 }
 0x7dc   :  { %v866_v26 = vadd.f32 %v2950_v20, %v865_v25  ;;  %v2955_v25 = vld [vmem:[%s4056_s4 + $0x11] ss:$0 sm:$0xff] }
 0x7de   :  { %v869_v27 = vadd.f32 %v866_v26, %v788_v9 }
 0x7e0   :  { %v873_v28 = vsel %vm120_vm2, %v869_v27, 0.0 }
 0x7e1   :  { %874 = vadd.xlane.f32.xlu2 %v873_v28 }
 0x84c   :  { %v872_v29 = vpop.xlane.xlu2 %871 }
 0x84d   :  { %v876_v30 = vmul.f32 %v872_v29, %v3387_v17  ;;  %v2954_v29 = vld [vmem:[%s4056_s4 + $0x10] ss:$0 sm:$0xff] }
 0x84f   :  { %v878_v31 = vsub.f32 %v868_v23, %v876_v30 }
 0x851   :  { %v880_v32 = vmul.f32 %v878_v31, %v878_v31 }
 0x853   :  { %v882_v33 = vsel %vm120_vm2, %v880_v32, 0.0 }
 0x854   :  { %883 = vadd.xlane.f32.xlu2 %v882_v33  ;;  %v875_v34 = vpop.xlane.xlu2 %874 }
 0x855   :  { %v877_v36 = vmul.f32 %v875_v34, %v3387_v17 }
 0x857   :  { %v3479_v35 = vsub.f32 %v869_v27, %v877_v36 }
 0x859   :  { %v881_v39 = vmul.f32 %v3479_v35, %v3479_v35 }
 0x85b   :  { %v885_v40 = vsel %vm120_vm2, %v881_v39, 0.0 }
 0x85c   :  { %886 = vadd.xlane.f32.xlu0 %v885_v40 }
 0x8c7   :  { %v884_v55 = vpop.xlane.xlu2 %883 }
 0x8c8   :  { %v888_v56 = vmul.f32 %v884_v55, %v3387_v17 }
 0x8ca   :  { %v890_v57 = vadd.f32 1e-05, %v888_v56 }
 0x8cc   :  { %3014 = vrsqrt.f32 %v890_v57  ;;  %vm898_vm1 = vweird.f32 %v890_v57 }
 0x8cf   :  { %v887_v58 = vpop.xlane.xlu0 %886 }
 0x8d0   :  { %v889_v59 = vmul.f32 %v887_v58, %v3387_v17 }
 0x8d2   :  { %v3015_v60 = vpop.eup %3014  ;;  %v891_v61 = vadd.f32 1e-05, %v889_v59 }
 0x8d3   :  { %v893_v62 = vmul.f32 %v3015_v60, %v890_v57  ;;  %vm899_vm0 = vweird.f32 %v3015_v60  ;;  %v2745_v57 = vld [vmem:[%s4055_s3 + $0xe0] sm:$0xff] }
 0x8d4   :  { %3016 = vrsqrt.f32 %v891_v61  ;;  %vm900_vm4 = vmor %vm898_vm1, %vm899_vm0  ;;  %vm908_vm7 = vweird.f32 %v891_v61 }
 0x8d5   :  { %v894_v63 = vmul.f32 %v3015_v60, %v893_v62 }
 0x8d7   :  { %v895_v0 = vmul.f32 0.5, %v894_v63 }
 0x8d9   :  { %v896_v1 = vsub.f32 1.5, %v895_v0 }
 0x8da   :  { %v3017_v2 = vpop.eup %3016 }
 0x8db   :  { %v897_v3 = vmul.f32 %v3015_v60, %v896_v1  ;;  %v903_v4 = vmul.f32 %v3017_v2, %v891_v61  ;;  %vm909_vm6 = vweird.f32 %v3017_v2 }
 0x8dc   :  { %vm910_vm8 = vmor %vm908_vm7, %vm909_vm6 }
 0x8dd   :  { %v901_v6 = vsel %vm900_vm4, %v3015_v60, %v897_v3  ;;  %v904_v7 = vmul.f32 %v3017_v2, %v903_v4 }
 0x8de   :  { %v912_v37 = vmul.f32 %v901_v6, %v878_v31 }
 0x8df   :  { %v905_v9 = vmul.f32 0.5, %v904_v7 }
 0x8e0   :  { %v915_v10 = vmul.f32 %v2951_v5, %v912_v37 }
 0x8e1   :  { %v906_v11 = vsub.f32 1.5, %v905_v9 }
 0x8e2   :  { %v3528_v12 = vadd.f32 %v2952_v8, %v915_v10 }
 0x8e3   :  { %v907_v13 = vmul.f32 %v3017_v2, %v906_v11 }
 0x8e4   :  { %2731 = vmatmul.msk.f32.vlgmr.msra.gmra.mxu2 %vm120_vm2, %v3528_v12  ;;  %2737 = vmatmul.msk.f32.vlgmr.msrb.gmra.mxu3 %vm120_vm2, %v3528_v12 }
 0x8e5   :  { %v911_v38 = vsel %vm910_vm8, %v3017_v2, %v907_v13  ;;  %2743 = vmatmul.msk.f32.vlgmr.msrb.gmra.mxu0 %vm120_vm2, %v3528_v12 }
 0x8e6   :  { %v913_v14 = vmul.f32 %v911_v38, %v3479_v35 }
 0x8e8   :  { %v916_v15 = vmul.f32 %v2951_v5, %v913_v14 }
 0x8ea   :  { %v3537_v16 = vadd.f32 %v2952_v8, %v916_v15 }
 0x8ec   :  { %2732 = vmatmul.msk.f32.gmra.mxu2 %vm120_vm2, %v3537_v16  ;;  %2738 = vmatmul.msk.f32.gmra.mxu3 %vm120_vm2, %v3537_v16 }
 0x8ed   :  { %2744 = vmatmul.msk.f32.gmra.mxu0 %vm120_vm2, %v3537_v16 }
 0x962   :  { %v1017_v18 = vpop.f32.mrf.mxu0 }
 0x963   :  { %v1018_v22 = vadd.f32 %v2953_v19, %v1017_v18 }
 0x967   :  { %v988_v20 = vpop.f32.mrf.mxu3  ;;  %v959_v28 = vpop.f32.mrf.mxu2 }
 0x968   :  { %v989_v30 = vadd.f32 %v2955_v25, %v988_v20  ;;  %v960_v31 = vadd.f32 %v2954_v29, %v959_v28 }
 0x96a   :  { %v1020_v21 = vpop.f32.mrf.mxu0 }
 0x96b   :  { %v1021_v23 = vadd.f32 %v2953_v19, %v1020_v21 }
 0x96d   :  { %1109 = vmatpush.msra.mxu3 %v1021_v23  ;;  %v3548_v24 = vpack.i.bf16 %v1018_v22, %v1021_v23 }
 0x96f   :  { %1110 = vmatpush.msra.mxu3 %v1018_v22  ;;  %v991_v26 = vpop.f32.mrf.mxu3  ;;  %v962_v32 = vpop.f32.mrf.mxu2 }
 0x970   :  { %v992_v27 = vadd.f32 %v2955_v25, %v991_v26  ;;  %v963_v33 = vadd.f32 %v2954_v29, %v962_v32 }
 0x971   :  { %1270 = vmatpush.msrb.mxu3 %v2745_v57 }
 0x972   :  { %2749 = vmatpush.xpose.msk.msrb.mxu2 %vm213_vm3, %v992_v27 }
 0x976   :  { %2750 = vmatpush.xpose.msk.msrb.mxu2 %vm213_vm3, %v989_v30 }
 0x979   :  { %2751 = vmatmul.msk.f32.vlgmr.msrb.gmra.mxu2 %vm213_vm3, %v960_v31 }
 0x981   :  { %2752 = vmatmul.msk.f32.gmra.mxu2 %vm213_vm3, %v963_v33 }
 0x9fc   :  { %v1057_v34 = vpop.f32.mrf.mxu2 }
 0x9fd   :  { %v1063_v36 = vmul.f32 0.35355338, %v1057_v34 }
 0x9ff   :  { %v1065_v35 = vadd.f32 %v1063_v36, %v3291_v46 }
 0xa01   :  { %v1067_v39 = vsel %vm253_vm5, %v1065_v35, -inf }
 0xa02   :  { %1068 = vmax.xlane.f32.xlu2 %v1067_v39 }
 0xa04   :  { %v1060_v40 = vpop.f32.mrf.mxu2 }
 0xa05   :  { %v1064_v41 = vmul.f32 0.35355338, %v1060_v40 }
 0xa07   :  { %v1066_v42 = vadd.f32 %v1064_v41, %v3295_v51 }
 0xa09   :  { %v1070_v43 = vsel %vm253_vm5, %v1066_v42, -inf }
 0xa0a   :  { %1071 = vmax.xlane.f32.xlu0 %v1070_v43 }
 0xa1e   :  { %1124 = vrot.lane.b32.xlu0 %v992_v27, %s3128_s2 }
 0xa26   :  { %1120 = vrot.lane.b32.xlu0 %v963_v33, %s3128_s2 }
 0xa2e   :  { %1415 = vrot.lane.b32.xlu0 %v992_v27, %s3130_s11 }
 0xa36   :  { %1278 = vrot.lane.b32.xlu0 %v960_v31, %s3129_s30 }
 0xa3e   :  { %1411 = vrot.lane.b32.xlu0 %v963_v33, %s3130_s11 }
 0xa75   :  { %v1069_v44 = vpop.xlane.xlu2 %1068 }
 0xa76   :  { %v1073_v45 = vsub.f32 %v1065_v35, %v1069_v44 }
 0xa78   :  { %v1075_v47 = vmul.f32 1.442695, %v1073_v45 }
 0xa7a   :  { %3018 = vpow2.f32 %v1075_v47 }
 0xa7d   :  { %v1072_v48 = vpop.xlane.xlu0 %1071 }
 0xa7e   :  { %v1074_v49 = vsub.f32 %v1066_v42, %v1072_v48 }
 0xa80   :  { %v3019_v50 = vpop.eup %3018  ;;  %v1077_v52 = vmul.f32 1.442695, %v1074_v49 }
 0xa81   :  { %v1079_v53 = vsel %vm253_vm5, %v3019_v50, 0.0 }
 0xa82   :  { %3020 = vpow2.f32 %v1077_v52  ;;  %1080 = vadd.xlane.f32.xlu1 %v1079_v53 }
 0xa88   :  { %v3021_v54 = vpop.eup %3020 }
 0xa89   :  { %v1082_v55 = vsel %vm253_vm5, %v3021_v54, 0.0 }
 0xa8a   :  { %1083 = vadd.xlane.f32.xlu2 %v1082_v55 }
 0xa90   :  { %v1125_v56 = vpop.permute.xlu0 %1124 }
 0xa91   :  { %2755 = vmatpush.xpose.msk.msra.mxu0 %vm213_vm3, %v1125_v56 }
 0xa98   :  { %v1121_v58 = vpop.permute.xlu0 %1120 }
 0xa9b   :  { %1122 = vrot.lane.b32.xlu1 %v989_v30, %s3128_s2 }
 0xaa0   :  { %v1416_v63 = vpop.permute.xlu0 %1415 }
 0xaa2   :  { %1118 = vrot.lane.b32.xlu2 %v960_v31, %s3128_s2 }
 0xaa3   :  { %1284 = vrot.lane.b32.xlu1 %v992_v27, %s3129_s30 }
 0xaa8   :  { %v1279_v7 = vpop.permute.xlu0 %1278 }
 0xaaa   :  { %1282 = vrot.lane.b32.xlu2 %v989_v30, %s3129_s30 }
 0xaab   :  { %1413 = vrot.lane.b32.xlu1 %v989_v30, %s3130_s11 }
 0xab0   :  { %v1412_v20 = vpop.permute.xlu0 %1411 }
 0xab2   :  { %1409 = vrot.lane.b32.xlu2 %v960_v31, %s3130_s11 }
 0xab3   :  { %1280 = vrot.lane.b32.xlu1 %v963_v33, %s3129_s30 }
 0xaf5   :  { %v1081_v59 = vpop.xlane.xlu1 %1080 }
 0xaf6   :  { %3022 = vrcp.f32 %v1081_v59 }
 0xafc   :  { %v3023_v60 = vpop.eup %3022 }
 0xafd   :  { %v1087_v61 = vmul.f32 %v3023_v60, %v3019_v50  ;;  %v1084_v62 = vpop.xlane.xlu2 %1083 }
 0xafe   :  { %3024 = vrcp.f32 %v1084_v62 }
 0xaff   :  { %2753 = vmatmul.msk.f32.vlgmr.msra.gmra.mxu3 %vm253_vm5, %v1087_v61 }
 0xb00   :  { %2773 = vmatpush.xpose.msk.msra.mxu3 %vm213_vm3, %v1416_v63 }
 0xb04   :  { %v3025_v0 = vpop.eup %3024 }
 0xb05   :  { %v1088_v1 = vmul.f32 %v3025_v0, %v3021_v54  ;;  %v1119_v3 = vpop.permute.xlu2 %1118 }
 0xb07   :  { %2754 = vmatmul.msk.f32.gmra.mxu3 %vm253_vm5, %v1088_v1 }
 0xb0d   :  { %v1123_v2 = vpop.permute.xlu1 %1122  ;;  %v1283_v5 = vpop.permute.xlu2 %1282 }
 0xb0e   :  { %2756 = vmatpush.xpose.msk.msra.mxu0 %vm213_vm3, %v1123_v2 }
 0xb11   :  { %2757 = vmatmul.msk.f32.vlgmr.msra.gmra.mxu0 %vm213_vm3, %v1119_v3 }
 0xb15   :  { %v1285_v4 = vpop.permute.xlu1 %1284  ;;  %v1410_v38 = vpop.permute.xlu2 %1409 }
 0xb16   :  { %2765 = vmatpush.xpose.msk.msrb.mxu0 %vm213_vm3, %v1285_v4 }
 0xb19   :  { %2758 = vmatmul.msk.f32.gmra.mxu0 %vm213_vm3, %v1121_v58 }
 0xb1a   :  { %2766 = vmatpush.xpose.msk.msrb.mxu0 %vm213_vm3, %v1283_v5 }
 0xb1d   :  { %v1414_v6 = vpop.permute.xlu1 %1413 }
 0xb1e   :  { %2774 = vmatpush.xpose.msk.msra.mxu3 %vm213_vm3, %v1414_v6 }
 0xb21   :  { %2767 = vmatmul.msk.f32.vlgmr.msrb.gmra.mxu0 %vm213_vm3, %v1279_v7 }
 0xb25   :  { %v1281_v37 = vpop.permute.xlu1 %1280 }
 0xb29   :  { %2768 = vmatmul.msk.f32.gmra.mxu0 %vm213_vm3, %v1281_v37 }
 0xb82   :  { %v1112_v8 = vpop.f32.mrf.mxu3 }
 0xb83   :  { %2763 = vmatmul.msk.f32.vlgmr.msrb.gmra.mxu3 %vm213_vm3, %v1112_v8 }
 0xb8a   :  { %v1115_v9 = vpop.f32.mrf.mxu3 }
 0xb8b   :  { %2764 = vmatmul.msk.f32.gmra.mxu3 %vm213_vm3, %v1115_v9 }
 0xb8e   :  { %v1151_v10 = vpop.f32.mrf.mxu0 }
 0xb8f   :  { %v1157_v11 = vmul.f32 0.35355338, %v1151_v10 }
 0xb91   :  { %v1159_v13 = vadd.f32 %v1157_v11, %v3291_v46 }
 0xb93   :  { %2775 = vmatmul.msk.f32.vlgmr.msra.gmra.mxu3 %vm213_vm3, %v1410_v38  ;;  %v1161_v14 = vsel %vm253_vm5, %v1159_v13, -inf }
 0xb94   :  { %1162 = vmax.xlane.f32.xlu2 %v1161_v14 }
 0xb96   :  { %v1154_v15 = vpop.f32.mrf.mxu0 }
 0xb97   :  { %v1158_v18 = vmul.f32 0.35355338, %v1154_v15 }
 0xb99   :  { %v1160_v19 = vadd.f32 %v1158_v18, %v3295_v51 }
 0xb9b   :  { %2776 = vmatmul.msk.f32.gmra.mxu3 %vm213_vm3, %v1412_v20  ;;  %v1164_v21 = vsel %vm253_vm5, %v1160_v19, -inf }
 0xb9c   :  { %1165 = vmax.xlane.f32.xlu1 %v1164_v21 }
 0xb9e   :  { %v1311_v22 = vpop.f32.mrf.mxu0 }
 0xb9f   :  { %v1317_v23 = vmul.f32 0.35355338, %v1311_v22 }
 0xba1   :  { %v1319_v25 = vadd.f32 %v1317_v23, %v3291_v46 }
 0xba3   :  { %v1321_v26 = vsel %vm253_vm5, %v1319_v25, -inf }
 0xba4   :  { %1322 = vmax.xlane.f32.xlu0 %v1321_v26 }
 0xba6   :  { %v1314_v27 = vpop.f32.mrf.mxu0 }
 0xba7   :  { %v1318_v28 = vmul.f32 0.35355338, %v1314_v27 }
 0xba9   :  { %v1320_v29 = vadd.f32 %v1318_v28, %v3295_v51 }
 0xbab   :  { %v1324_v30 = vsel %vm253_vm5, %v1320_v29, -inf }
 0xbac   :  { %1325 = vmax.xlane.f32.xlu2 %v1324_v30 }
 0xc06   :  { %v3605_v31 = vpop.f32.mrf.mxu3 }
 0xc07   :  { %v1163_v32 = vpop.xlane.xlu2 %1162 }
 0xc08   :  { %v1167_v33 = vsub.f32 %v1159_v13, %v1163_v32 }
 0xc0a   :  { %v1169_v34 = vmul.f32 1.442695, %v1167_v33 }
 0xc0c   :  { %3026 = vpow2.f32 %v1169_v34  ;;  %v2746_v34 = vld [vmem:[%s4055_s3 + $0xe8] sm:$0xff] }
 0xc0d   :  { %1241 = vmatpush.msra.mxu2 %v2746_v34  ;;  %v2798_v34 = vld [vmem:[%s4059_s7 + $0xd0] sm:$0xff] }
 0xc0e   :  { %v3607_v36 = vpop.f32.mrf.mxu3 }
 0xc0f   :  { %v1166_v41 = vpop.xlane.xlu1 %1165 }
 0xc10   :  { %v1168_v47 = vsub.f32 %v1160_v19, %v1166_v41 }
 0xc12   :  { %v3027_v35 = vpop.eup %3026  ;;  %v1171_v50 = vmul.f32 1.442695, %v1168_v47 }
 0xc13   :  { %v1173_v39 = vsel %vm253_vm5, %v3027_v35, 0.0 }
 0xc14   :  { %1174 = vadd.xlane.f32.xlu2 %v1173_v39 }
 0xc16   :  { %v1442_v40 = vpop.f32.mrf.mxu3 }
 0xc17   :  { %v1448_v42 = vmul.f32 0.35355338, %v1442_v40  ;;  %v1323_v43 = vpop.xlane.xlu0 %1322 }
 0xc18   :  { %v1327_v44 = vsub.f32 %v1319_v25, %v1323_v43 }
 0xc19   :  { %v1450_v45 = vadd.f32 %v1448_v42, %v3291_v46  ;;  %v2747_v42 = vld [vmem:[%s4055_s3 + $0xf0] sm:$0xff] }
 0xc1a   :  { %v1329_v48 = vmul.f32 1.442695, %v1327_v44  ;;  %1399 = vmatpush.msrb.mxu2 %v2747_v42 }
 0xc1b   :  { %v1452_v49 = vsel %vm253_vm5, %v1450_v45, -inf }
 0xc1c   :  { %3028 = vpow2.f32 %v1329_v48  ;;  %1453 = vmax.xlane.f32.xlu1 %v1452_v49 }
 0xc1d   :  { %3030 = vpow2.f32 %v1171_v50 }
 0xc1e   :  { %v1445_v52 = vpop.f32.mrf.mxu3 }
 0xc1f   :  { %v1449_v53 = vmul.f32 0.35355338, %v1445_v52  ;;  %v1326_v54 = vpop.xlane.xlu2 %1325 }
 0xc20   :  { %v1328_v55 = vsub.f32 %v1320_v29, %v1326_v54 }
 0xc21   :  { %v1451_v56 = vadd.f32 %v1449_v53, %v3295_v51 }
 0xc22   :  { %v3029_v57 = vpop.eup %3028  ;;  %v1331_v58 = vmul.f32 1.442695, %v1328_v55 }
 0xc23   :  { %v1455_v59 = vsel %vm253_vm5, %v1451_v56, -inf  ;;  %v1333_v60 = vsel %vm253_vm5, %v3029_v57, 0.0  ;;  %v3031_v61 = vpop.eup %3030 }
 0xc24   :  { %3032 = vpow2.f32 %v1331_v58  ;;  %1456 = vmax.xlane.f32.xlu0 %v1455_v59  ;;  %1334 = vadd.xlane.f32.xlu2 %v1333_v60  ;;  %v1176_v63 = vsel %vm253_vm5, %v3031_v61, 0.0  ;;  %v2956_v59 = vld [vmem:[%s4056_s4 + $0x13] ss:$0 sm:$0xff] }
 0xc2a   :  { %v3033_v62 = vpop.eup %3032 }
 0xc2b   :  { %v1336_v0 = vsel %vm253_vm5, %v3033_v62, 0.0 }
 0xc2c   :  { %1177 = vadd.xlane.f32.xlu0 %v1176_v63  ;;  %1337 = vadd.xlane.f32.xlu2 %v1336_v0 }
 0xc35   :  { %2914 = vrot.lane.b32.xlu1 %v3548_v24, %s3128_s2 }
 0xc3d   :  { %2924 = vrot.lane.b32.xlu1 %v3548_v24, %s3130_s11 }
 0xc40   :  { %2919 = vrot.lane.b32.xlu0 %v3548_v24, %s3129_s30 }
 0xc87   :  { %v1175_v8 = vpop.xlane.xlu2 %1174 }
 0xc8f   :  { %v1454_v1 = vpop.xlane.xlu1 %1453 }
 0xc90   :  { %v1458_v2 = vsub.f32 %v1450_v45, %v1454_v1  ;;  %v2748_v45 = vld [vmem:[%s4055_s3 + $0xf8] sm:$0xff] }
 0xc92   :  { %v1460_v3 = vmul.f32 1.442695, %v1458_v2 }
 0xc94   :  { %3034 = vpow2.f32 %v1460_v3 }
 0xc97   :  { %v1457_v4 = vpop.xlane.xlu0 %1456  ;;  %v1335_v18 = vpop.xlane.xlu2 %1334 }
 0xc98   :  { %v1459_v5 = vsub.f32 %v1451_v56, %v1457_v4 }
 0xc9a   :  { %v3035_v6 = vpop.eup %3034  ;;  %v1462_v7 = vmul.f32 1.442695, %v1459_v5 }
 0xc9b   :  { %v1464_v37 = vsel %vm253_vm5, %v3035_v6, 0.0 }
 0xc9c   :  { %3036 = vpow2.f32 %v1462_v7  ;;  %1465 = vadd.xlane.f32.xlu2 %v1464_v37 }
 0xc9d   :  { %3038 = vrcp.f32 %v1175_v8 }
 0xc9f   :  { %v1178_v11 = vpop.xlane.xlu0 %1177  ;;  %v1338_v28 = vpop.xlane.xlu2 %1337 }
 0xca0   :  { %3040 = vrcp.f32 %v1178_v11 }
 0xca1   :  { %3042 = vrcp.f32 %v1335_v18  ;;  %v2781_v18 = vld [vmem:[%s4057_s5 + $0x20] sm:$0xff] }
 0xca2   :  { %v3037_v9 = vpop.eup %3036  ;;  %3044 = vrcp.f32 %v1338_v28  ;;  %v2800_v28 = vld [vmem:[%s4059_s7 + $0xe0] sm:$0xff] }
 0xca3   :  { %v1467_v10 = vsel %vm253_vm5, %v3037_v9, 0.0  ;;  %v3039_v13 = vpop.eup %3038 }
 0xca4   :  { %1468 = vadd.xlane.f32.xlu2 %v1467_v10  ;;  %v1181_v15 = vmul.f32 %v3039_v13, %v3027_v35 }
 0xca6   :  { %v3041_v20 = vpop.eup %3040 }
 0xca7   :  { %v2915_v24 = vpop.permute.xlu1 %2914  ;;  %v1182_v26 = vmul.f32 %v3041_v20, %v3031_v61  ;;  %v3043_v29 = vpop.eup %3042 }
 0xca8   :  { %v2916_v38 = vunpack.i.l.bf16 %v2915_v24  ;;  %v2917_v14 = vunpack.i.h.bf16 %v2915_v24  ;;  %v1341_v30 = vmul.f32 %v3043_v29, %v3029_v57  ;;  %v3045_v32 = vpop.eup %3044 }
 0xca9   :  { %v1342_v33 = vmul.f32 %v3045_v32, %v3033_v62  ;;  %v2799_v32 = vld [vmem:[%s4059_s7 + $0xd8] sm:$0xff] }
 0xcaa   :  { %1211 = vmatpush.msra.mxu1 %v2916_v38  ;;  %v2784_v38 = vld [vmem:[%s4057_s5 + $0x38] sm:$0xff] }
 0xcac   :  { %1212 = vmatpush.msra.mxu1 %v2917_v14  ;;  %v2783_v14 = vld [vmem:[%s4057_s5 + $0x30] sm:$0xff] }
 0xcad   :  { %2759 = vmatmul.msk.f32.vlgmr.msra.gmra.mxu1 %vm253_vm5, %v1181_v15  ;;  %v2782_v15 = vld [vmem:[%s4057_s5 + $0x28] sm:$0xff] }
 0xcaf   :  { %v2925_v19 = vpop.permute.xlu1 %2924 }
 0xcb0   :  { %v2926_v21 = vunpack.i.l.bf16 %v2925_v19  ;;  %v2927_v22 = vunpack.i.h.bf16 %v2925_v19 }
 0xcb2   :  { %1500 = vmatpush.msra.mxu0 %v2926_v21  ;;  %v2920_v23 = vpop.permute.xlu0 %2919 }
 0xcb3   :  { %v2921_v25 = vunpack.i.l.bf16 %v2920_v23  ;;  %v2922_v27 = vunpack.i.h.bf16 %v2920_v23  ;;  %v2802_v23 = vld [vmem:[%s4059_s7 + $0xf0] sm:$0xff] }
 0xcb4   :  { %1501 = vmatpush.msra.mxu0 %v2927_v22  ;;  %v2803_v22 = vld [vmem:[%s4059_s7 + $0xf8] sm:$0xff] }
 0xcb5   :  { %2760 = vmatmul.msk.f32.gmra.mxu1 %vm253_vm5, %v1182_v26  ;;  %1654 = vmatpush.msrb.mxu3 %v2803_v22 }
 0xcb6   :  { %1369 = vmatpush.msrb.mxu1 %v2921_v25  ;;  %v2801_v25 = vld [vmem:[%s4059_s7 + $0xe8] sm:$0xff] }
 0xcb7   :  { %1655 = vmatpush.msrb.mxu3 %v2802_v23 }
 0xcb8   :  { %1370 = vmatpush.msrb.mxu1 %v2922_v27 }
 0xcb9   :  { %1656 = vmatpush.msrb.mxu3 %v2801_v25 }
 0xcba   :  { %1530 = vmatpush.msra.mxu1 %v2748_v45 }
 0xcbb   :  { %1657 = vmatpush.msrb.mxu3 %v2800_v28 }
 0xcbd   :  { %2769 = vmatmul.msk.f32.vlgmr.msrb.gmra.mxu1 %vm253_vm5, %v1341_v30  ;;  %1658 = vmatpush.msrb.mxu3 %v2799_v32  ;;  %v2828_v32 = vld [vmem:[%s4055_s3 + $0x158] sm:$0xff] }
 0xcbf   :  { %1659 = vmatpush.msrb.mxu3 %v2798_v34  ;;  %v2821_v34 = vld [vmem:[%s4055_s3 + $0x130] sm:$0xff] }
 0xcc5   :  { %2770 = vmatmul.msk.f32.gmra.mxu1 %vm253_vm5, %v1342_v33 }
 0xd0f   :  { %v1466_v35 = vpop.xlane.xlu2 %1465 }
 0xd10   :  { %3046 = vrcp.f32 %v1466_v35 }
 0xd16   :  { %v3047_v39 = vpop.eup %3046 }
 0xd17   :  { %v1472_v40 = vmul.f32 %v3047_v39, %v3035_v6  ;;  %v1469_v41 = vpop.xlane.xlu2 %1468  ;;  %v2797_v39 = vld [vmem:[%s4059_s7 + $0xc8] sm:$0xff] }
 0xd18   :  { %3048 = vrcp.f32 %v1469_v41  ;;  %v2796_v41 = vld [vmem:[%s4059_s7 + $0xc0] sm:$0xff]  ;;  %1660 = vmatpush.msrb.mxu3 %v2797_v39  ;;  %v2814_v39 = vld [vmem:[%s4055_s3 + $0x108] sm:$0xff] }
 0xd19   :  { %2777 = vmatmul.msk.f32.vlgmr.msra.gmra.mxu0 %vm253_vm5, %v1472_v40 }
 0xd1a   :  { %1661 = vmatpush.msrb.mxu3 %v2796_v41  ;;  %v2826_v41 = vld [vmem:[%s4055_s3 + $0x148] sm:$0xff] }
 0xd1e   :  { %v3049_v43 = vpop.eup %3048 }
 0xd1f   :  { %v1473_v44 = vmul.f32 %v3049_v43, %v3037_v9 }
 0xd21   :  { %2778 = vmatmul.msk.f32.gmra.mxu0 %vm253_vm5, %v1473_v44  ;;  %v2795_v44 = vld [vmem:[%s4059_s7 + $0xb8] sm:$0xff] }
 0xd22   :  { %1662 = vmatpush.msrb.mxu3 %v2795_v44  ;;  %v2825_v44 = vld [vmem:[%s4055_s3 + $0x140] sm:$0xff] }
 0xd2a   :  { %v1214_v47 = vpop.f32.mrf.mxu1 }
 0xd2b   :  { %2761 = vmatmul.msk.f32.vlgmr.msra.gmra.mxu2 %vm213_vm3, %v1214_v47 }
 0xd2c   :  { %1623 = vmatpush.msra.mxu2 %v2784_v38 }
 0xd2e   :  { %1624 = vmatpush.msra.mxu2 %v2783_v14 }
 0xd30   :  { %1625 = vmatpush.msra.mxu2 %v2782_v15 }
 0xd32   :  { %v1217_v48 = vpop.f32.mrf.mxu1  ;;  %1626 = vmatpush.msra.mxu2 %v2781_v18 }
 0xd33   :  { %2762 = vmatmul.msk.f32.gmra.mxu2 %vm213_vm3, %v1217_v48  ;;  %v2957_v48 = vld [vmem:[%s4056_s4 + $0x14] ss:$0 sm:$0xff] }
 0xd3a   :  { %v1372_v49 = vpop.f32.mrf.mxu1 }
 0xd3b   :  { %2771 = vmatmul.msk.f32.vlgmr.msrb.gmra.mxu2 %vm213_vm3, %v1372_v49  ;;  %v2794_v49 = vld [vmem:[%s4059_s7 + $0xb0] sm:$0xff] }
 0xd3c   :  { %1663 = vmatpush.msrb.mxu3 %v2794_v49  ;;  %1821 = vmatpush.msrb.mxu2 %v2828_v32 }
 0xd42   :  { %v1375_v50 = vpop.f32.mrf.mxu1 }
 0xd43   :  { %2772 = vmatmul.msk.f32.gmra.mxu2 %vm213_vm3, %v1375_v50 }
 0xd96   :  { %v1503_v52 = vpop.f32.mrf.mxu0 }
 0xd97   :  { %2779 = vmatmul.msk.f32.vlgmr.msra.gmra.mxu1 %vm213_vm3, %v1503_v52 }
 0xd9e   :  { %v1506_v53 = vpop.f32.mrf.mxu0 }
 0xd9f   :  { %2780 = vmatmul.msk.f32.gmra.mxu1 %vm213_vm3, %v1506_v53 }
 0xdae   :  { %v1243_v54 = vpop.f32.mrf.mxu2 }
 0xdaf   :  { %v1273_v57 = vadd.f32 %v3605_v31, %v1243_v54  ;;  %v2958_v54 = vld [vmem:[%s4056_s4 + $0x15] ss:$0 sm:$0xff] }
 0xdb6   :  { %v1246_v55 = vpop.f32.mrf.mxu2 }
 0xdb7   :  { %v1276_v0 = vadd.f32 %v3607_v36, %v1246_v55  ;;  %v2793_v55 = vld [vmem:[%s4059_s7 + $0xa8] sm:$0xff] }
 0xdb8   :  { %1664 = vmatpush.msrb.mxu3 %v2793_v55 }
 0xdbe   :  { %v1401_v56 = vpop.f32.mrf.mxu2 }
 0xdbf   :  { %v1407_v58 = vadd.f32 %v1401_v56, %v1273_v57 }
 0xdc6   :  { %v1404_v63 = vpop.f32.mrf.mxu2 }
 0xdc7   :  { %v1408_v2 = vadd.f32 %v1404_v63, %v1276_v0 }
 0xe14   :  { %v1532_v60 = vpop.f32.mrf.mxu1 }
 0xe15   :  { %v1538_v61 = vadd.f32 %v1532_v60, %v1407_v58  ;;  %v2792_v58 = vld [vmem:[%s4059_s7 + $0xa0] sm:$0xff] }
 0xe16   :  { %1665 = vmatpush.msrb.mxu3 %v2792_v58 }
 0xe17   :  { %v1541_v62 = vadd.f32 %v2956_v59, %v1538_v61  ;;  %v2791_v61 = vld [vmem:[%s4059_s7 + $0x98] sm:$0xff] }
 0xe18   :  { %1666 = vmatpush.msrb.mxu3 %v2791_v61  ;;  %v2961_v61 = vld [vmem:[%s4056_s4 + $0x17] ss:$0 sm:$0xff] }
 0xe19   :  { %v1543_v1 = vadd.f32 %v1541_v62, %v3528_v12 }
 0xe1b   :  { %v1545_v3 = vsel %vm120_vm2, %v1543_v1, 0.0 }
 0xe1c   :  { %1546 = vadd.xlane.f32.xlu0 %v1545_v3  ;;  %v1535_v4 = vpop.f32.mrf.mxu1  ;;  %v2790_v3 = vld [vmem:[%s4059_s7 + $0x90] sm:$0xff] }
 0xe1d   :  { %v1539_v5 = vadd.f32 %v1535_v4, %v1408_v2  ;;  %1667 = vmatpush.msrb.mxu3 %v2790_v3  ;;  %v2789_v4 = vld [vmem:[%s4059_s7 + $0x88] sm:$0xff] }
 0xe1f   :  { %v1542_v31 = vadd.f32 %v2956_v59, %v1539_v5  ;;  %1668 = vmatpush.msrb.mxu3 %v2789_v4  ;;  %v2788_v5 = vld [vmem:[%s4059_s7 + $0x80] sm:$0xff] }
 0xe21   :  { %v1544_v6 = vadd.f32 %v1542_v31, %v3537_v16  ;;  %1669 = vmatpush.msrb.mxu3 %v2788_v5  ;;  %v2959_v31 = vld [vmem:[%s4058_s6 + $0x1] ss:$0 sm:$0xff] }
 0xe23   :  { %v1548_v7 = vsel %vm120_vm2, %v1544_v6, 0.0 }
 0xe24   :  { %1549 = vadd.xlane.f32.xlu1 %v1548_v7 }
 0xe8f   :  { %v1547_v37 = vpop.xlane.xlu0 %1546 }
 0xe90   :  { %v1551_v8 = vmul.f32 %v1547_v37, %v3387_v17 }
 0xe92   :  { %v1553_v9 = vsub.f32 %v1543_v1, %v1551_v8 }
 0xe94   :  { %v1555_v10 = vmul.f32 %v1553_v9, %v1553_v9 }
 0xe96   :  { %v1557_v36 = vsel %vm120_vm2, %v1555_v10, 0.0 }
 0xe97   :  { %1558 = vadd.xlane.f32.xlu2 %v1557_v36  ;;  %v1550_v12 = vpop.xlane.xlu1 %1549  ;;  %v2960_v36 = vld [vmem:[%s4056_s4 + $0x16] ss:$0 sm:$0xff] }
 0xe98   :  { %v1552_v11 = vmul.f32 %v1550_v12, %v3387_v17 }
 0xe9a   :  { %v3658_v24 = vsub.f32 %v1544_v6, %v1552_v11 }
 0xe9c   :  { %v1556_v13 = vmul.f32 %v3658_v24, %v3658_v24 }
 0xe9e   :  { %v1560_v16 = vsel %vm120_vm2, %v1556_v13, 0.0 }
 0xe9f   :  { %1561 = vadd.xlane.f32.xlu2 %v1560_v16 }
 0xf0a   :  { %v1559_v19 = vpop.xlane.xlu2 %1558 }
 0xf0b   :  { %v1563_v20 = vmul.f32 %v1559_v19, %v3387_v17 }
 0xf0d   :  { %v1565_v21 = vadd.f32 1e-05, %v1563_v20 }
 0xf0f   :  { %3050 = vrsqrt.f32 %v1565_v21  ;;  %vm1573_vm10 = vweird.f32 %v1565_v21 }
 0xf12   :  { %v1562_v26 = vpop.xlane.xlu2 %1561 }
 0xf13   :  { %v1564_v27 = vmul.f32 %v1562_v26, %v3387_v17 }
 0xf15   :  { %v3051_v29 = vpop.eup %3050  ;;  %v1566_v30 = vadd.f32 1e-05, %v1564_v27 }
 0xf16   :  { %v1568_v33 = vmul.f32 %v3051_v29, %v1565_v21  ;;  %vm1574_vm9 = vweird.f32 %v3051_v29 }
 0xf17   :  { %3052 = vrsqrt.f32 %v1566_v30  ;;  %vm1575_vm11 = vmor %vm1573_vm10, %vm1574_vm9  ;;  %vm1583_vm13 = vweird.f32 %v1566_v30 }
 0xf18   :  { %v1569_v35 = vmul.f32 %v3051_v29, %v1568_v33  ;;  %v2815_v33 = vld [vmem:[%s4055_s3 + $0x110] sm:$0xff] }
 0xf1a   :  { %v1570_v40 = vmul.f32 0.5, %v1569_v35  ;;  %v2827_v35 = vld [vmem:[%s4055_s3 + $0x150] sm:$0xff] }
 0xf1b   :  { %1822 = vmatpush.msrb.mxu2 %v2827_v35 }
 0xf1c   :  { %v1571_v42 = vsub.f32 1.5, %v1570_v40  ;;  %v2820_v40 = vld [vmem:[%s4055_s3 + $0x128] sm:$0xff] }
 0xf1d   :  { %v3053_v43 = vpop.eup %3052  ;;  %1823 = vmatpush.msrb.mxu2 %v2826_v41 }
 0xf1e   :  { %v1572_v45 = vmul.f32 %v3051_v29, %v1571_v42  ;;  %v1578_v47 = vmul.f32 %v3053_v43, %v1566_v30  ;;  %vm1584_vm12 = vweird.f32 %v3053_v43  ;;  %v2822_v30 = vld [vmem:[%s4055_s3 + $0x138] sm:$0xff]  ;;  %v2813_v42 = vld [vmem:[%s4055_s3 + $0x100] sm:$0xff] }
 0xf1f   :  { %vm1585_vm14 = vmor %vm1583_vm13, %vm1584_vm12  ;;  %1792 = vmatpush.msrb.mxu1 %v2822_v30  ;;  %1824 = vmatpush.msrb.mxu2 %v2825_v44 }
 0xf20   :  { %v1576_v50 = vsel %vm1575_vm11, %v3051_v29, %v1572_v45  ;;  %v1579_v52 = vmul.f32 %v3053_v43, %v1578_v47  ;;  %v2816_v29 = vld [vmem:[%s4055_s3 + $0x118] sm:$0xff] }
 0xf21   :  { %v1587_v53 = vmul.f32 %v1576_v50, %v1553_v9  ;;  %1763 = vmatpush.msrb.mxu0 %v2816_v29  ;;  %1793 = vmatpush.msrb.mxu1 %v2821_v34 }
 0xf22   :  { %v1580_v56 = vmul.f32 0.5, %v1579_v52 }
 0xf23   :  { %v1590_v57 = vmul.f32 %v2957_v48, %v1587_v53  ;;  %1764 = vmatpush.msrb.mxu0 %v2815_v33  ;;  %1794 = vmatpush.msrb.mxu1 %v2820_v40 }
 0xf24   :  { %v1581_v59 = vsub.f32 1.5, %v1580_v56 }
 0xf25   :  { %v1593_v60 = vadd.f32 %v2958_v54, %v1590_v57  ;;  %1765 = vmatpush.msrb.mxu0 %v2814_v39 }
 0xf26   :  { %v1582_v62 = vmul.f32 %v3053_v43, %v1581_v59 }
 0xf27   :  { %2786 = vmatmul.msk.f32.vlgmr.msra.gmra.mxu2 %vm120_vm2, %v1593_v60  ;;  %1766 = vmatpush.msrb.mxu0 %v2813_v42 }
 0xf28   :  { %v1586_v63 = vsel %vm1585_vm14, %v3053_v43, %v1582_v62  ;;  %v2819_v43 = vld [vmem:[%s4055_s3 + $0x120] sm:$0xff] }
 0xf29   :  { %v1588_v0 = vmul.f32 %v1586_v63, %v3658_v24  ;;  %1795 = vmatpush.msrb.mxu1 %v2819_v43 }
 0xf2b   :  { %v1591_v1 = vmul.f32 %v2957_v48, %v1588_v0 }
 0xf2d   :  { %v1594_v2 = vadd.f32 %v2958_v54, %v1591_v1  ;;  %v2962_v1 = vld [vmem:[%s4056_s4 + $0x18] ss:$0 sm:$0xff] }
 0xf2f   :  { %2787 = vmatmul.msk.f32.gmra.mxu2 %vm120_vm2, %v1594_v2 }
 0xfaa   :  { %v1628_v6 = vpop.f32.mrf.mxu2 }
 0xfab   :  { %v1629_v7 = vadd.f32 %v2959_v31, %v1628_v6 }
 0xfad   :  { %v1634_v37 = vmax.f32 %v1629_v7, 0.0 }
 0xfaf   :  { %1670 = vmatmul.f32.vlgmr.msrb.gmra.mxu3 %v1634_v37 }
 0xfb2   :  { %v1631_v8 = vpop.f32.mrf.mxu2 }
 0xfb3   :  { %v1632_v9 = vadd.f32 %v2959_v31, %v1631_v8 }
 0xfb5   :  { %v1635_v10 = vmax.f32 %v1632_v9, 0.0 }
 0xfb7   :  { %1673 = vmatmul.f32.gmra.mxu3 %v1635_v10  ;;  %v2964_v10 = vld [vmem:[%s4056_s4 + $0x21] ss:$0 sm:$0xff] }
0x1032   :  { %v1671_v12 = vpop.f32.mrf.mxu3 }
0x1033   :  { %v1672_v11 = vadd.f32 %v2960_v36, %v1671_v12 }
0x1035   :  { %v1677_v24 = vadd.f32 %v1672_v11, %v1593_v60 }
0x1037   :  { %v1679_v13 = vsel %vm120_vm2, %v1677_v24, 0.0 }
0x1038   :  { %1680 = vadd.xlane.f32.xlu2 %v1679_v13  ;;  %v2963_v13 = vld [vmem:[%s4056_s4 + $0x20] ss:$0 sm:$0xff] }
0x103a   :  { %v1674_v16 = vpop.f32.mrf.mxu3 }
0x103b   :  { %v1675_v38 = vadd.f32 %v2960_v36, %v1674_v16  ;;  %v2965_v16 = vld [vmem:[%s4056_s4 + $0x22] ss:$0 sm:$0xff] }
0x103d   :  { %v1678_v14 = vadd.f32 %v1675_v38, %v1594_v2 }
0x103f   :  { %v1682_v15 = vsel %vm120_vm2, %v1678_v14, 0.0 }
0x1040   :  { %1683 = vadd.xlane.f32.xlu2 %v1682_v15 }
0x10ab   :  { %v1681_v18 = vpop.xlane.xlu2 %1680 }
0x10ac   :  { %v1685_v19 = vmul.f32 %v1681_v18, %v3387_v17 }
0x10ae   :  { %v1687_v20 = vsub.f32 %v1677_v24, %v1685_v19 }
0x10b0   :  { %v1689_v21 = vmul.f32 %v1687_v20, %v1687_v20 }
0x10b2   :  { %v1691_v22 = vsel %vm120_vm2, %v1689_v21, 0.0 }
0x10b3   :  { %1692 = vadd.xlane.f32.xlu2 %v1691_v22  ;;  %v1684_v23 = vpop.xlane.xlu2 %1683 }
0x10b4   :  { %v1686_v25 = vmul.f32 %v1684_v23, %v3387_v17 }
0x10b6   :  { %v3745_v26 = vsub.f32 %v1678_v14, %v1686_v25 }
0x10b8   :  { %v1690_v27 = vmul.f32 %v3745_v26, %v3745_v26 }
0x10ba   :  { %v1694_v28 = vsel %vm120_vm2, %v1690_v27, 0.0 }
0x10bb   :  { %1695 = vadd.xlane.f32.xlu0 %v1694_v28 }
0x1126   :  { %v1693_v45 = vpop.xlane.xlu2 %1692 }
0x1127   :  { %v1697_v47 = vmul.f32 %v1693_v45, %v3387_v17 }
0x1129   :  { %v1699_v48 = vadd.f32 1e-05, %v1697_v47 }
0x112b   :  { %3054 = vrsqrt.f32 %v1699_v48  ;;  %vm1707_vm0 = vweird.f32 %v1699_v48 }
0x112e   :  { %v1696_v49 = vpop.xlane.xlu0 %1695 }
0x112f   :  { %v1698_v50 = vmul.f32 %v1696_v49, %v3387_v17 }
0x1131   :  { %v3055_v52 = vpop.eup %3054  ;;  %v1700_v53 = vadd.f32 1e-05, %v1698_v50 }
0x1132   :  { %v1702_v54 = vmul.f32 %v3055_v52, %v1699_v48  ;;  %vm1708_vm15 = vweird.f32 %v3055_v52  ;;  %v2831_v48 = vld [vmem:[%s4055_s3 + $0x160] sm:$0xff] }
0x1133   :  { %3056 = vrsqrt.f32 %v1700_v53  ;;  %vm1709_vm1 = vmor %vm1707_vm0, %vm1708_vm15  ;;  %vm1717_vm6 = vweird.f32 %v1700_v53 }
0x1134   :  { %v1703_v55 = vmul.f32 %v3055_v52, %v1702_v54 }
0x1136   :  { %v1704_v56 = vmul.f32 0.5, %v1703_v55 }
0x1138   :  { %v1705_v57 = vsub.f32 1.5, %v1704_v56 }
0x1139   :  { %v3057_v58 = vpop.eup %3056 }
0x113a   :  { %v1706_v59 = vmul.f32 %v3055_v52, %v1705_v57  ;;  %v1712_v60 = vmul.f32 %v3057_v58, %v1700_v53  ;;  %vm1718_vm4 = vweird.f32 %v3057_v58 }
0x113b   :  { %vm1719_vm7 = vmor %vm1717_vm6, %vm1718_vm4  ;;  %vm2565_vm6 = vcmask 1041409  }
0x113c   :  { %v1710_v62 = vsel %vm1709_vm1, %v3055_v52, %v1706_v59  ;;  %v1713_v63 = vmul.f32 %v3057_v58, %v1712_v60 }
0x113d   :  { %v1721_v0 = vmul.f32 %v1710_v62, %v1687_v20 }
0x113e   :  { %v1714_v2 = vmul.f32 0.5, %v1713_v63 }
0x113f   :  { %v1724_v3 = vmul.f32 %v2961_v61, %v1721_v0 }
0x1140   :  { %v1715_v4 = vsub.f32 1.5, %v1714_v2 }
0x1141   :  { %v3794_v5 = vadd.f32 %v2962_v1, %v1724_v3 }
0x1142   :  { %v1716_v31 = vmul.f32 %v3057_v58, %v1715_v4 }
0x1143   :  { %2817 = vmatmul.msk.f32.vlgmr.msrb.gmra.mxu0 %vm120_vm2, %v3794_v5  ;;  %2823 = vmatmul.msk.f32.vlgmr.msrb.gmra.mxu1 %vm120_vm2, %v3794_v5 }
0x1144   :  { %v1720_v6 = vsel %vm1719_vm7, %v3057_v58, %v1716_v31  ;;  %2829 = vmatmul.msk.f32.vlgmr.msrb.gmra.mxu2 %vm120_vm2, %v3794_v5  ;;  %vm2568_vm7 = vcmask 254976  }
0x1145   :  { %v1722_v7 = vmul.f32 %v1720_v6, %v3745_v26 }
0x1147   :  { %v1725_v37 = vmul.f32 %v2961_v61, %v1722_v7 }
0x1149   :  { %v3803_v8 = vadd.f32 %v2962_v1, %v1725_v37 }
0x114b   :  { %2818 = vmatmul.msk.f32.gmra.mxu0 %vm120_vm2, %v3803_v8  ;;  %2824 = vmatmul.msk.f32.gmra.mxu1 %vm120_vm2, %v3803_v8 }
0x114c   :  { %2830 = vmatmul.msk.f32.gmra.mxu2 %vm120_vm2, %v3803_v8 }
0x11c0   :  { %v1797_v9 = vpop.f32.mrf.mxu1  ;;  %v1768_v24 = vpop.f32.mrf.mxu0 }
0x11c1   :  { %v1798_v38 = vadd.f32 %v2964_v10, %v1797_v9  ;;  %v1769_v15 = vadd.f32 %v2963_v13, %v1768_v24 }
0x11c7   :  { %v1826_v36 = vpop.f32.mrf.mxu2 }
0x11c8   :  { %v1800_v12 = vpop.f32.mrf.mxu1  ;;  %v1827_v18 = vadd.f32 %v2965_v16, %v1826_v36  ;;  %v1771_v21 = vpop.f32.mrf.mxu0 }
0x11c9   :  { %v1801_v11 = vadd.f32 %v2964_v10, %v1800_v12  ;;  %v1772_v22 = vadd.f32 %v2963_v13, %v1771_v21 }
0x11cb   :  { %2835 = vmatpush.xpose.msk.msra.mxu0 %vm213_vm3, %v1801_v11 }
0x11cf   :  { %v1829_v14 = vpop.f32.mrf.mxu2  ;;  %2836 = vmatpush.xpose.msk.msra.mxu0 %vm213_vm3, %v1798_v38 }
0x11d0   :  { %v1830_v19 = vadd.f32 %v2965_v16, %v1829_v14 }
0x11d2   :  { %1918 = vmatpush.msra.mxu1 %v1830_v19  ;;  %2837 = vmatmul.msk.f32.vlgmr.msra.gmra.mxu0 %vm213_vm3, %v1769_v15  ;;  %v3823_v20 = vpack.i.bf16 %v1827_v18, %v1830_v19 }
0x11d4   :  { %1919 = vmatpush.msra.mxu1 %v1827_v18 }
0x11d6   :  { %2079 = vmatpush.msrb.mxu1 %v2831_v48 }
0x11da   :  { %2838 = vmatmul.msk.f32.gmra.mxu0 %vm213_vm3, %v1772_v22 }
0x124f   :  { %v1866_v23 = vpop.f32.mrf.mxu0 }
0x1250   :  { %v1872_v25 = vmul.f32 0.35355338, %v1866_v23 }
0x1252   :  { %v1874_v26 = vadd.f32 %v1872_v25, %v3291_v46 }
0x1254   :  { %v1876_v27 = vsel %vm253_vm5, %v1874_v26, -inf }
0x1255   :  { %1877 = vmax.xlane.f32.xlu2 %v1876_v27 }
0x1257   :  { %v1869_v28 = vpop.f32.mrf.mxu0 }
0x1258   :  { %v1873_v29 = vmul.f32 0.35355338, %v1869_v28 }
0x125a   :  { %v1875_v30 = vadd.f32 %v1873_v29, %v3295_v51 }
0x125c   :  { %v1879_v32 = vsel %vm253_vm5, %v1875_v30, -inf }
0x125d   :  { %1880 = vmax.xlane.f32.xlu1 %v1879_v32 }
0x1276   :  { %1933 = vrot.lane.b32.xlu1 %v1801_v11, %s3128_s2 }
0x127e   :  { %2093 = vrot.lane.b32.xlu1 %v1801_v11, %s3129_s30 }
0x1286   :  { %2222 = vrot.lane.b32.xlu1 %v1798_v38, %s3130_s11 }
0x128e   :  { %2089 = vrot.lane.b32.xlu1 %v1772_v22, %s3129_s30 }
0x12c8   :  { %v1878_v33 = vpop.xlane.xlu2 %1877 }
0x12c9   :  { %v1882_v34 = vsub.f32 %v1874_v26, %v1878_v33 }
0x12cb   :  { %v1884_v35 = vmul.f32 1.442695, %v1882_v34 }
0x12cd   :  { %3058 = vpow2.f32 %v1884_v35 }
0x12d0   :  { %v1881_v39 = vpop.xlane.xlu1 %1880 }
0x12d1   :  { %v1883_v40 = vsub.f32 %v1875_v30, %v1881_v39 }
0x12d3   :  { %v3059_v41 = vpop.eup %3058  ;;  %v1886_v42 = vmul.f32 1.442695, %v1883_v40 }
0x12d4   :  { %v1888_v43 = vsel %vm253_vm5, %v3059_v41, 0.0 }
0x12d5   :  { %3060 = vpow2.f32 %v1886_v42  ;;  %1889 = vadd.xlane.f32.xlu0 %v1888_v43 }
0x12db   :  { %v3061_v44 = vpop.eup %3060 }
0x12dc   :  { %v1891_v45 = vsel %vm253_vm5, %v3061_v44, 0.0 }
0x12dd   :  { %1892 = vadd.xlane.f32.xlu2 %v1891_v45 }
0x12e8   :  { %v1934_v47 = vpop.permute.xlu1 %1933 }
0x12e9   :  { %1931 = vrot.lane.b32.xlu0 %v1798_v38, %s3128_s2  ;;  %2841 = vmatpush.xpose.msk.msra.mxu2 %vm213_vm3, %v1934_v47 }
0x12f0   :  { %v2094_v57 = vpop.permute.xlu1 %2093 }
0x12f1   :  { %1929 = vrot.lane.b32.xlu0 %v1772_v22, %s3128_s2 }
0x12f5   :  { %1927 = vrot.lane.b32.xlu2 %v1769_v15, %s3128_s2 }
0x12f8   :  { %v2223_v61 = vpop.permute.xlu1 %2222 }
0x12f9   :  { %2091 = vrot.lane.b32.xlu0 %v1798_v38, %s3129_s30 }
0x12fd   :  { %2224 = vrot.lane.b32.xlu2 %v1801_v11, %s3130_s11 }
0x1300   :  { %v2090_v0 = vpop.permute.xlu1 %2089 }
0x1301   :  { %2218 = vrot.lane.b32.xlu0 %v1769_v15, %s3130_s11 }
0x1305   :  { %2087 = vrot.lane.b32.xlu2 %v1769_v15, %s3129_s30 }
0x130d   :  { %2220 = vrot.lane.b32.xlu2 %v1772_v22, %s3130_s11 }
0x1348   :  { %v1890_v49 = vpop.xlane.xlu0 %1889 }
0x1349   :  { %3062 = vrcp.f32 %v1890_v49 }
0x134f   :  { %v3063_v50 = vpop.eup %3062 }
0x1350   :  { %v1896_v52 = vmul.f32 %v3063_v50, %v3059_v41  ;;  %v1893_v53 = vpop.xlane.xlu2 %1892 }
0x1351   :  { %3064 = vrcp.f32 %v1893_v53 }
0x1352   :  { %2839 = vmatmul.msk.f32.vlgmr.msra.gmra.mxu1 %vm253_vm5, %v1896_v52 }
0x1357   :  { %v3065_v54 = vpop.eup %3064 }
0x1358   :  { %v1928_v55 = vpop.permute.xlu2 %1927  ;;  %v1897_v56 = vmul.f32 %v3065_v54, %v3061_v44 }
0x135a   :  { %2840 = vmatmul.msk.f32.gmra.mxu1 %vm253_vm5, %v1897_v56 }
0x135b   :  { %v1932_v58 = vpop.permute.xlu0 %1931 }
0x135c   :  { %2842 = vmatpush.xpose.msk.msra.mxu2 %vm213_vm3, %v1932_v58 }
0x135f   :  { %2843 = vmatmul.msk.f32.vlgmr.msra.gmra.mxu2 %vm213_vm3, %v1928_v55 }
0x1360   :  { %2851 = vmatpush.xpose.msk.msrb.mxu2 %vm213_vm3, %v2094_v57  ;;  %v2225_v59 = vpop.permute.xlu2 %2224 }
0x1361   :  { %2859 = vmatpush.xpose.msk.msra.mxu1 %vm213_vm3, %v2225_v59 }
0x1363   :  { %v1930_v60 = vpop.permute.xlu0 %1929 }
0x1365   :  { %2860 = vmatpush.xpose.msk.msra.mxu1 %vm213_vm3, %v2223_v61 }
0x1367   :  { %2844 = vmatmul.msk.f32.gmra.mxu2 %vm213_vm3, %v1930_v60 }
0x1368   :  { %v2088_v63 = vpop.permute.xlu2 %2087 }
0x136b   :  { %v2092_v62 = vpop.permute.xlu0 %2091 }
0x136c   :  { %2852 = vmatpush.xpose.msk.msrb.mxu2 %vm213_vm3, %v2092_v62 }
0x136f   :  { %2853 = vmatmul.msk.f32.vlgmr.msrb.gmra.mxu2 %vm213_vm3, %v2088_v63 }
0x1370   :  { %v2221_v7 = vpop.permute.xlu2 %2220 }
0x1373   :  { %v2219_v3 = vpop.permute.xlu0 %2218 }
0x1377   :  { %2854 = vmatmul.msk.f32.gmra.mxu2 %vm213_vm3, %v2090_v0 }
0x13cf   :  { %v1921_v1 = vpop.f32.mrf.mxu1 }
0x13d0   :  { %2849 = vmatmul.msk.f32.vlgmr.msrb.gmra.mxu1 %vm213_vm3, %v1921_v1 }
0x13d7   :  { %v1924_v2 = vpop.f32.mrf.mxu1 }
0x13d8   :  { %2850 = vmatmul.msk.f32.gmra.mxu1 %vm213_vm3, %v1924_v2 }
0x13e0   :  { %2861 = vmatmul.msk.f32.vlgmr.msra.gmra.mxu1 %vm213_vm3, %v2219_v3 }
0x13e2   :  { %v1960_v4 = vpop.f32.mrf.mxu2 }
0x13e3   :  { %v1966_v31 = vmul.f32 0.35355338, %v1960_v4 }
0x13e5   :  { %v1968_v6 = vadd.f32 %v1966_v31, %v3291_v46 }
0x13e7   :  { %v1970_v37 = vsel %vm253_vm5, %v1968_v6, -inf }
0x13e8   :  { %1971 = vmax.xlane.f32.xlu0 %v1970_v37  ;;  %2862 = vmatmul.msk.f32.gmra.mxu1 %vm213_vm3, %v2221_v7 }
0x13ea   :  { %v1963_v9 = vpop.f32.mrf.mxu2 }
0x13eb   :  { %v1967_v10 = vmul.f32 0.35355338, %v1963_v9 }
0x13ed   :  { %v1969_v36 = vadd.f32 %v1967_v10, %v3295_v51 }
0x13ef   :  { %v1973_v12 = vsel %vm253_vm5, %v1969_v36, -inf }
0x13f0   :  { %1974 = vmax.xlane.f32.xlu1 %v1973_v12 }
0x13f2   :  { %v2120_v11 = vpop.f32.mrf.mxu2 }
0x13f3   :  { %v2126_v24 = vmul.f32 0.35355338, %v2120_v11 }
0x13f5   :  { %v2128_v13 = vadd.f32 %v2126_v24, %v3291_v46 }
0x13f7   :  { %v2130_v16 = vsel %vm253_vm5, %v2128_v13, -inf }
0x13f8   :  { %2131 = vmax.xlane.f32.xlu0 %v2130_v16  ;;  %v2832_v16 = vld [vmem:[%s4055_s3 + $0x168] sm:$0xff] }
0x13f9   :  { %2050 = vmatpush.msrb.mxu0 %v2832_v16 }
0x13fa   :  { %v2123_v23 = vpop.f32.mrf.mxu2 }
0x13fb   :  { %v2127_v26 = vmul.f32 0.35355338, %v2123_v23 }
0x13fd   :  { %v2129_v35 = vadd.f32 %v2127_v26, %v3295_v51 }
0x13ff   :  { %v2133_v41 = vsel %vm253_vm5, %v2129_v35, -inf }
0x144d   :  { %v3869_v38 = vpop.f32.mrf.mxu1 }
0x1455   :  { %v3871_v14 = vpop.f32.mrf.mxu1 }
0x145b   :  { %v1972_v15 = vpop.xlane.xlu0 %1971 }
0x145c   :  { %v1976_v18 = vsub.f32 %v1968_v6, %v1972_v15 }
0x145d   :  { %v2251_v19 = vpop.f32.mrf.mxu1 }
0x145e   :  { %v1978_v21 = vmul.f32 1.442695, %v1976_v18  ;;  %v2257_v22 = vmul.f32 0.35355338, %v2251_v19 }
0x1460   :  { %3066 = vpow2.f32 %v1978_v21  ;;  %v2259_v25 = vadd.f32 %v2257_v22, %v3291_v46 }
0x1462   :  { %v2261_v27 = vsel %vm253_vm5, %v2259_v25, -inf }
0x1463   :  { %2262 = vmax.xlane.f32.xlu2 %v2261_v27  ;;  %v1975_v28 = vpop.xlane.xlu1 %1974 }
0x1464   :  { %v1977_v29 = vsub.f32 %v1969_v36, %v1975_v28  ;;  %v2833_v28 = vld [vmem:[%s4055_s3 + $0x170] sm:$0xff] }
0x1465   :  { %v2254_v30 = vpop.f32.mrf.mxu1  ;;  %2208 = vmatpush.msra.mxu0 %v2833_v28  ;;  %v2881_v28 = vld [vmem:[%s4059_s7 + $0x138] sm:$0xff] }
0x1466   :  { %v3067_v32 = vpop.eup %3066  ;;  %v1980_v33 = vmul.f32 1.442695, %v1977_v29  ;;  %v2258_v34 = vmul.f32 0.35355338, %v2254_v30  ;;  %v2834_v29 = vld [vmem:[%s4055_s3 + $0x178] sm:$0xff] }
0x1467   :  { %v1982_v39 = vsel %vm253_vm5, %v3067_v32, 0.0 }
0x1468   :  { %1983 = vadd.xlane.f32.xlu0 %v1982_v39  ;;  %v2260_v40 = vadd.f32 %v2258_v34, %v3295_v51  ;;  %3068 = vpow2.f32 %v1980_v33 }
0x146a   :  { %v2264_v46 = vsel %vm253_vm5, %v2260_v40, -inf }
0x146b   :  { %v2132_v42 = vpop.xlane.xlu0 %2131  ;;  %2265 = vmax.xlane.f32.xlu1 %v2264_v46  ;;  %2134 = vmax.xlane.f32.xlu2 %v2133_v41 }
0x146c   :  { %v2136_v43 = vsub.f32 %v2128_v13, %v2132_v42 }
0x146e   :  { %v2138_v44 = vmul.f32 1.442695, %v2136_v43  ;;  %v3069_v45 = vpop.eup %3068 }
0x146f   :  { %v1985_v47 = vsel %vm253_vm5, %v3069_v45, 0.0 }
0x1470   :  { %3070 = vpow2.f32 %v2138_v44 }
0x1473   :  { %1986 = vadd.xlane.f32.xlu2 %v1985_v47  ;;  %v2966_v47 = vld [vmem:[%s4056_s4 + $0x23] ss:$0 sm:$0xff] }
0x1476   :  { %v3071_v48 = vpop.eup %3070 }
0x1477   :  { %v2142_v49 = vsel %vm253_vm5, %v3071_v48, 0.0 }
0x147b   :  { %2143 = vadd.xlane.f32.xlu2 %v2142_v49 }
0x1484   :  { %2929 = vrot.lane.b32.xlu1 %v3823_v20, %s3128_s2  ;;  %s2654_s2 = sshll.u32 %s4062_s10, 4  ;;  %s2655_s2 = int_to_ptr.hbm [resolvable:$true] %s2654_s2 }
0x148c   :  { %2939 = vrot.lane.b32.xlu1 %v3823_v20, %s3129_s30 }
0x14d6   :  { %v2263_v51 = vpop.xlane.xlu2 %2262 }
0x14d7   :  { %v2267_v50 = vsub.f32 %v2259_v25, %v2263_v51 }
0x14d9   :  { %v2269_v52 = vmul.f32 1.442695, %v2267_v50 }
0x14db   :  { %3072 = vpow2.f32 %v2269_v52  ;;  %v1984_v63 = vpop.xlane.xlu0 %1983 }
0x14de   :  { %v2266_v53 = vpop.xlane.xlu1 %2265  ;;  %v2135_v54 = vpop.xlane.xlu2 %2134 }
0x14df   :  { %v2268_v55 = vsub.f32 %v2260_v40, %v2266_v53  ;;  %v2137_v58 = vsub.f32 %v2129_v35, %v2135_v54 }
0x14e1   :  { %v3073_v56 = vpop.eup %3072  ;;  %v2271_v57 = vmul.f32 1.442695, %v2268_v55  ;;  %v2140_v60 = vmul.f32 1.442695, %v2137_v58 }
0x14e2   :  { %v2273_v59 = vsel %vm253_vm5, %v3073_v56, 0.0 }
0x14e3   :  { %2274 = vadd.xlane.f32.xlu0 %v2273_v59  ;;  %3074 = vpow2.f32 %v2271_v57 }
0x14e4   :  { %3076 = vpow2.f32 %v2140_v60 }
0x14e5   :  { %3078 = vrcp.f32 %v1984_v63 }
0x14e6   :  { %v1987_v2 = vpop.xlane.xlu2 %1986 }
0x14e7   :  { %3080 = vrcp.f32 %v1987_v2 }
0x14e9   :  { %v3075_v61 = vpop.eup %3074 }
0x14ea   :  { %v2276_v62 = vsel %vm253_vm5, %v3075_v61, 0.0  ;;  %v3077_v0 = vpop.eup %3076 }
0x14eb   :  { %2277 = vadd.xlane.f32.xlu2 %v2276_v62  ;;  %v2145_v1 = vsel %vm253_vm5, %v3077_v0, 0.0  ;;  %v3079_v4 = vpop.eup %3078 }
0x14ec   :  { %v1990_v7 = vmul.f32 %v3079_v4, %v3067_v32  ;;  %v2869_v4 = vld [vmem:[%s4057_s5 + $0x50] sm:$0xff] }
0x14ed   :  { %v3081_v10 = vpop.eup %3080 }
0x14ee   :  { %v2144_v37 = vpop.xlane.xlu2 %2143  ;;  %v1991_v11 = vmul.f32 %v3081_v10, %v3069_v45  ;;  %v2889_v10 = vld [vmem:[%s4059_s7 + $0x178] sm:$0xff] }
0x14ef   :  { %3082 = vrcp.f32 %v2144_v37  ;;  %2463 = vmatpush.msrb.mxu1 %v2889_v10 }
0x14f3   :  { %2146 = vadd.xlane.f32.xlu2 %v2145_v1 }
0x14f5   :  { %v3083_v24 = vpop.eup %3082 }
0x14f6   :  { %v2930_v3 = vpop.permute.xlu1 %2929 }
0x14f7   :  { %v2931_v31 = vunpack.i.l.bf16 %v2930_v3  ;;  %2934 = vrot.lane.b32.xlu0 %v3823_v20, %s3130_s11  ;;  %v2932_v6 = vunpack.i.h.bf16 %v2930_v3  ;;  %v2150_v20 = vmul.f32 %v3083_v24, %v3071_v48  ;;  %v2870_v3 = vld [vmem:[%s4057_s5 + $0x58] sm:$0xff] }
0x14f9   :  { %2020 = vmatpush.msra.mxu3 %v2931_v31  ;;  %v2868_v31 = vld [vmem:[%s4057_s5 + $0x48] sm:$0xff] }
0x14fb   :  { %2021 = vmatpush.msra.mxu3 %v2932_v6  ;;  %v2867_v6 = vld [vmem:[%s4057_s5 + $0x40] sm:$0xff]  ;;  %s2652_s5 = sshll.u32 %s3134_s14, 4  ;;  %s2653_s5 = int_to_ptr.vmem [resolvable:$true] %s2652_s5 }
0x14fc   :  { %2845 = vmatmul.msk.f32.vlgmr.msra.gmra.mxu3 %vm253_vm5, %v1990_v7 }
0x14fe   :  { %v2940_v9 = vpop.permute.xlu1 %2939 }
0x14ff   :  { %v2941_v36 = vunpack.i.l.bf16 %v2940_v9  ;;  %v2942_v12 = vunpack.i.h.bf16 %v2940_v9 }
0x1501   :  { %2178 = vmatpush.msrb.mxu3 %v2941_v36  ;;  %v2888_v36 = vld [vmem:[%s4059_s7 + $0x170] sm:$0xff] }
0x1502   :  { %2464 = vmatpush.msrb.mxu1 %v2888_v36 }
0x1503   :  { %2179 = vmatpush.msrb.mxu3 %v2942_v12  ;;  %v2887_v12 = vld [vmem:[%s4059_s7 + $0x168] sm:$0xff] }
0x1504   :  { %2846 = vmatmul.msk.f32.gmra.mxu3 %vm253_vm5, %v1991_v11  ;;  %2465 = vmatpush.msrb.mxu1 %v2887_v12 }
0x1505   :  { %2339 = vmatpush.msra.mxu3 %v2834_v29 }
0x150c   :  { %2855 = vmatmul.msk.f32.vlgmr.msrb.gmra.mxu3 %vm253_vm5, %v2150_v20  ;;  %v2886_v20 = vld [vmem:[%s4059_s7 + $0x160] sm:$0xff] }
0x150d   :  { %2466 = vmatpush.msrb.mxu1 %v2886_v20 }
0x1556   :  { %v2275_v15 = vpop.xlane.xlu0 %2274 }
0x1557   :  { %3084 = vrcp.f32 %v2275_v15  ;;  %v2885_v15 = vld [vmem:[%s4059_s7 + $0x158] sm:$0xff] }
0x1558   :  { %2467 = vmatpush.msrb.mxu1 %v2885_v15 }
0x155d   :  { %v3085_v21 = vpop.eup %3084 }
0x155e   :  { %v2278_v13 = vpop.xlane.xlu2 %2277  ;;  %v2281_v25 = vmul.f32 %v3085_v21, %v3073_v56 }
0x1566   :  { %v2147_v18 = vpop.xlane.xlu2 %2146 }
0x1567   :  { %3086 = vrcp.f32 %v2147_v18 }
0x1568   :  { %3088 = vrcp.f32 %v2278_v13 }
0x1569   :  { %v2935_v19 = vpop.permute.xlu0 %2934 }
0x156a   :  { %v2936_v22 = vunpack.i.l.bf16 %v2935_v19  ;;  %v2937_v23 = vunpack.i.h.bf16 %v2935_v19  ;;  %v2884_v19 = vld [vmem:[%s4059_s7 + $0x150] sm:$0xff] }
0x156b   :  { %2468 = vmatpush.msrb.mxu1 %v2884_v19 }
0x156c   :  { %2309 = vmatpush.msra.mxu2 %v2936_v22  ;;  %v2883_v22 = vld [vmem:[%s4059_s7 + $0x148] sm:$0xff] }
0x156d   :  { %v3087_v26 = vpop.eup %3086  ;;  %2469 = vmatpush.msrb.mxu1 %v2883_v22 }
0x156e   :  { %2310 = vmatpush.msra.mxu2 %v2937_v23  ;;  %v2151_v27 = vmul.f32 %v3087_v26, %v3077_v0  ;;  %v3089_v30 = vpop.eup %3088 }
0x156f   :  { %2863 = vmatmul.msk.f32.vlgmr.msra.gmra.mxu2 %vm253_vm5, %v2281_v25  ;;  %v2282_v32 = vmul.f32 %v3089_v30, %v3075_v61  ;;  %v2882_v25 = vld [vmem:[%s4059_s7 + $0x140] sm:$0xff] }
0x1570   :  { %2856 = vmatmul.msk.f32.gmra.mxu3 %vm253_vm5, %v2151_v27  ;;  %2470 = vmatpush.msrb.mxu1 %v2882_v25 }
0x1572   :  { %2471 = vmatpush.msrb.mxu1 %v2881_v28 }
0x1577   :  { %2864 = vmatmul.msk.f32.gmra.mxu2 %vm253_vm5, %v2282_v32  ;;  %v2967_v32 = vld [vmem:[%s4056_s4 + $0x24] ss:$0 sm:$0xff] }
0x157f   :  { %v2023_v33 = vpop.f32.mrf.mxu3 }
0x1580   :  { %2847 = vmatmul.msk.f32.vlgmr.msrb.gmra.mxu0 %vm213_vm3, %v2023_v33  ;;  %v2880_v33 = vld [vmem:[%s4059_s7 + $0x130] sm:$0xff] }
0x1581   :  { %2432 = vmatpush.msrb.mxu0 %v2870_v3  ;;  %2472 = vmatpush.msrb.mxu1 %v2880_v33  ;;  %v3133_v33 = vmov 8.0  }
0x1583   :  { %2433 = vmatpush.msrb.mxu0 %v2869_v4 }
0x1585   :  { %2434 = vmatpush.msrb.mxu0 %v2868_v31 }
0x1587   :  { %v2026_v34 = vpop.f32.mrf.mxu3  ;;  %2435 = vmatpush.msrb.mxu0 %v2867_v6 }
0x1588   :  { %2848 = vmatmul.msk.f32.gmra.mxu0 %vm213_vm3, %v2026_v34 }
0x158f   :  { %v2181_v35 = vpop.f32.mrf.mxu3 }
0x1590   :  { %2857 = vmatmul.msk.f32.vlgmr.msra.gmra.mxu0 %vm213_vm3, %v2181_v35 }
0x15f2   :  { %v2312_v39 = vpop.f32.mrf.mxu2 }
0x15f3   :  { %2865 = vmatmul.msk.f32.vlgmr.msra.gmra.mxu3 %vm213_vm3, %v2312_v39  ;;  %v2184_v40 = vpop.f32.mrf.mxu3  ;;  %v2968_v39 = vld [vmem:[%s4056_s4 + $0x25] ss:$0 sm:$0xff] }
0x15f4   :  { %2858 = vmatmul.msk.f32.gmra.mxu0 %vm213_vm3, %v2184_v40 }
0x15fa   :  { %v2315_v46 = vpop.f32.mrf.mxu2 }
0x15fb   :  { %2866 = vmatmul.msk.f32.gmra.mxu3 %vm213_vm3, %v2315_v46  ;;  %v2879_v46 = vld [vmem:[%s4059_s7 + $0x128] sm:$0xff] }
0x15fc   :  { %2473 = vmatpush.msrb.mxu1 %v2879_v46 }
0x15fd   :  { %v2052_v41 = vpop.f32.mrf.mxu0 }
0x15fe   :  { %v2082_v44 = vadd.f32 %v3869_v38, %v2052_v41 }
0x1605   :  { %v2055_v42 = vpop.f32.mrf.mxu0 }
0x1606   :  { %v2085_v52 = vadd.f32 %v3871_v14, %v2055_v42 }
0x160d   :  { %v2210_v43 = vpop.f32.mrf.mxu0 }
0x160e   :  { %v2216_v45 = vadd.f32 %v2210_v43, %v2082_v44  ;;  %v2878_v43 = vld [vmem:[%s4059_s7 + $0x120] sm:$0xff] }
0x160f   :  { %2474 = vmatpush.msrb.mxu1 %v2878_v43 }
0x1671   :  { %v2213_v50 = vpop.f32.mrf.mxu0 }
0x1672   :  { %v2217_v54 = vadd.f32 %v2213_v50, %v2085_v52 }
0x1676   :  { %v2341_v48 = vpop.f32.mrf.mxu3 }
0x1677   :  { %v2347_v49 = vadd.f32 %v2341_v48, %v2216_v45 }
0x1679   :  { %v2350_v51 = vadd.f32 %v2966_v47, %v2347_v49 }
0x167b   :  { %v2352_v53 = vadd.f32 %v2350_v51, %v3794_v5 }
0x167d   :  { %v2354_v55 = vsel %vm120_vm2, %v2352_v53, 0.0 }
0x167e   :  { %v2344_v56 = vpop.f32.mrf.mxu3  ;;  %2355 = vadd.xlane.f32.xlu1 %v2354_v55  ;;  %v2874_v55 = vld [vmem:[%s4059_s7 + $0x100] sm:$0xff] }
0x167f   :  { %v2348_v57 = vadd.f32 %v2344_v56, %v2217_v54  ;;  %v2875_v54 = vld [vmem:[%s4059_s7 + $0x108] sm:$0xff]  ;;  %v2969_v56 = vld [vmem:[%s4058_s6 + $0x2] ss:$0 sm:$0xff] }
0x1681   :  { %v2351_v38 = vadd.f32 %v2966_v47, %v2348_v57  ;;  %v2877_v47 = vld [vmem:[%s4059_s7 + $0x118] sm:$0xff] }
0x1682   :  { %2475 = vmatpush.msrb.mxu1 %v2877_v47 }
0x1683   :  { %v2353_v58 = vadd.f32 %v2351_v38, %v3803_v8 }
0x1685   :  { %v2357_v59 = vsel %vm120_vm2, %v2353_v58, 0.0 }
0x1686   :  { %2358 = vadd.xlane.f32.xlu0 %v2357_v59 }
0x16f1   :  { %v2356_v60 = vpop.xlane.xlu1 %2355 }
0x16f2   :  { %v2360_v61 = vmul.f32 %v2356_v60, %v3387_v17 }
0x16f4   :  { %v2362_v62 = vsub.f32 %v2352_v53, %v2360_v61  ;;  %v2876_v53 = vld [vmem:[%s4059_s7 + $0x110] sm:$0xff] }
0x16f5   :  { %2476 = vmatpush.msrb.mxu1 %v2876_v53 }
0x16f6   :  { %v2364_v63 = vmul.f32 %v2362_v62, %v2362_v62 }
0x16f7   :  { %2477 = vmatpush.msrb.mxu1 %v2875_v54 }
0x16f8   :  { %v2366_v14 = vsel %vm120_vm2, %v2364_v63, 0.0 }
0x16f9   :  { %2367 = vadd.xlane.f32.xlu2 %v2366_v14  ;;  %v2359_v5 = vpop.xlane.xlu0 %2358  ;;  %2478 = vmatpush.msrb.mxu1 %v2874_v55 }
0x16fa   :  { %v2361_v0 = vmul.f32 %v2359_v5, %v3387_v17 }
0x16fc   :  { %v3924_v1 = vsub.f32 %v2353_v58, %v2361_v0 }
0x16fe   :  { %v2365_v2 = vmul.f32 %v3924_v1, %v3924_v1 }
0x1700   :  { %v2369_v8 = vsel %vm120_vm2, %v2365_v2, 0.0 }
0x1701   :  { %2370 = vadd.xlane.f32.xlu2 %v2369_v8 }
0x176c   :  { %v2368_v7 = vpop.xlane.xlu2 %2367 }
0x176d   :  { %v2372_v37 = vmul.f32 %v2368_v7, %v3387_v17 }
0x176f   :  { %v2374_v9 = vadd.f32 1e-05, %v2372_v37 }
0x1771   :  { %3090 = vrsqrt.f32 %v2374_v9  ;;  %vm2382_vm5 = vweird.f32 %v2374_v9 }
0x1774   :  { %v2371_v11 = vpop.xlane.xlu2 %2370 }
0x1775   :  { %v2373_v24 = vmul.f32 %v2371_v11, %v3387_v17 }
0x1777   :  { %v3091_v13 = vpop.eup %3090  ;;  %v2375_v16 = vadd.f32 1e-05, %v2373_v24 }
0x1778   :  { %v2377_v18 = vmul.f32 %v3091_v13, %v2374_v9  ;;  %vm2383_vm3 = vweird.f32 %v3091_v13 }
0x1779   :  { %3092 = vrsqrt.f32 %v2375_v16  ;;  %vm2384_vm8 = vmor %vm2382_vm5, %vm2383_vm3  ;;  %vm2392_vm10 = vweird.f32 %v2375_v16 }
0x177a   :  { %v2378_v21 = vmul.f32 %v3091_v13, %v2377_v18 }
0x177c   :  { %v2379_v23 = vmul.f32 0.5, %v2378_v21 }
0x177e   :  { %v2380_v26 = vsub.f32 1.5, %v2379_v23 }
0x177f   :  { %v3093_v27 = vpop.eup %3092 }
0x1780   :  { %v2381_v29 = vmul.f32 %v3091_v13, %v2380_v26  ;;  %v2387_v30 = vmul.f32 %v3093_v27, %v2375_v16  ;;  %vm2393_vm9 = vweird.f32 %v3093_v27 }
0x1781   :  { %vm2394_vm11 = vmor %vm2392_vm10, %vm2393_vm9  ;;  %vm2645_vm9 = vcmask 33792  }
0x1782   :  { %v2385_v34 = vsel %vm2384_vm8, %v3091_v13, %v2381_v29  ;;  %v2388_v35 = vmul.f32 %v3093_v27, %v2387_v30  ;;  %v2971_v29 = vld [vmem:[%s4056_s4 + $0x27] ss:$0 sm:$0xff] }
0x1783   :  { %v2396_v40 = vmul.f32 %v2385_v34, %v2362_v62  ;;  %v2970_v62 = vld [vmem:[%s4056_s4 + $0x26] ss:$0 sm:$0xff]  ;;  %v2972_v34 = vld [vmem:[%s4056_s4 + $0x28] ss:$0 sm:$0xff] }
0x1784   :  { %v2389_v41 = vmul.f32 0.5, %v2388_v35 }
0x1785   :  { %v2399_v42 = vmul.f32 %v2967_v32, %v2396_v40 }
0x1786   :  { %v2390_v44 = vsub.f32 1.5, %v2389_v41 }
0x1787   :  { %v2402_v45 = vadd.f32 %v2968_v39, %v2399_v42 }
0x1788   :  { %v2391_v48 = vmul.f32 %v3093_v27, %v2390_v44 }
0x1789   :  { %2872 = vmatmul.msk.f32.vlgmr.msrb.gmra.mxu0 %vm120_vm2, %v2402_v45 }
0x178a   :  { %v2395_v49 = vsel %vm2394_vm11, %v3093_v27, %v2391_v48 }
0x178b   :  { %v2397_v51 = vmul.f32 %v2395_v49, %v3924_v1 }
0x178d   :  { %v2400_v50 = vmul.f32 %v2967_v32, %v2397_v51 }
0x178f   :  { %v2403_v52 = vadd.f32 %v2968_v39, %v2400_v50 }
0x1791   :  { %2873 = vmatmul.msk.f32.gmra.mxu0 %vm120_vm2, %v2403_v52 }
0x1806   :  { %v2437_v57 = vpop.f32.mrf.mxu0 }
0x1807   :  { %v2438_v38 = vadd.f32 %v2969_v56, %v2437_v57 }
0x1809   :  { %v2443_v58 = vmax.f32 %v2438_v38, 0.0 }
0x180b   :  { %2479 = vmatmul.f32.vlgmr.msrb.gmra.mxu1 %v2443_v58 }
0x180e   :  { %v2440_v59 = vpop.f32.mrf.mxu0 }
0x180f   :  { %v2441_v60 = vadd.f32 %v2969_v56, %v2440_v59 }
0x1811   :  { %v2444_v61 = vmax.f32 %v2441_v60, 0.0 }
0x1813   :  { %2482 = vmatmul.f32.gmra.mxu1 %v2444_v61 }
0x1888   :  { %v2480_v63 = vpop.f32.mrf.mxu1 }
0x1889   :  { %v2481_v14 = vadd.f32 %v2970_v62, %v2480_v63 }
0x188b   :  { %v2486_v5 = vadd.f32 %v2481_v14, %v2402_v45 }
0x188d   :  { %v2488_v0 = vsel %vm120_vm2, %v2486_v5, 0.0 }
0x188e   :  { %2489 = vadd.xlane.f32.xlu2 %v2488_v0 }
0x1890   :  { %v2483_v1 = vpop.f32.mrf.mxu1 }
0x1891   :  { %v2484_v2 = vadd.f32 %v2970_v62, %v2483_v1 }
0x1893   :  { %v2487_v8 = vadd.f32 %v2484_v2, %v2403_v52 }
0x1895   :  { %v2491_v3 = vsel %vm120_vm2, %v2487_v8, 0.0 }
0x1896   :  { %2492 = vadd.xlane.f32.xlu2 %v2491_v3 }
0x1901   :  { %v2490_v4 = vpop.xlane.xlu2 %2489 }
0x1902   :  { %v2494_v31 = vmul.f32 %v2490_v4, %v3387_v17 }
0x1904   :  { %v2496_v6 = vsub.f32 %v2486_v5, %v2494_v31 }
0x1906   :  { %v2498_v7 = vmul.f32 %v2496_v6, %v2496_v6 }
0x1908   :  { %v2500_v37 = vsel %vm120_vm2, %v2498_v7, 0.0 }
0x1909   :  { %2501 = vadd.xlane.f32.xlu2 %v2500_v37  ;;  %v2493_v9 = vpop.xlane.xlu2 %2492 }
0x190a   :  { %v2495_v10 = vmul.f32 %v2493_v9, %v3387_v17 }
0x190c   :  { %v2497_v36 = vsub.f32 %v2487_v8, %v2495_v10 }
0x190e   :  { %v2499_v12 = vmul.f32 %v2497_v36, %v2497_v36 }
0x1910   :  { %v2503_v11 = vsel %vm120_vm2, %v2499_v12, 0.0 }
0x1911   :  { %2504 = vadd.xlane.f32.xlu1 %v2503_v11 }
0x197c   :  { %v2502_v24 = vpop.xlane.xlu2 %2501 }
0x197d   :  { %v2506_v20 = vmul.f32 %v2502_v24, %v3387_v17  ;;  %v2616_v24 = vld [vmem:[%s4061_s9 + $0x18] sm:$0xff] }
0x197e   :  { %2637 = vmatpush.msrb.mxu2 %v2616_v24 }
0x197f   :  { %v2508_v13 = vadd.f32 1e-05, %v2506_v20  ;;  %v2615_v20 = vld [vmem:[%s4061_s9 + $0x10] sm:$0xff] }
0x1980   :  { %2638 = vmatpush.msrb.mxu2 %v2615_v20 }
0x1981   :  { %3094 = vrsqrt.f32 %v2508_v13  ;;  %vm2516_vm13 = vweird.f32 %v2508_v13 }
0x1984   :  { %v2505_v16 = vpop.xlane.xlu1 %2504 }
0x1985   :  { %v2507_v15 = vmul.f32 %v2505_v16, %v3387_v17  ;;  %v2613_v16 = vld [vmem:[%s4061_s9] sm:$0xff] }
0x1987   :  { %v3095_v18 = vpop.eup %3094  ;;  %v2509_v19 = vadd.f32 1e-05, %v2507_v15 }
0x1988   :  { %v2511_v21 = vmul.f32 %v3095_v18, %v2508_v13  ;;  %vm2517_vm12 = vweird.f32 %v3095_v18  ;;  %v2614_v13 = vld [vmem:[%s4061_s9 + $0x8] sm:$0xff] }
0x1989   :  { %3096 = vrsqrt.f32 %v2509_v19  ;;  %vm2518_vm14 = vmor %vm2516_vm13, %vm2517_vm12  ;;  %vm2526_vm0 = vweird.f32 %v2509_v19  ;;  %2639 = vmatpush.msrb.mxu2 %v2614_v13 }
0x198a   :  { %v2512_v22 = vmul.f32 %v3095_v18, %v2511_v21  ;;  %3098 = vrcp.f32 %v3133_v33 }
0x198b   :  { %2640 = vmatpush.msrb.mxu2 %v2613_v16 }
0x198c   :  { %v2513_v23 = vmul.f32 0.5, %v2512_v22 }
0x198e   :  { %v2514_v25 = vsub.f32 1.5, %v2513_v23 }
0x198f   :  { %v3097_v26 = vpop.eup %3096 }
0x1990   :  { %v2515_v27 = vmul.f32 %v3095_v18, %v2514_v25  ;;  %v2521_v28 = vmul.f32 %v3097_v26, %v2509_v19  ;;  %vm2527_vm15 = vweird.f32 %v3097_v26  ;;  %v3099_v42 = vpop.eup %3098 }
0x1991   :  { %vm2528_vm1 = vmor %vm2526_vm0, %vm2527_vm15  ;;  %v2553_v49 = vmul.f32 8.0, %v3099_v42  ;;  %vm2557_vm4 = vweird.f32 %v3099_v42 }
0x1992   :  { %v2519_v30 = vsel %vm2518_vm14, %v3095_v18, %v2515_v27  ;;  %v2522_v32 = vmul.f32 %v3097_v26, %v2521_v28 }
0x1993   :  { %v2530_v35 = vmul.f32 %v2519_v30, %v2496_v6  ;;  %v2554_v54 = vsub.f32 1.0, %v2553_v49 }
0x1994   :  { %v2523_v39 = vmul.f32 0.5, %v2522_v32 }
0x1995   :  { %v2533_v40 = vmul.f32 %v2971_v29, %v2530_v35  ;;  %v2555_v38 = vmul.f32 %v3099_v42, %v2554_v54  ;;  %v2974_v35 = vld [vmem:[%s4060_s8 + $0x1] ss:$0 sm:$0xff] }
0x1996   :  { %v2524_v46 = vsub.f32 1.5, %v2523_v39 }
0x1997   :  { %v2536_v41 = vadd.f32 %v2972_v34, %v2533_v40  ;;  %v2556_v61 = vadd.f32 %v3099_v42, %v2555_v38 }
0x1998   :  { %v2525_v43 = vmul.f32 %v3097_v26, %v2524_v46 }
0x1999   :  { %v2538_v44 = vsel %vm120_vm2, %v2536_v41, 0.0  ;;  %v2558_v5 = vsel %vm2557_vm4, %v3099_v42, %v2556_v61  ;;  %v2975_v42 = vld [vmem:[%s4061_s9 + $0x20] ss:$0 sm:$0xff] }
0x199a   :  { %v2529_v45 = vsel %vm2528_vm1, %v3097_v26, %v2525_v43  ;;  %v2539_v47 = vrot.slane %v2538_v44, 4 }
0x199b   :  { %v2531_v48 = vmul.f32 %v2529_v45, %v2497_v36 }
0x199c   :  { %v2540_v51 = vadd.f32 %v2539_v47, %v2538_v44 }
0x199d   :  { %v2534_v50 = vmul.f32 %v2971_v29, %v2531_v48  ;;  %v2973_v29 = vld [vmem:[%s4060_s8] ss:$0 sm:$0xff] }
0x199e   :  { %v2541_v52 = vrot.slane %v2540_v51, 2 }
0x199f   :  { %v2537_v53 = vadd.f32 %v2972_v34, %v2534_v50 }
0x19a0   :  { %v2542_v56 = vadd.f32 %v2541_v52, %v2540_v51 }
0x19a1   :  { %v2545_v55 = vsel %vm120_vm2, %v2537_v53, 0.0 }
0x19a2   :  { %v2546_v57 = vrot.slane %v2545_v55, 4  ;;  %v2543_v59 = vrot.slane %v2542_v56, 1 }
0x19a4   :  { %v2547_v58 = vadd.f32 %v2546_v57, %v2545_v55  ;;  %v2544_v63 = vadd.f32 %v2543_v59, %v2542_v56 }
0x19a6   :  { %v2548_v60 = vrot.slane %v2547_v58, 2  ;;  %v2559_v1 = vmul.f32 %v2558_v5, %v2544_v63 }
0x19a8   :  { %v2549_v62 = vadd.f32 %v2548_v60, %v2547_v58 }
0x19aa   :  { %v2550_v14 = vrot.slane %v2549_v62, 1 }
0x19ac   :  { %v2551_v0 = vadd.f32 %v2550_v14, %v2549_v62 }
0x19ae   :  { %v2560_v2 = vmul.f32 %v2558_v5, %v2551_v0 }
0x19b0   :  { %v2566_v8 = vsel %vm2565_vm6, %v2560_v2, %v2559_v1 }
0x19b1   :  { %v2569_v3 = vsel %vm2568_vm7, %v2566_v8, 0.0 }
0x19b2   :  { %2570 = vadd.xlane.f32.xlu2 %v2569_v3 }
0x1a25   :  { %v2571_v4 = vpop.xlane.xlu2 %2570 }
0x1a26   :  { %v2572_v31 = vmul.f32 %v2571_v4, %v3387_v17 }
0x1a28   :  { %v2574_v6 = vrot.slane %v2572_v31, 1  ;;  %v2577_v7 = vsub.f32 %v2559_v1, %v2572_v31 }
0x1a2a   :  { %v2578_v37 = vsub.f32 %v2560_v2, %v2574_v6  ;;  %v2579_v10 = vmul.f32 %v2577_v7, %v2577_v7 }
0x1a2c   :  { %v2580_v9 = vmul.f32 %v2578_v37, %v2578_v37 }
0x1a2e   :  { %v2583_v36 = vrot.slane %v2580_v9, 7 }
0x1a30   :  { %v2584_v12 = vsel %vm2565_vm6, %v2583_v36, %v2579_v10 }
0x1a31   :  { %v2586_v11 = vsel %vm2568_vm7, %v2584_v12, 0.0 }
0x1a32   :  { %2587 = vadd.xlane.f32.xlu0 %v2586_v11 }
0x1aa5   :  { %v2588_v15 = vpop.xlane.xlu0 %2587 }
0x1aa6   :  { %v2589_v18 = vmul.f32 %v2588_v15, %v3387_v17 }
0x1aa8   :  { %v2590_v19 = vadd.f32 1e-05, %v2589_v18 }
0x1aaa   :  { %3100 = vrsqrt.f32 %v2590_v19  ;;  %vm2597_vm5 = vweird.f32 %v2590_v19 }
0x1ab0   :  { %v3101_v21 = vpop.eup %3100 }
0x1ab1   :  { %v2592_v22 = vmul.f32 %v3101_v21, %v2590_v19  ;;  %vm2598_vm3 = vweird.f32 %v3101_v21 }
0x1ab2   :  { %vm2599_vm8 = vmor %vm2597_vm5, %vm2598_vm3 }
0x1ab3   :  { %v2593_v23 = vmul.f32 %v3101_v21, %v2592_v22 }
0x1ab5   :  { %v2594_v25 = vmul.f32 0.5, %v2593_v23 }
0x1ab7   :  { %v2595_v26 = vsub.f32 1.5, %v2594_v25 }
0x1ab9   :  { %v2596_v27 = vmul.f32 %v3101_v21, %v2595_v26 }
0x1abb   :  { %v2600_v28 = vsel %vm2599_vm8, %v3101_v21, %v2596_v27 }
0x1abc   :  { %v2602_v30 = vrot.slane %v2600_v28, 1  ;;  %v2605_v32 = vmul.f32 %v2600_v28, %v2577_v7 }
0x1abe   :  { %v2606_v17 = vmul.f32 %v2602_v30, %v2578_v37  ;;  %v2608_v33 = vmul.f32 %v2973_v29, %v2605_v32 }
0x1ac0   :  { %v2609_v34 = vmul.f32 %v2973_v29, %v2606_v17  ;;  %v2611_v40 = vadd.f32 %v2974_v35, %v2608_v33 }
0x1ac2   :  { %v2612_v39 = vadd.f32 %v2974_v35, %v2609_v34 }
0x1ac4   :  { %v2621_v46 = vrot.slane %v2612_v39, 7 }
0x1ac6   :  { %v2622_v41 = vsel %vm2565_vm6, %v2621_v46, %v2611_v40 }
0x1ac7   :  { %2890 = vmatmul.msk.f32.vlgmr.msrb.gmra.mxu2 %vm120_vm2, %v2622_v41 }
0x1b4a   :  { %v2642_v43 = vpop.f32.mrf.mxu2 }
0x1b4b   :  { %v2643_v44 = vadd.f32 %v2975_v42, %v2642_v43 }
0x1b4d   :  { %2646 = vst.msk [vmem:[#allocation2] sm:$0x3] %vm2645_vm9, %v2643_v44 }
0x1b4e   :  { %2657 = dma.vmem_to_hbm [thread:$0]  %s2653_s5, 32, %s2655_s2, [#allocation3]  }
0x1b4f   :  { %3126 = dma.done.wait [#allocation3], 32  }
0x1b50   :  { %3127 = vsyncadd [#allocation3], 4294967264 }
0x1b51   :  { %2662 = vsyncpa [#allocation3], 1 }

</bundles_post_ra>
